<compile_context>
chip_gen: v6e
topology: v6e:2x2x1
jax: 0.10.0
libtpu: 0.0.40
codegen_flags: <defaults>
</compile_context>

<pallas_src>
import functools
import math

import jax
import jax.numpy as jnp
import numpy as np
from jax.experimental import pallas as pl
from jax.experimental.pallas import tpu as pltpu


def _layer_norm(v, w, b, eps=1e-5):
    mu = jnp.mean(v, axis=-1, keepdims=True)
    var = jnp.mean((v - mu) ** 2, axis=-1, keepdims=True)
    return (v - mu) * jax.lax.rsqrt(var + eps) * w + b


def _gelu_exact(x):
    # nn.GELU() default: exact erf-based gelu.
    return 0.5 * x * (1.0 + jax.lax.erf(x * (1.0 / math.sqrt(2.0))))


def block_kernel(xf_ref,
                 ln1_w_ref, ln1_b_ref,
                 wq_ref, bq_ref, wk_ref, bk_ref, wv_ref, bv_ref,
                 wo_ref, bo_ref,
                 ln2_w_ref, ln2_b_ref,
                 w1_ref, b1_ref, w2_ref, b2_ref,
                 o_ref,
                 kh_ref, vh_ref, *, n_head, tq):
    # xf_ref: (S, D) full sequence of one batch element (resident across tiles).
    S, D = xf_ref.shape
    hd = D // n_head
    scale = 1.0 / math.sqrt(hd)
    i = pl.program_id(1)

    ln1_w = ln1_w_ref[...]
    ln1_b = ln1_b_ref[...]

    # ---- per-batch K/V cache: computed once per batch element ----------------
    @pl.when(i == 0)
    def _():
        xf = xf_ref[...].astype(jnp.float32)
        ln1_f = _layer_norm(xf, ln1_w, ln1_b).astype(jnp.bfloat16)
        k = (jnp.dot(ln1_f, wk_ref[...], preferred_element_type=jnp.float32)
             + bk_ref[...]).astype(jnp.bfloat16)
        v = (jnp.dot(ln1_f, wv_ref[...], preferred_element_type=jnp.float32)
             + bv_ref[...]).astype(jnp.bfloat16)
        # Cast to bf16 BEFORE the head relayout: half the vld/vst traffic.
        kh_ref[...] = jnp.swapaxes(k.reshape(S, n_head, hd), 0, 1)   # (H, S, hd)
        vh_ref[...] = jnp.swapaxes(v.reshape(S, n_head, hd), 0, 1)   # (H, S, hd)

    # ---- query tile: rows are already resident inside the full-seq block -----
    row0 = pl.multiple_of(i * tq, tq)
    xq = xf_ref[pl.ds(row0, tq), :].astype(jnp.float32)              # (TQ, D)

    ln1_q = _layer_norm(xq, ln1_w, ln1_b).astype(jnp.bfloat16)
    q = (jnp.dot(ln1_q, wq_ref[...], preferred_element_type=jnp.float32)
         + bq_ref[...]).astype(jnp.bfloat16)
    qh = jnp.swapaxes(q.reshape(tq, n_head, hd), 0, 1)               # (H, TQ, hd)

    s = jnp.einsum("hqd,hkd->hqk", qh, kh_ref[...],
                   preferred_element_type=jnp.float32) * scale       # (H, TQ, S)
    s = s - jnp.max(s, axis=-1, keepdims=True)                       # f32 softmax
    p = jnp.exp(s)
    p = p * pl.reciprocal(jnp.sum(p, axis=-1, keepdims=True), approx=True)

    ctx = jnp.einsum("hqk,hkd->hqd", p.astype(jnp.bfloat16), vh_ref[...],
                     preferred_element_type=jnp.float32)             # (H, TQ, hd)
    attn = jnp.swapaxes(ctx, 0, 1).reshape(tq, D)                    # (TQ, D)

    attn_out = jnp.dot(attn.astype(jnp.bfloat16), wo_ref[...],
                       preferred_element_type=jnp.float32) + bo_ref[...]
    x1 = xq + attn_out                                               # residual 1

    # ---- feed-forward sub-block (pre-norm) -----------------------------------
    ln2 = _layer_norm(x1, ln2_w_ref[...], ln2_b_ref[...]).astype(jnp.bfloat16)
    h1 = jnp.dot(ln2, w1_ref[...], preferred_element_type=jnp.float32) + b1_ref[...]
    g = _gelu_exact(h1)
    ff = jnp.dot(g.astype(jnp.bfloat16), w2_ref[...],
                 preferred_element_type=jnp.float32) + b2_ref[...]

    o_ref[...] = (x1 + ff).astype(o_ref.dtype)                       # residual 2


def _vmem_capacity_bytes():
    try:
        return int(pltpu.get_tpu_info().vmem_capacity_bytes)
    except Exception:
        return 64 * 1024 * 1024   # conservative: legal on every TPU generation


def _is_v5():
    try:
        return "v5" in jax.devices()[0].device_kind.lower()
    except Exception:
        return False


def _pick_tq(S, vmem_cap):
    if S <= 128:
        return S
    # 256-wide MXU chips (v6e/v7x) benefit from TQ=256; v5e (4x128x128) does not.
    if (S % 256 == 0) and (vmem_cap >= 96 * 1024 * 1024) and not _is_v5():
        return 256
    if S % 128 == 0:
        return 128
    for t in range(min(S, 128), 7, -1):
        if S % t == 0 and t % 8 == 0:
            return t
    return S   # irregular S: one tile covering the whole sequence


def _vmem_limit_bytes(S, tq, D, n_head, weight_buffers, vmem_cap):
    bf, f4 = 2, 4
    hd = D // n_head
    weights = weight_buffers * bf * 12 * D * D          # wq/wk/wv/wo + w1 + w2 (bf16)
    small = 2 * f4 * 16 * D                             # biases + LN params (f32, dbl buf)
    x_block = 2 * f4 * S * D                            # full-seq input (double buffered)
    out_blk = 2 * f4 * tq * D                           # output tile (double buffered)
    kv_scr = 2 * bf * n_head * S * max(hd, 128)         # bf16 K/V scratch (lane padding)
    acts = f4 * (2 * S * D                              # f32 k/v at tile 0
                 + 3 * n_head * tq * S                  # scores / softmax temporaries
                 + 3 * tq * 4 * D                       # FFN hidden (h1, gelu, bf16 copy)
                 + 8 * tq * D)                          # q / ln / attn / residual temps
    est = weights + small + x_block + out_blk + kv_scr + acts
    return int(min(int(0.85 * vmem_cap), max(32 * 1024 * 1024, 2 * est)))


def residual_attention_block(x, params, n_head):
    B, S, D = x.shape
    assert D % n_head == 0
    vmem_cap = _vmem_capacity_bytes()
    tq = _pick_tq(S, vmem_cap)
    assert S % tq == 0, "S must be a multiple of the query tile"
    nq = S // tq
    hd = D // n_head

    param_list = [
        params["ln1_w"], params["ln1_b"],
        params["wq"], params["bq"], params["wk"], params["bk"],
        params["wv"], params["bv"], params["wo"], params["bo"],
        params["ln2_w"], params["ln2_b"],
        params["w1"], params["b1"], params["w2"], params["b2"],
    ]

    def weight_spec(p, single_buffer):
        nd = p.ndim
        index_map = lambda b, i, _nd=nd: (0,) * _nd      # constant: never re-DMA'd
        if single_buffer and hasattr(pl, "Buffered"):
            try:
                # Single-buffer the constant weights: halves resident weight VMEM.
                return pl.BlockSpec(p.shape, index_map, pipeline_mode=pl.Buffered(1))
            except TypeError:
                pass
        return pl.BlockSpec(p.shape, index_map)

    kernel = functools.partial(block_kernel, n_head=n_head, tq=tq)

    def build(single_buffer):
        weight_buffers = 1 if single_buffer else 2
        return pl.pallas_call(
            kernel,
            out_shape=jax.ShapeDtypeStruct((B, S, D), x.dtype),
            grid=(B, nq),
            in_specs=[pl.BlockSpec((None, S, D), lambda b, i: (b, 0, 0))]   # full seq
                     + [weight_spec(p, single_buffer) for p in param_list],
            out_specs=pl.BlockSpec((None, tq, D), lambda b, i: (b, i, 0)),
            scratch_shapes=[pltpu.VMEM((n_head, S, hd), jnp.bfloat16),      # K cache
                            pltpu.VMEM((n_head, S, hd), jnp.bfloat16)],     # V cache
            compiler_params=pltpu.CompilerParams(
                # K/V scratch carries state across query tiles -> "arbitrary";
                # batch axis stays "parallel" for 2-TC sharding on v7x.
                dimension_semantics=("parallel", "arbitrary"),
                vmem_limit_bytes=_vmem_limit_bytes(
                    S, tq, D, n_head, weight_buffers, vmem_cap)),
        )

    try:
        return build(single_buffer=True)(x, *param_list)
    except Exception:
        # pl.Buffered(1) not supported in this runtime -> default double buffering.
        return build(single_buffer=False)(x, *param_list)


# ---------------- pure-JAX reference (for correctness check) -----------------
def reference(x, params, n_head):
    B, S, D = x.shape
    hd = D // n_head
    f32 = lambda name: params[name].astype(jnp.float32)
    xb = x.astype(jnp.float32)

    ln1 = _layer_norm(xb, f32("ln1_w"), f32("ln1_b"))
    q = ln1 @ f32("wq") + f32("bq")
    k = ln1 @ f32("wk") + f32("bk")
    v = ln1 @ f32("wv") + f32("bv")
    q = q.reshape(B, S, n_head, hd).transpose(0, 2, 1, 3)
    k = k.reshape(B, S, n_head, hd).transpose(0, 2, 1, 3)
    v = v.reshape(B, S, n_head, hd).transpose(0, 2, 1, 3)
    s = jnp.einsum("bhqd,bhkd->bhqk", q, k) / math.sqrt(hd)
    p = jax.nn.softmax(s, axis=-1)
    ctx = jnp.einsum("bhqk,bhkd->bhqd", p, v)
    attn = ctx.transpose(0, 2, 1, 3).reshape(B, S, D)
    attn_out = attn @ f32("wo") + f32("bo")
    x1 = xb + attn_out

    ln2 = _layer_norm(x1, f32("ln2_w"), f32("ln2_b"))
    h1 = ln2 @ f32("w1") + f32("b1")
    g = 0.5 * h1 * (1.0 + jax.lax.erf(h1 / math.sqrt(2.0)))
    ff = g @ f32("w2") + f32("b2")
    return x1 + ff


def init_params(key, d_model):
    D = d_model
    ks = jax.random.split(key, 12)
    s = 0.02
    bf = jnp.bfloat16
    # Matmul weights stored pre-transposed (in_features, out_features) in bf16;
    # biases / LayerNorm params stay f32 as 2-D (1, N) for clean VMEM layout.
    return {
        "ln1_w": jnp.ones((1, D), jnp.float32),
        "ln1_b": jnp.zeros((1, D), jnp.float32),
        "wq": (s * jax.random.normal(ks[0], (D, D), jnp.float32)).astype(bf),
        "bq": s * jax.random.normal(ks[1], (1, D), jnp.float32),
        "wk": (s * jax.random.normal(ks[2], (D, D), jnp.float32)).astype(bf),
        "bk": s * jax.random.normal(ks[3], (1, D), jnp.float32),
        "wv": (s * jax.random.normal(ks[4], (D, D), jnp.float32)).astype(bf),
        "bv": s * jax.random.normal(ks[5], (1, D), jnp.float32),
        "wo": (s * jax.random.normal(ks[6], (D, D), jnp.float32)).astype(bf),
        "bo": s * jax.random.normal(ks[7], (1, D), jnp.float32),
        "ln2_w": jnp.ones((1, D), jnp.float32),
        "ln2_b": jnp.zeros((1, D), jnp.float32),
        "w1": (s * jax.random.normal(ks[8], (D, 4 * D), jnp.float32)).astype(bf),
        "b1": s * jax.random.normal(ks[9], (1, 4 * D), jnp.float32),
        "w2": (s * jax.random.normal(ks[10], (4 * D, D), jnp.float32)).astype(bf),
        "b2": s * jax.random.normal(ks[11], (1, D), jnp.float32),
    }


if __name__ == "__main__":
    # TODO(synk): dropout layers are omitted (inference/eval semantics); only
    # the attention_mask=None / key_padding_mask=None path is implemented.
    configs = [
        (2, 8, 32, 4),      # tiny smoke test (single query tile)
        (1, 512, 256, 4),   # multi-query-tile path: exercises K/V scratch reuse
    ]
    key = jax.random.PRNGKey(0)
    for (B, S, D, H) in configs:
        key, k_x, k_p = jax.random.split(key, 3)
        x = jax.random.normal(k_x, (B, S, D), jnp.float32)
        params = init_params(k_p, D)

        out = jax.block_until_ready(residual_attention_block(x, params, H))
        ref = reference(x, params, H)
        # bf16 matmul operands (f32 accumulation) in the kernel vs f32 reference:
        # allow ~1e-2 combined tolerance.
        np.testing.assert_allclose(np.asarray(out), np.asarray(ref),
                                   rtol=1e-2, atol=1e-2)

    print("KERNEL_OK")
</pallas_src>

<mosaic_0001>
module attributes {stable_mosaic.version = 11 : i64} {
  func.func @block_kernel(%arg0: i32, %arg1: i32, %arg2: memref<1x8x32xf32, #tpu.memory_space<vmem>>, %arg3: memref<1x32xf32, #tpu.memory_space<vmem>>, %arg4: memref<1x32xf32, #tpu.memory_space<vmem>>, %arg5: memref<32x32xbf16, #tpu.memory_space<vmem>>, %arg6: memref<1x32xf32, #tpu.memory_space<vmem>>, %arg7: memref<32x32xbf16, #tpu.memory_space<vmem>>, %arg8: memref<1x32xf32, #tpu.memory_space<vmem>>, %arg9: memref<32x32xbf16, #tpu.memory_space<vmem>>, %arg10: memref<1x32xf32, #tpu.memory_space<vmem>>, %arg11: memref<32x32xbf16, #tpu.memory_space<vmem>>, %arg12: memref<1x32xf32, #tpu.memory_space<vmem>>, %arg13: memref<1x32xf32, #tpu.memory_space<vmem>>, %arg14: memref<1x32xf32, #tpu.memory_space<vmem>>, %arg15: memref<32x128xbf16, #tpu.memory_space<vmem>>, %arg16: memref<1x128xf32, #tpu.memory_space<vmem>>, %arg17: memref<128x32xbf16, #tpu.memory_space<vmem>>, %arg18: memref<1x32xf32, #tpu.memory_space<vmem>>, %arg19: memref<1x8x32xf32, #tpu.memory_space<vmem>>, %arg20: memref<4x8x8xbf16, #tpu.memory_space<vmem>>, %arg21: memref<4x8x8xbf16, #tpu.memory_space<vmem>>) attributes {dimension_semantics = [#tpu.dimension_semantics<parallel>, #tpu.dimension_semantics<arbitrary>], iteration_bounds = array<i64: 2, 1>, scalar_prefetch = 0 : i64, scratch_operands = 2 : i64, tpu.core_type = #tpu.core_type<tc>, window_params = [{transform_indices = @transform_0, window_bounds = array<i64: 1, 8, 32>}, {pipeline_mode = #tpu.pipeline_mode<synchronous>, transform_indices = @transform_1, window_bounds = array<i64: 1, 32>}, {pipeline_mode = #tpu.pipeline_mode<synchronous>, transform_indices = @transform_2, window_bounds = array<i64: 1, 32>}, {pipeline_mode = #tpu.pipeline_mode<synchronous>, transform_indices = @transform_3, window_bounds = array<i64: 32, 32>}, {pipeline_mode = #tpu.pipeline_mode<synchronous>, transform_indices = @transform_4, window_bounds = array<i64: 1, 32>}, {pipeline_mode = #tpu.pipeline_mode<synchronous>, transform_indices = @transform_5, window_bounds = array<i64: 32, 32>}, {pipeline_mode = #tpu.pipeline_mode<synchronous>, transform_indices = @transform_6, window_bounds = array<i64: 1, 32>}, {pipeline_mode = #tpu.pipeline_mode<synchronous>, transform_indices = @transform_7, window_bounds = array<i64: 32, 32>}, {pipeline_mode = #tpu.pipeline_mode<synchronous>, transform_indices = @transform_8, window_bounds = array<i64: 1, 32>}, {pipeline_mode = #tpu.pipeline_mode<synchronous>, transform_indices = @transform_9, window_bounds = array<i64: 32, 32>}, {pipeline_mode = #tpu.pipeline_mode<synchronous>, transform_indices = @transform_10, window_bounds = array<i64: 1, 32>}, {pipeline_mode = #tpu.pipeline_mode<synchronous>, transform_indices = @transform_11, window_bounds = array<i64: 1, 32>}, {pipeline_mode = #tpu.pipeline_mode<synchronous>, transform_indices = @transform_12, window_bounds = array<i64: 1, 32>}, {pipeline_mode = #tpu.pipeline_mode<synchronous>, transform_indices = @transform_13, window_bounds = array<i64: 32, 128>}, {pipeline_mode = #tpu.pipeline_mode<synchronous>, transform_indices = @transform_14, window_bounds = array<i64: 1, 128>}, {pipeline_mode = #tpu.pipeline_mode<synchronous>, transform_indices = @transform_15, window_bounds = array<i64: 128, 32>}, {pipeline_mode = #tpu.pipeline_mode<synchronous>, transform_indices = @transform_16, window_bounds = array<i64: 1, 32>}, {transform_indices = @transform_17, window_bounds = array<i64: 1, 8, 32>}]} {
    %c0 = arith.constant 0 : index
    %c0_0 = arith.constant 0 : index
    %0 = vector.load %arg3[%c0, %c0_0] : memref<1x32xf32, #tpu.memory_space<vmem>>, vector<1x32xf32>
    %c0_1 = arith.constant 0 : index
    %c0_2 = arith.constant 0 : index
    %1 = vector.load %arg4[%c0_1, %c0_2] : memref<1x32xf32, #tpu.memory_space<vmem>>, vector<1x32xf32>
    %c0_i32 = arith.constant 0 : i32
    %2 = arith.cmpi eq, %arg1, %c0_i32 : i32
    %3 = arith.extui %2 : i1 to i32
    %c0_i32_3 = arith.constant 0 : i32
    %4 = arith.cmpi ne, %3, %c0_i32_3 : i32
    scf.if %4 {
      %c0_56 = arith.constant 0 : index
      %c0_57 = arith.constant 0 : index
      %c0_58 = arith.constant 0 : index
      %115 = vector.load %arg2[%c0_56, %c0_57, %c0_58] : memref<1x8x32xf32, #tpu.memory_space<vmem>>, vector<1x8x32xf32>
      %116 = vector.shape_cast %115 : vector<1x8x32xf32> to vector<8x32xf32>
      %cst_59 = arith.constant dense<0.000000e+00> : vector<8xf32>
      %117 = vector.multi_reduction <add>, %116, %cst_59 [1] : vector<8x32xf32> to vector<8xf32>
      %118 = vector.shape_cast %117 : vector<8xf32> to vector<8x1xf32>
      %cst_60 = arith.constant 3.200000e+01 : f32
      %119 = vector.broadcast %cst_60 : f32 to vector<8x1xf32>
      %120 = arith.divf %118, %119 : vector<8x1xf32>
      %121 = vector.broadcast %120 : vector<8x1xf32> to vector<8x32xf32>
      %122 = arith.subf %116, %121 : vector<8x32xf32>
      %123 = arith.mulf %122, %122 : vector<8x32xf32>
      %cst_61 = arith.constant dense<0.000000e+00> : vector<8xf32>
      %124 = vector.multi_reduction <add>, %123, %cst_61 [1] : vector<8x32xf32> to vector<8xf32>
      %125 = vector.shape_cast %124 : vector<8xf32> to vector<8x1xf32>
      %cst_62 = arith.constant 3.200000e+01 : f32
      %126 = vector.broadcast %cst_62 : f32 to vector<8x1xf32>
      %127 = arith.divf %125, %126 : vector<8x1xf32>
      %128 = vector.broadcast %120 : vector<8x1xf32> to vector<8x32xf32>
      %129 = arith.subf %116, %128 : vector<8x32xf32>
      %cst_63 = arith.constant 9.99999974E-6 : f32
      %130 = vector.broadcast %cst_63 : f32 to vector<8x1xf32>
      %131 = arith.addf %127, %130 : vector<8x1xf32>
      %132 = math.rsqrt %131 : vector<8x1xf32>
      %133 = vector.broadcast %132 : vector<8x1xf32> to vector<8x32xf32>
      %134 = arith.mulf %129, %133 : vector<8x32xf32>
      %135 = vector.broadcast %0 : vector<1x32xf32> to vector<8x32xf32>
      %136 = arith.mulf %134, %135 : vector<8x32xf32>
      %137 = vector.broadcast %1 : vector<1x32xf32> to vector<8x32xf32>
      %138 = arith.addf %136, %137 : vector<8x32xf32>
      %139 = arith.truncf %138 : vector<8x32xf32> to vector<8x32xbf16>
      %c0_64 = arith.constant 0 : index
      %c0_65 = arith.constant 0 : index
      %140 = vector.load %arg7[%c0_64, %c0_65] : memref<32x32xbf16, #tpu.memory_space<vmem>>, vector<32x32xbf16>
      %cst_66 = arith.constant dense<0.000000e+00> : vector<8x32xf32>
      %141 = tpu.matmul %139, %140, %cst_66 {dimension_numbers = #tpu.dot_dimension_numbers<[1], [0], [0], [1], [0, 0, 1, 1], [], []>} : vector<8x32xbf16>, vector<32x32xbf16>, vector<8x32xf32> -> vector<8x32xf32>
      %c0_67 = arith.constant 0 : index
      %c0_68 = arith.constant 0 : index
      %142 = vector.load %arg8[%c0_67, %c0_68] : memref<1x32xf32, #tpu.memory_space<vmem>>, vector<1x32xf32>
      %143 = vector.broadcast %142 : vector<1x32xf32> to vector<8x32xf32>
      %144 = arith.addf %141, %143 : vector<8x32xf32>
      %145 = arith.truncf %144 : vector<8x32xf32> to vector<8x32xbf16>
      %c0_69 = arith.constant 0 : index
      %c0_70 = arith.constant 0 : index
      %146 = vector.load %arg9[%c0_69, %c0_70] : memref<32x32xbf16, #tpu.memory_space<vmem>>, vector<32x32xbf16>
      %cst_71 = arith.constant dense<0.000000e+00> : vector<8x32xf32>
      %147 = tpu.matmul %139, %146, %cst_71 {dimension_numbers = #tpu.dot_dimension_numbers<[1], [0], [0], [1], [0, 0, 1, 1], [], []>} : vector<8x32xbf16>, vector<32x32xbf16>, vector<8x32xf32> -> vector<8x32xf32>
      %c0_72 = arith.constant 0 : index
      %c0_73 = arith.constant 0 : index
      %148 = vector.load %arg10[%c0_72, %c0_73] : memref<1x32xf32, #tpu.memory_space<vmem>>, vector<1x32xf32>
      %149 = vector.broadcast %148 : vector<1x32xf32> to vector<8x32xf32>
      %150 = arith.addf %147, %149 : vector<8x32xf32>
      %151 = arith.truncf %150 : vector<8x32xf32> to vector<8x32xbf16>
      %152 = vector.shape_cast %145 : vector<8x32xbf16> to vector<8x4x8xbf16>
      %153 = tpu.transpose %152, [1, 0, 2] : vector<8x4x8xbf16> -> vector<4x8x8xbf16>
      %c0_74 = arith.constant 0 : index
      %c0_75 = arith.constant 0 : index
      %c0_76 = arith.constant 0 : index
      %154 = vector.load %arg20[%c0_74, %c0_75, %c0_76] : memref<4x8x8xbf16, #tpu.memory_space<vmem>>, vector<4x8x8xbf16>
      tpu.vector_store %arg20[%c0_74, %c0_75, %c0_76], %153 {strides = array<i32>} : memref<4x8x8xbf16, #tpu.memory_space<vmem>>, vector<4x8x8xbf16>,
      %155 = vector.shape_cast %151 : vector<8x32xbf16> to vector<8x4x8xbf16>
      %156 = tpu.transpose %155, [1, 0, 2] : vector<8x4x8xbf16> -> vector<4x8x8xbf16>
      %c0_77 = arith.constant 0 : index
      %c0_78 = arith.constant 0 : index
      %c0_79 = arith.constant 0 : index
      %157 = vector.load %arg21[%c0_77, %c0_78, %c0_79] : memref<4x8x8xbf16, #tpu.memory_space<vmem>>, vector<4x8x8xbf16>
      tpu.vector_store %arg21[%c0_77, %c0_78, %c0_79], %156 {strides = array<i32>} : memref<4x8x8xbf16, #tpu.memory_space<vmem>>, vector<4x8x8xbf16>,
    } else {
    }
    %c8_i32 = arith.constant 8 : i32
    %5 = arith.muli %arg1, %c8_i32 : i32
    %6 = tpu.assume_multiple %5, 8 : i32
    %c0_4 = arith.constant 0 : index
    %7 = arith.index_cast %6 : i32 to index
    %c0_5 = arith.constant 0 : index
    %8 = vector.load %arg2[%c0_4, %7, %c0_5] : memref<1x8x32xf32, #tpu.memory_space<vmem>>, vector<1x8x32xf32>
    %9 = vector.shape_cast %8 : vector<1x8x32xf32> to vector<8x32xf32>
    %cst = arith.constant dense<0.000000e+00> : vector<8xf32>
    %10 = vector.multi_reduction <add>, %9, %cst [1] : vector<8x32xf32> to vector<8xf32>
    %11 = vector.shape_cast %10 : vector<8xf32> to vector<8x1xf32>
    %cst_6 = arith.constant 3.200000e+01 : f32
    %12 = vector.broadcast %cst_6 : f32 to vector<8x1xf32>
    %13 = arith.divf %11, %12 : vector<8x1xf32>
    %14 = vector.broadcast %13 : vector<8x1xf32> to vector<8x32xf32>
    %15 = arith.subf %9, %14 : vector<8x32xf32>
    %16 = arith.mulf %15, %15 : vector<8x32xf32>
    %cst_7 = arith.constant dense<0.000000e+00> : vector<8xf32>
    %17 = vector.multi_reduction <add>, %16, %cst_7 [1] : vector<8x32xf32> to vector<8xf32>
    %18 = vector.shape_cast %17 : vector<8xf32> to vector<8x1xf32>
    %cst_8 = arith.constant 3.200000e+01 : f32
    %19 = vector.broadcast %cst_8 : f32 to vector<8x1xf32>
    %20 = arith.divf %18, %19 : vector<8x1xf32>
    %21 = vector.broadcast %13 : vector<8x1xf32> to vector<8x32xf32>
    %22 = arith.subf %9, %21 : vector<8x32xf32>
    %cst_9 = arith.constant 9.99999974E-6 : f32
    %23 = vector.broadcast %cst_9 : f32 to vector<8x1xf32>
    %24 = arith.addf %20, %23 : vector<8x1xf32>
    %25 = math.rsqrt %24 : vector<8x1xf32>
    %26 = vector.broadcast %25 : vector<8x1xf32> to vector<8x32xf32>
    %27 = arith.mulf %22, %26 : vector<8x32xf32>
    %28 = vector.broadcast %0 : vector<1x32xf32> to vector<8x32xf32>
    %29 = arith.mulf %27, %28 : vector<8x32xf32>
    %30 = vector.broadcast %1 : vector<1x32xf32> to vector<8x32xf32>
    %31 = arith.addf %29, %30 : vector<8x32xf32>
    %32 = arith.truncf %31 : vector<8x32xf32> to vector<8x32xbf16>
    %c0_10 = arith.constant 0 : index
    %c0_11 = arith.constant 0 : index
    %33 = vector.load %arg5[%c0_10, %c0_11] : memref<32x32xbf16, #tpu.memory_space<vmem>>, vector<32x32xbf16>
    %cst_12 = arith.constant dense<0.000000e+00> : vector<8x32xf32>
    %34 = tpu.matmul %32, %33, %cst_12 {dimension_numbers = #tpu.dot_dimension_numbers<[1], [0], [0], [1], [0, 0, 1, 1], [], []>} : vector<8x32xbf16>, vector<32x32xbf16>, vector<8x32xf32> -> vector<8x32xf32>
    %c0_13 = arith.constant 0 : index
    %c0_14 = arith.constant 0 : index
    %35 = vector.load %arg6[%c0_13, %c0_14] : memref<1x32xf32, #tpu.memory_space<vmem>>, vector<1x32xf32>
    %36 = vector.broadcast %35 : vector<1x32xf32> to vector<8x32xf32>
    %37 = arith.addf %34, %36 : vector<8x32xf32>
    %38 = arith.truncf %37 : vector<8x32xf32> to vector<8x32xbf16>
    %39 = vector.shape_cast %38 : vector<8x32xbf16> to vector<8x4x8xbf16>
    %40 = tpu.transpose %39, [1, 0, 2] : vector<8x4x8xbf16> -> vector<4x8x8xbf16>
    %c0_15 = arith.constant 0 : index
    %c0_16 = arith.constant 0 : index
    %c0_17 = arith.constant 0 : index
    %41 = vector.load %arg20[%c0_15, %c0_16, %c0_17] : memref<4x8x8xbf16, #tpu.memory_space<vmem>>, vector<4x8x8xbf16>
    "tpu.trace_start"() <{level = 10 : i32, message = "hqd,hkd->hqk"}> : () -> ()
    %cst_18 = arith.constant dense<0.000000e+00> : vector<4x8x8xf32>
    %42 = tpu.matmul %40, %41, %cst_18 {dimension_numbers = #tpu.dot_dimension_numbers<[2], [2], [1], [1], [0, 0, 0, 1, 1, 1], [0], [0]>} : vector<4x8x8xbf16>, vector<4x8x8xbf16>, vector<4x8x8xf32> -> vector<4x8x8xf32>
    "tpu.trace_stop"() : () -> ()
    %cst_19 = arith.constant 0.353553385 : f32
    %43 = vector.broadcast %cst_19 : f32 to vector<4x8x8xf32>
    %44 = arith.mulf %42, %43 : vector<4x8x8xf32>
    %cst_20 = arith.constant dense<0xFF800000> : vector<4x8xf32>
    %45 = vector.multi_reduction <maximumf>, %44, %cst_20 [2] : vector<4x8x8xf32> to vector<4x8xf32>
    %46 = vector.shape_cast %45 : vector<4x8xf32> to vector<4x8x1xf32>
    %47 = vector.broadcast %46 : vector<4x8x1xf32> to vector<4x8x8xf32>
    %48 = arith.subf %44, %47 : vector<4x8x8xf32>
    %49 = math.exp %48 : vector<4x8x8xf32>
    %cst_21 = arith.constant dense<0.000000e+00> : vector<4x8xf32>
    %50 = vector.multi_reduction <add>, %49, %cst_21 [2] : vector<4x8x8xf32> to vector<4x8xf32>
    %51 = vector.shape_cast %50 : vector<4x8xf32> to vector<4x8x1xf32>
    %52 = tpu.reciprocal %51 {approx = true} : vector<4x8x1xf32> -> vector<4x8x1xf32>
    %53 = vector.broadcast %52 : vector<4x8x1xf32> to vector<4x8x8xf32>
    %54 = arith.mulf %49, %53 : vector<4x8x8xf32>
    %55 = arith.truncf %54 : vector<4x8x8xf32> to vector<4x8x8xbf16>
    %c0_22 = arith.constant 0 : index
    %c0_23 = arith.constant 0 : index
    %c0_24 = arith.constant 0 : index
    %56 = vector.load %arg21[%c0_22, %c0_23, %c0_24] : memref<4x8x8xbf16, #tpu.memory_space<vmem>>, vector<4x8x8xbf16>
    "tpu.trace_start"() <{level = 10 : i32, message = "hqk,hkd->hqd"}> : () -> ()
    %cst_25 = arith.constant dense<0.000000e+00> : vector<4x8x8xf32>
    %57 = tpu.matmul %55, %56, %cst_25 {dimension_numbers = #tpu.dot_dimension_numbers<[2], [1], [1], [2], [0, 0, 0, 1, 1, 2], [0], [0]>} : vector<4x8x8xbf16>, vector<4x8x8xbf16>, vector<4x8x8xf32> -> vector<4x8x8xf32>
    "tpu.trace_stop"() : () -> ()
    %58 = tpu.transpose %57, [1, 0, 2] : vector<4x8x8xf32> -> vector<8x4x8xf32>
    %59 = vector.shape_cast %58 : vector<8x4x8xf32> to vector<8x32xf32>
    %60 = arith.truncf %59 : vector<8x32xf32> to vector<8x32xbf16>
    %c0_26 = arith.constant 0 : index
    %c0_27 = arith.constant 0 : index
    %61 = vector.load %arg11[%c0_26, %c0_27] : memref<32x32xbf16, #tpu.memory_space<vmem>>, vector<32x32xbf16>
    %cst_28 = arith.constant dense<0.000000e+00> : vector<8x32xf32>
    %62 = tpu.matmul %60, %61, %cst_28 {dimension_numbers = #tpu.dot_dimension_numbers<[1], [0], [0], [1], [0, 0, 1, 1], [], []>} : vector<8x32xbf16>, vector<32x32xbf16>, vector<8x32xf32> -> vector<8x32xf32>
    %c0_29 = arith.constant 0 : index
    %c0_30 = arith.constant 0 : index
    %63 = vector.load %arg12[%c0_29, %c0_30] : memref<1x32xf32, #tpu.memory_space<vmem>>, vector<1x32xf32>
    %64 = vector.broadcast %63 : vector<1x32xf32> to vector<8x32xf32>
    %65 = arith.addf %62, %64 : vector<8x32xf32>
    %66 = arith.addf %9, %65 : vector<8x32xf32>
    %c0_31 = arith.constant 0 : index
    %c0_32 = arith.constant 0 : index
    %67 = vector.load %arg13[%c0_31, %c0_32] : memref<1x32xf32, #tpu.memory_space<vmem>>, vector<1x32xf32>
    %c0_33 = arith.constant 0 : index
    %c0_34 = arith.constant 0 : index
    %68 = vector.load %arg14[%c0_33, %c0_34] : memref<1x32xf32, #tpu.memory_space<vmem>>, vector<1x32xf32>
    %cst_35 = arith.constant dense<0.000000e+00> : vector<8xf32>
    %69 = vector.multi_reduction <add>, %66, %cst_35 [1] : vector<8x32xf32> to vector<8xf32>
    %70 = vector.shape_cast %69 : vector<8xf32> to vector<8x1xf32>
    %cst_36 = arith.constant 3.200000e+01 : f32
    %71 = vector.broadcast %cst_36 : f32 to vector<8x1xf32>
    %72 = arith.divf %70, %71 : vector<8x1xf32>
    %73 = vector.broadcast %72 : vector<8x1xf32> to vector<8x32xf32>
    %74 = arith.subf %66, %73 : vector<8x32xf32>
    %75 = arith.mulf %74, %74 : vector<8x32xf32>
    %cst_37 = arith.constant dense<0.000000e+00> : vector<8xf32>
    %76 = vector.multi_reduction <add>, %75, %cst_37 [1] : vector<8x32xf32> to vector<8xf32>
    %77 = vector.shape_cast %76 : vector<8xf32> to vector<8x1xf32>
    %cst_38 = arith.constant 3.200000e+01 : f32
    %78 = vector.broadcast %cst_38 : f32 to vector<8x1xf32>
    %79 = arith.divf %77, %78 : vector<8x1xf32>
    %80 = vector.broadcast %72 : vector<8x1xf32> to vector<8x32xf32>
    %81 = arith.subf %66, %80 : vector<8x32xf32>
    %cst_39 = arith.constant 9.99999974E-6 : f32
    %82 = vector.broadcast %cst_39 : f32 to vector<8x1xf32>
    %83 = arith.addf %79, %82 : vector<8x1xf32>
    %84 = math.rsqrt %83 : vector<8x1xf32>
    %85 = vector.broadcast %84 : vector<8x1xf32> to vector<8x32xf32>
    %86 = arith.mulf %81, %85 : vector<8x32xf32>
    %87 = vector.broadcast %67 : vector<1x32xf32> to vector<8x32xf32>
    %88 = arith.mulf %86, %87 : vector<8x32xf32>
    %89 = vector.broadcast %68 : vector<1x32xf32> to vector<8x32xf32>
    %90 = arith.addf %88, %89 : vector<8x32xf32>
    %91 = arith.truncf %90 : vector<8x32xf32> to vector<8x32xbf16>
    %c0_40 = arith.constant 0 : index
    %c0_41 = arith.constant 0 : index
    %92 = vector.load %arg15[%c0_40, %c0_41] : memref<32x128xbf16, #tpu.memory_space<vmem>>, vector<32x128xbf16>
    %cst_42 = arith.constant dense<0.000000e+00> : vector<8x128xf32>
    %93 = tpu.matmul %91, %92, %cst_42 {dimension_numbers = #tpu.dot_dimension_numbers<[1], [0], [0], [1], [0, 0, 1, 1], [], []>} : vector<8x32xbf16>, vector<32x128xbf16>, vector<8x128xf32> -> vector<8x128xf32>
    %c0_43 = arith.constant 0 : index
    %c0_44 = arith.constant 0 : index
    %94 = vector.load %arg16[%c0_43, %c0_44] : memref<1x128xf32, #tpu.memory_space<vmem>>, vector<1x128xf32>
    %95 = vector.broadcast %94 : vector<1x128xf32> to vector<8x128xf32>
    %96 = arith.addf %93, %95 : vector<8x128xf32>
    %cst_45 = arith.constant 5.000000e-01 : f32
    %97 = vector.broadcast %cst_45 : f32 to vector<8x128xf32>
    %98 = arith.mulf %97, %96 : vector<8x128xf32>
    %cst_46 = arith.constant 0.707106769 : f32
    %99 = vector.broadcast %cst_46 : f32 to vector<8x128xf32>
    %100 = arith.mulf %96, %99 : vector<8x128xf32>
    %101 = math.erf %100 : vector<8x128xf32>
    %cst_47 = arith.constant 1.000000e+00 : f32
    %102 = vector.broadcast %cst_47 : f32 to vector<8x128xf32>
    %103 = arith.addf %102, %101 : vector<8x128xf32>
    %104 = arith.mulf %98, %103 : vector<8x128xf32>
    %105 = arith.truncf %104 : vector<8x128xf32> to vector<8x128xbf16>
    %c0_48 = arith.constant 0 : index
    %c0_49 = arith.constant 0 : index
    %106 = vector.load %arg17[%c0_48, %c0_49] : memref<128x32xbf16, #tpu.memory_space<vmem>>, vector<128x32xbf16>
    %cst_50 = arith.constant dense<0.000000e+00> : vector<8x32xf32>
    %107 = tpu.matmul %105, %106, %cst_50 {dimension_numbers = #tpu.dot_dimension_numbers<[1], [0], [0], [1], [0, 0, 1, 1], [], []>} : vector<8x128xbf16>, vector<128x32xbf16>, vector<8x32xf32> -> vector<8x32xf32>
    %c0_51 = arith.constant 0 : index
    %c0_52 = arith.constant 0 : index
    %108 = vector.load %arg18[%c0_51, %c0_52] : memref<1x32xf32, #tpu.memory_space<vmem>>, vector<1x32xf32>
    %109 = vector.broadcast %108 : vector<1x32xf32> to vector<8x32xf32>
    %110 = arith.addf %107, %109 : vector<8x32xf32>
    %111 = arith.addf %66, %110 : vector<8x32xf32>
    %c0_53 = arith.constant 0 : index
    %c0_54 = arith.constant 0 : index
    %c0_55 = arith.constant 0 : index
    %112 = vector.load %arg19[%c0_53, %c0_54, %c0_55] : memref<1x8x32xf32, #tpu.memory_space<vmem>>, vector<1x8x32xf32>
    %113 = vector.shape_cast %112 : vector<1x8x32xf32> to vector<8x32xf32>
    %114 = vector.shape_cast %111 : vector<8x32xf32> to vector<1x8x32xf32>
    tpu.vector_store %arg19[%c0_53, %c0_54, %c0_55], %114 {strides = array<i32>} : memref<1x8x32xf32, #tpu.memory_space<vmem>>, vector<1x8x32xf32>,
    return
  }
  func.func @transform_0(%arg0: i32, %arg1: i32) -> (i32, i32, i32) {
    %c0_i32 = arith.constant 0 : i32
    %c0_i32_0 = arith.constant 0 : i32
    %c0_i32_1 = arith.constant 0 : i32
    return %arg0, %c0_i32, %c0_i32_0 : i32, i32, i32
  }
  func.func @transform_1(%arg0: i32, %arg1: i32) -> (i32, i32) {
    %c0_i32 = arith.constant 0 : i32
    %c0_i32_0 = arith.constant 0 : i32
    %c0_i32_1 = arith.constant 0 : i32
    return %c0_i32, %c0_i32_0 : i32, i32
  }
  func.func @transform_2(%arg0: i32, %arg1: i32) -> (i32, i32) {
    %c0_i32 = arith.constant 0 : i32
    %c0_i32_0 = arith.constant 0 : i32
    %c0_i32_1 = arith.constant 0 : i32
    return %c0_i32, %c0_i32_0 : i32, i32
  }
  func.func @transform_3(%arg0: i32, %arg1: i32) -> (i32, i32) {
    %c0_i32 = arith.constant 0 : i32
    %c0_i32_0 = arith.constant 0 : i32
    %c0_i32_1 = arith.constant 0 : i32
    return %c0_i32, %c0_i32_0 : i32, i32
  }
  func.func @transform_4(%arg0: i32, %arg1: i32) -> (i32, i32) {
    %c0_i32 = arith.constant 0 : i32
    %c0_i32_0 = arith.constant 0 : i32
    %c0_i32_1 = arith.constant 0 : i32
    return %c0_i32, %c0_i32_0 : i32, i32
  }
  func.func @transform_5(%arg0: i32, %arg1: i32) -> (i32, i32) {
    %c0_i32 = arith.constant 0 : i32
    %c0_i32_0 = arith.constant 0 : i32
    %c0_i32_1 = arith.constant 0 : i32
    return %c0_i32, %c0_i32_0 : i32, i32
  }
  func.func @transform_6(%arg0: i32, %arg1: i32) -> (i32, i32) {
    %c0_i32 = arith.constant 0 : i32
    %c0_i32_0 = arith.constant 0 : i32
    %c0_i32_1 = arith.constant 0 : i32
    return %c0_i32, %c0_i32_0 : i32, i32
  }
  func.func @transform_7(%arg0: i32, %arg1: i32) -> (i32, i32) {
    %c0_i32 = arith.constant 0 : i32
    %c0_i32_0 = arith.constant 0 : i32
    %c0_i32_1 = arith.constant 0 : i32
    return %c0_i32, %c0_i32_0 : i32, i32
  }
  func.func @transform_8(%arg0: i32, %arg1: i32) -> (i32, i32) {
    %c0_i32 = arith.constant 0 : i32
    %c0_i32_0 = arith.constant 0 : i32
    %c0_i32_1 = arith.constant 0 : i32
    return %c0_i32, %c0_i32_0 : i32, i32
  }
  func.func @transform_9(%arg0: i32, %arg1: i32) -> (i32, i32) {
    %c0_i32 = arith.constant 0 : i32
    %c0_i32_0 = arith.constant 0 : i32
    %c0_i32_1 = arith.constant 0 : i32
    return %c0_i32, %c0_i32_0 : i32, i32
  }
  func.func @transform_10(%arg0: i32, %arg1: i32) -> (i32, i32) {
    %c0_i32 = arith.constant 0 : i32
    %c0_i32_0 = arith.constant 0 : i32
    %c0_i32_1 = arith.constant 0 : i32
    return %c0_i32, %c0_i32_0 : i32, i32
  }
  func.func @transform_11(%arg0: i32, %arg1: i32) -> (i32, i32) {
    %c0_i32 = arith.constant 0 : i32
    %c0_i32_0 = arith.constant 0 : i32
    %c0_i32_1 = arith.constant 0 : i32
    return %c0_i32, %c0_i32_0 : i32, i32
  }
  func.func @transform_12(%arg0: i32, %arg1: i32) -> (i32, i32) {
    %c0_i32 = arith.constant 0 : i32
    %c0_i32_0 = arith.constant 0 : i32
    %c0_i32_1 = arith.constant 0 : i32
    return %c0_i32, %c0_i32_0 : i32, i32
  }
  func.func @transform_13(%arg0: i32, %arg1: i32) -> (i32, i32) {
    %c0_i32 = arith.constant 0 : i32
    %c0_i32_0 = arith.constant 0 : i32
    %c0_i32_1 = arith.constant 0 : i32
    return %c0_i32, %c0_i32_0 : i32, i32
  }
  func.func @transform_14(%arg0: i32, %arg1: i32) -> (i32, i32) {
    %c0_i32 = arith.constant 0 : i32
    %c0_i32_0 = arith.constant 0 : i32
    %c0_i32_1 = arith.constant 0 : i32
    return %c0_i32, %c0_i32_0 : i32, i32
  }
  func.func @transform_15(%arg0: i32, %arg1: i32) -> (i32, i32) {
    %c0_i32 = arith.constant 0 : i32
    %c0_i32_0 = arith.constant 0 : i32
    %c0_i32_1 = arith.constant 0 : i32
    return %c0_i32, %c0_i32_0 : i32, i32
  }
  func.func @transform_16(%arg0: i32, %arg1: i32) -> (i32, i32) {
    %c0_i32 = arith.constant 0 : i32
    %c0_i32_0 = arith.constant 0 : i32
    %c0_i32_1 = arith.constant 0 : i32
    return %c0_i32, %c0_i32_0 : i32, i32
  }
  func.func @transform_17(%arg0: i32, %arg1: i32) -> (i32, i32, i32) {
    %c0_i32 = arith.constant 0 : i32
    %c0_i32_0 = arith.constant 0 : i32
    return %arg0, %arg1, %c0_i32 : i32, i32, i32
  }
}

module attributes {stable_mosaic.version = 11 : i64} {
  func.func @block_kernel(%arg0: i32, %arg1: i32, %arg2: memref<1x8x32xf32, #tpu.memory_space<vmem>>, %arg3: memref<1x32xf32, #tpu.memory_space<vmem>>, %arg4: memref<1x32xf32, #tpu.memory_space<vmem>>, %arg5: memref<32x32xbf16, #tpu.memory_space<vmem>>, %arg6: memref<1x32xf32, #tpu.memory_space<vmem>>, %arg7: memref<32x32xbf16, #tpu.memory_space<vmem>>, %arg8: memref<1x32xf32, #tpu.memory_space<vmem>>, %arg9: memref<32x32xbf16, #tpu.memory_space<vmem>>, %arg10: memref<1x32xf32, #tpu.memory_space<vmem>>, %arg11: memref<32x32xbf16, #tpu.memory_space<vmem>>, %arg12: memref<1x32xf32, #tpu.memory_space<vmem>>, %arg13: memref<1x32xf32, #tpu.memory_space<vmem>>, %arg14: memref<1x32xf32, #tpu.memory_space<vmem>>, %arg15: memref<32x128xbf16, #tpu.memory_space<vmem>>, %arg16: memref<1x128xf32, #tpu.memory_space<vmem>>, %arg17: memref<128x32xbf16, #tpu.memory_space<vmem>>, %arg18: memref<1x32xf32, #tpu.memory_space<vmem>>, %arg19: memref<1x8x32xf32, #tpu.memory_space<vmem>>, %arg20: memref<4x8x8xbf16, #tpu.memory_space<vmem>>, %arg21: memref<4x8x8xbf16, #tpu.memory_space<vmem>>) attributes {dimension_semantics = [#tpu.dimension_semantics<parallel>, #tpu.dimension_semantics<arbitrary>], iteration_bounds = array<i64: 2, 1>, scalar_prefetch = 0 : i64, scratch_operands = 2 : i64, tpu.core_type = #tpu.core_type<tc>, window_params = [{transform_indices = @transform_0, window_bounds = array<i64: 1, 8, 32>}, {pipeline_mode = #tpu.pipeline_mode<synchronous>, transform_indices = @transform_1, window_bounds = array<i64: 1, 32>}, {pipeline_mode = #tpu.pipeline_mode<synchronous>, transform_indices = @transform_2, window_bounds = array<i64: 1, 32>}, {pipeline_mode = #tpu.pipeline_mode<synchronous>, transform_indices = @transform_3, window_bounds = array<i64: 32, 32>}, {pipeline_mode = #tpu.pipeline_mode<synchronous>, transform_indices = @transform_4, window_bounds = array<i64: 1, 32>}, {pipeline_mode = #tpu.pipeline_mode<synchronous>, transform_indices = @transform_5, window_bounds = array<i64: 32, 32>}, {pipeline_mode = #tpu.pipeline_mode<synchronous>, transform_indices = @transform_6, window_bounds = array<i64: 1, 32>}, {pipeline_mode = #tpu.pipeline_mode<synchronous>, transform_indices = @transform_7, window_bounds = array<i64: 32, 32>}, {pipeline_mode = #tpu.pipeline_mode<synchronous>, transform_indices = @transform_8, window_bounds = array<i64: 1, 32>}, {pipeline_mode = #tpu.pipeline_mode<synchronous>, transform_indices = @transform_9, window_bounds = array<i64: 32, 32>}, {pipeline_mode = #tpu.pipeline_mode<synchronous>, transform_indices = @transform_10, window_bounds = array<i64: 1, 32>}, {pipeline_mode = #tpu.pipeline_mode<synchronous>, transform_indices = @transform_11, window_bounds = array<i64: 1, 32>}, {pipeline_mode = #tpu.pipeline_mode<synchronous>, transform_indices = @transform_12, window_bounds = array<i64: 1, 32>}, {pipeline_mode = #tpu.pipeline_mode<synchronous>, transform_indices = @transform_13, window_bounds = array<i64: 32, 128>}, {pipeline_mode = #tpu.pipeline_mode<synchronous>, transform_indices = @transform_14, window_bounds = array<i64: 1, 128>}, {pipeline_mode = #tpu.pipeline_mode<synchronous>, transform_indices = @transform_15, window_bounds = array<i64: 128, 32>}, {pipeline_mode = #tpu.pipeline_mode<synchronous>, transform_indices = @transform_16, window_bounds = array<i64: 1, 32>}, {transform_indices = @transform_17, window_bounds = array<i64: 1, 8, 32>}]} {
    %c0 = arith.constant 0 : index
    %c0_0 = arith.constant 0 : index
    %0 = vector.load %arg3[%c0, %c0_0] : memref<1x32xf32, #tpu.memory_space<vmem>>, vector<1x32xf32>
    %c0_1 = arith.constant 0 : index
    %c0_2 = arith.constant 0 : index
    %1 = vector.load %arg4[%c0_1, %c0_2] : memref<1x32xf32, #tpu.memory_space<vmem>>, vector<1x32xf32>
    %c0_i32 = arith.constant 0 : i32
    %2 = arith.cmpi eq, %arg1, %c0_i32 : i32
    %3 = arith.extui %2 : i1 to i32
    %c0_i32_3 = arith.constant 0 : i32
    %4 = arith.cmpi ne, %3, %c0_i32_3 : i32
    scf.if %4 {
      %c0_56 = arith.constant 0 : index
      %c0_57 = arith.constant 0 : index
      %c0_58 = arith.constant 0 : index
      %115 = vector.load %arg2[%c0_56, %c0_57, %c0_58] : memref<1x8x32xf32, #tpu.memory_space<vmem>>, vector<1x8x32xf32>
      %116 = vector.shape_cast %115 : vector<1x8x32xf32> to vector<8x32xf32>
      %cst_59 = arith.constant dense<0.000000e+00> : vector<8xf32>
      %117 = vector.multi_reduction <add>, %116, %cst_59 [1] : vector<8x32xf32> to vector<8xf32>
      %118 = vector.shape_cast %117 : vector<8xf32> to vector<8x1xf32>
      %cst_60 = arith.constant 3.200000e+01 : f32
      %119 = vector.broadcast %cst_60 : f32 to vector<8x1xf32>
      %120 = arith.divf %118, %119 : vector<8x1xf32>
      %121 = vector.broadcast %120 : vector<8x1xf32> to vector<8x32xf32>
      %122 = arith.subf %116, %121 : vector<8x32xf32>
      %123 = arith.mulf %122, %122 : vector<8x32xf32>
      %cst_61 = arith.constant dense<0.000000e+00> : vector<8xf32>
      %124 = vector.multi_reduction <add>, %123, %cst_61 [1] : vector<8x32xf32> to vector<8xf32>
      %125 = vector.shape_cast %124 : vector<8xf32> to vector<8x1xf32>
      %cst_62 = arith.constant 3.200000e+01 : f32
      %126 = vector.broadcast %cst_62 : f32 to vector<8x1xf32>
      %127 = arith.divf %125, %126 : vector<8x1xf32>
      %128 = vector.broadcast %120 : vector<8x1xf32> to vector<8x32xf32>
      %129 = arith.subf %116, %128 : vector<8x32xf32>
      %cst_63 = arith.constant 9.99999974E-6 : f32
      %130 = vector.broadcast %cst_63 : f32 to vector<8x1xf32>
      %131 = arith.addf %127, %130 : vector<8x1xf32>
      %132 = math.rsqrt %131 : vector<8x1xf32>
      %133 = vector.broadcast %132 : vector<8x1xf32> to vector<8x32xf32>
      %134 = arith.mulf %129, %133 : vector<8x32xf32>
      %135 = vector.broadcast %0 : vector<1x32xf32> to vector<8x32xf32>
      %136 = arith.mulf %134, %135 : vector<8x32xf32>
      %137 = vector.broadcast %1 : vector<1x32xf32> to vector<8x32xf32>
      %138 = arith.addf %136, %137 : vector<8x32xf32>
      %139 = arith.truncf %138 : vector<8x32xf32> to vector<8x32xbf16>
      %c0_64 = arith.constant 0 : index
      %c0_65 = arith.constant 0 : index
      %140 = vector.load %arg7[%c0_64, %c0_65] : memref<32x32xbf16, #tpu.memory_space<vmem>>, vector<32x32xbf16>
      %cst_66 = arith.constant dense<0.000000e+00> : vector<8x32xf32>
      %141 = tpu.matmul %139, %140, %cst_66 {dimension_numbers = #tpu.dot_dimension_numbers<[1], [0], [0], [1], [0, 0, 1, 1], [], []>} : vector<8x32xbf16>, vector<32x32xbf16>, vector<8x32xf32> -> vector<8x32xf32>
      %c0_67 = arith.constant 0 : index
      %c0_68 = arith.constant 0 : index
      %142 = vector.load %arg8[%c0_67, %c0_68] : memref<1x32xf32, #tpu.memory_space<vmem>>, vector<1x32xf32>
      %143 = vector.broadcast %142 : vector<1x32xf32> to vector<8x32xf32>
      %144 = arith.addf %141, %143 : vector<8x32xf32>
      %145 = arith.truncf %144 : vector<8x32xf32> to vector<8x32xbf16>
      %c0_69 = arith.constant 0 : index
      %c0_70 = arith.constant 0 : index
      %146 = vector.load %arg9[%c0_69, %c0_70] : memref<32x32xbf16, #tpu.memory_space<vmem>>, vector<32x32xbf16>
      %cst_71 = arith.constant dense<0.000000e+00> : vector<8x32xf32>
      %147 = tpu.matmul %139, %146, %cst_71 {dimension_numbers = #tpu.dot_dimension_numbers<[1], [0], [0], [1], [0, 0, 1, 1], [], []>} : vector<8x32xbf16>, vector<32x32xbf16>, vector<8x32xf32> -> vector<8x32xf32>
      %c0_72 = arith.constant 0 : index
      %c0_73 = arith.constant 0 : index
      %148 = vector.load %arg10[%c0_72, %c0_73] : memref<1x32xf32, #tpu.memory_space<vmem>>, vector<1x32xf32>
      %149 = vector.broadcast %148 : vector<1x32xf32> to vector<8x32xf32>
      %150 = arith.addf %147, %149 : vector<8x32xf32>
      %151 = arith.truncf %150 : vector<8x32xf32> to vector<8x32xbf16>
      %152 = vector.shape_cast %145 : vector<8x32xbf16> to vector<8x4x8xbf16>
      %153 = tpu.transpose %152, [1, 0, 2] : vector<8x4x8xbf16> -> vector<4x8x8xbf16>
      %c0_74 = arith.constant 0 : index
      %c0_75 = arith.constant 0 : index
      %c0_76 = arith.constant 0 : index
      %154 = vector.load %arg20[%c0_74, %c0_75, %c0_76] : memref<4x8x8xbf16, #tpu.memory_space<vmem>>, vector<4x8x8xbf16>
      tpu.vector_store %arg20[%c0_74, %c0_75, %c0_76], %153 {strides = array<i32>} : memref<4x8x8xbf16, #tpu.memory_space<vmem>>, vector<4x8x8xbf16>,
      %155 = vector.shape_cast %151 : vector<8x32xbf16> to vector<8x4x8xbf16>
      %156 = tpu.transpose %155, [1, 0, 2] : vector<8x4x8xbf16> -> vector<4x8x8xbf16>
      %c0_77 = arith.constant 0 : index
      %c0_78 = arith.constant 0 : index
      %c0_79 = arith.constant 0 : index
      %157 = vector.load %arg21[%c0_77, %c0_78, %c0_79] : memref<4x8x8xbf16, #tpu.memory_space<vmem>>, vector<4x8x8xbf16>
      tpu.vector_store %arg21[%c0_77, %c0_78, %c0_79], %156 {strides = array<i32>} : memref<4x8x8xbf16, #tpu.memory_space<vmem>>, vector<4x8x8xbf16>,
    } else {
    }
    %c8_i32 = arith.constant 8 : i32
    %5 = arith.muli %arg1, %c8_i32 : i32
    %6 = tpu.assume_multiple %5, 8 : i32
    %c0_4 = arith.constant 0 : index
    %7 = arith.index_cast %6 : i32 to index
    %c0_5 = arith.constant 0 : index
    %8 = vector.load %arg2[%c0_4, %7, %c0_5] : memref<1x8x32xf32, #tpu.memory_space<vmem>>, vector<1x8x32xf32>
    %9 = vector.shape_cast %8 : vector<1x8x32xf32> to vector<8x32xf32>
    %cst = arith.constant dense<0.000000e+00> : vector<8xf32>
    %10 = vector.multi_reduction <add>, %9, %cst [1] : vector<8x32xf32> to vector<8xf32>
    %11 = vector.shape_cast %10 : vector<8xf32> to vector<8x1xf32>
    %cst_6 = arith.constant 3.200000e+01 : f32
    %12 = vector.broadcast %cst_6 : f32 to vector<8x1xf32>
    %13 = arith.divf %11, %12 : vector<8x1xf32>
    %14 = vector.broadcast %13 : vector<8x1xf32> to vector<8x32xf32>
    %15 = arith.subf %9, %14 : vector<8x32xf32>
    %16 = arith.mulf %15, %15 : vector<8x32xf32>
    %cst_7 = arith.constant dense<0.000000e+00> : vector<8xf32>
    %17 = vector.multi_reduction <add>, %16, %cst_7 [1] : vector<8x32xf32> to vector<8xf32>
    %18 = vector.shape_cast %17 : vector<8xf32> to vector<8x1xf32>
    %cst_8 = arith.constant 3.200000e+01 : f32
    %19 = vector.broadcast %cst_8 : f32 to vector<8x1xf32>
    %20 = arith.divf %18, %19 : vector<8x1xf32>
    %21 = vector.broadcast %13 : vector<8x1xf32> to vector<8x32xf32>
    %22 = arith.subf %9, %21 : vector<8x32xf32>
    %cst_9 = arith.constant 9.99999974E-6 : f32
    %23 = vector.broadcast %cst_9 : f32 to vector<8x1xf32>
    %24 = arith.addf %20, %23 : vector<8x1xf32>
    %25 = math.rsqrt %24 : vector<8x1xf32>
    %26 = vector.broadcast %25 : vector<8x1xf32> to vector<8x32xf32>
    %27 = arith.mulf %22, %26 : vector<8x32xf32>
    %28 = vector.broadcast %0 : vector<1x32xf32> to vector<8x32xf32>
    %29 = arith.mulf %27, %28 : vector<8x32xf32>
    %30 = vector.broadcast %1 : vector<1x32xf32> to vector<8x32xf32>
    %31 = arith.addf %29, %30 : vector<8x32xf32>
    %32 = arith.truncf %31 : vector<8x32xf32> to vector<8x32xbf16>
    %c0_10 = arith.constant 0 : index
    %c0_11 = arith.constant 0 : index
    %33 = vector.load %arg5[%c0_10, %c0_11] : memref<32x32xbf16, #tpu.memory_space<vmem>>, vector<32x32xbf16>
    %cst_12 = arith.constant dense<0.000000e+00> : vector<8x32xf32>
    %34 = tpu.matmul %32, %33, %cst_12 {dimension_numbers = #tpu.dot_dimension_numbers<[1], [0], [0], [1], [0, 0, 1, 1], [], []>} : vector<8x32xbf16>, vector<32x32xbf16>, vector<8x32xf32> -> vector<8x32xf32>
    %c0_13 = arith.constant 0 : index
    %c0_14 = arith.constant 0 : index
    %35 = vector.load %arg6[%c0_13, %c0_14] : memref<1x32xf32, #tpu.memory_space<vmem>>, vector<1x32xf32>
    %36 = vector.broadcast %35 : vector<1x32xf32> to vector<8x32xf32>
    %37 = arith.addf %34, %36 : vector<8x32xf32>
    %38 = arith.truncf %37 : vector<8x32xf32> to vector<8x32xbf16>
    %39 = vector.shape_cast %38 : vector<8x32xbf16> to vector<8x4x8xbf16>
    %40 = tpu.transpose %39, [1, 0, 2] : vector<8x4x8xbf16> -> vector<4x8x8xbf16>
    %c0_15 = arith.constant 0 : index
    %c0_16 = arith.constant 0 : index
    %c0_17 = arith.constant 0 : index
    %41 = vector.load %arg20[%c0_15, %c0_16, %c0_17] : memref<4x8x8xbf16, #tpu.memory_space<vmem>>, vector<4x8x8xbf16>
    "tpu.trace_start"() <{level = 10 : i32, message = "hqd,hkd->hqk"}> : () -> ()
    %cst_18 = arith.constant dense<0.000000e+00> : vector<4x8x8xf32>
    %42 = tpu.matmul %40, %41, %cst_18 {dimension_numbers = #tpu.dot_dimension_numbers<[2], [2], [1], [1], [0, 0, 0, 1, 1, 1], [0], [0]>} : vector<4x8x8xbf16>, vector<4x8x8xbf16>, vector<4x8x8xf32> -> vector<4x8x8xf32>
    "tpu.trace_stop"() : () -> ()
    %cst_19 = arith.constant 0.353553385 : f32
    %43 = vector.broadcast %cst_19 : f32 to vector<4x8x8xf32>
    %44 = arith.mulf %42, %43 : vector<4x8x8xf32>
    %cst_20 = arith.constant dense<0xFF800000> : vector<4x8xf32>
    %45 = vector.multi_reduction <maximumf>, %44, %cst_20 [2] : vector<4x8x8xf32> to vector<4x8xf32>
    %46 = vector.shape_cast %45 : vector<4x8xf32> to vector<4x8x1xf32>
    %47 = vector.broadcast %46 : vector<4x8x1xf32> to vector<4x8x8xf32>
    %48 = arith.subf %44, %47 : vector<4x8x8xf32>
    %49 = math.exp %48 : vector<4x8x8xf32>
    %cst_21 = arith.constant dense<0.000000e+00> : vector<4x8xf32>
    %50 = vector.multi_reduction <add>, %49, %cst_21 [2] : vector<4x8x8xf32> to vector<4x8xf32>
    %51 = vector.shape_cast %50 : vector<4x8xf32> to vector<4x8x1xf32>
    %52 = tpu.reciprocal %51 {approx = true} : vector<4x8x1xf32> -> vector<4x8x1xf32>
    %53 = vector.broadcast %52 : vector<4x8x1xf32> to vector<4x8x8xf32>
    %54 = arith.mulf %49, %53 : vector<4x8x8xf32>
    %55 = arith.truncf %54 : vector<4x8x8xf32> to vector<4x8x8xbf16>
    %c0_22 = arith.constant 0 : index
    %c0_23 = arith.constant 0 : index
    %c0_24 = arith.constant 0 : index
    %56 = vector.load %arg21[%c0_22, %c0_23, %c0_24] : memref<4x8x8xbf16, #tpu.memory_space<vmem>>, vector<4x8x8xbf16>
    "tpu.trace_start"() <{level = 10 : i32, message = "hqk,hkd->hqd"}> : () -> ()
    %cst_25 = arith.constant dense<0.000000e+00> : vector<4x8x8xf32>
    %57 = tpu.matmul %55, %56, %cst_25 {dimension_numbers = #tpu.dot_dimension_numbers<[2], [1], [1], [2], [0, 0, 0, 1, 1, 2], [0], [0]>} : vector<4x8x8xbf16>, vector<4x8x8xbf16>, vector<4x8x8xf32> -> vector<4x8x8xf32>
    "tpu.trace_stop"() : () -> ()
    %58 = tpu.transpose %57, [1, 0, 2] : vector<4x8x8xf32> -> vector<8x4x8xf32>
    %59 = vector.shape_cast %58 : vector<8x4x8xf32> to vector<8x32xf32>
    %60 = arith.truncf %59 : vector<8x32xf32> to vector<8x32xbf16>
    %c0_26 = arith.constant 0 : index
    %c0_27 = arith.constant 0 : index
    %61 = vector.load %arg11[%c0_26, %c0_27] : memref<32x32xbf16, #tpu.memory_space<vmem>>, vector<32x32xbf16>
    %cst_28 = arith.constant dense<0.000000e+00> : vector<8x32xf32>
    %62 = tpu.matmul %60, %61, %cst_28 {dimension_numbers = #tpu.dot_dimension_numbers<[1], [0], [0], [1], [0, 0, 1, 1], [], []>} : vector<8x32xbf16>, vector<32x32xbf16>, vector<8x32xf32> -> vector<8x32xf32>
    %c0_29 = arith.constant 0 : index
    %c0_30 = arith.constant 0 : index
    %63 = vector.load %arg12[%c0_29, %c0_30] : memref<1x32xf32, #tpu.memory_space<vmem>>, vector<1x32xf32>
    %64 = vector.broadcast %63 : vector<1x32xf32> to vector<8x32xf32>
    %65 = arith.addf %62, %64 : vector<8x32xf32>
    %66 = arith.addf %9, %65 : vector<8x32xf32>
    %c0_31 = arith.constant 0 : index
    %c0_32 = arith.constant 0 : index
    %67 = vector.load %arg13[%c0_31, %c0_32] : memref<1x32xf32, #tpu.memory_space<vmem>>, vector<1x32xf32>
    %c0_33 = arith.constant 0 : index
    %c0_34 = arith.constant 0 : index
    %68 = vector.load %arg14[%c0_33, %c0_34] : memref<1x32xf32, #tpu.memory_space<vmem>>, vector<1x32xf32>
    %cst_35 = arith.constant dense<0.000000e+00> : vector<8xf32>
    %69 = vector.multi_reduction <add>, %66, %cst_35 [1] : vector<8x32xf32> to vector<8xf32>
    %70 = vector.shape_cast %69 : vector<8xf32> to vector<8x1xf32>
    %cst_36 = arith.constant 3.200000e+01 : f32
    %71 = vector.broadcast %cst_36 : f32 to vector<8x1xf32>
    %72 = arith.divf %70, %71 : vector<8x1xf32>
    %73 = vector.broadcast %72 : vector<8x1xf32> to vector<8x32xf32>
    %74 = arith.subf %66, %73 : vector<8x32xf32>
    %75 = arith.mulf %74, %74 : vector<8x32xf32>
    %cst_37 = arith.constant dense<0.000000e+00> : vector<8xf32>
    %76 = vector.multi_reduction <add>, %75, %cst_37 [1] : vector<8x32xf32> to vector<8xf32>
    %77 = vector.shape_cast %76 : vector<8xf32> to vector<8x1xf32>
    %cst_38 = arith.constant 3.200000e+01 : f32
    %78 = vector.broadcast %cst_38 : f32 to vector<8x1xf32>
    %79 = arith.divf %77, %78 : vector<8x1xf32>
    %80 = vector.broadcast %72 : vector<8x1xf32> to vector<8x32xf32>
    %81 = arith.subf %66, %80 : vector<8x32xf32>
    %cst_39 = arith.constant 9.99999974E-6 : f32
    %82 = vector.broadcast %cst_39 : f32 to vector<8x1xf32>
    %83 = arith.addf %79, %82 : vector<8x1xf32>
    %84 = math.rsqrt %83 : vector<8x1xf32>
    %85 = vector.broadcast %84 : vector<8x1xf32> to vector<8x32xf32>
    %86 = arith.mulf %81, %85 : vector<8x32xf32>
    %87 = vector.broadcast %67 : vector<1x32xf32> to vector<8x32xf32>
    %88 = arith.mulf %86, %87 : vector<8x32xf32>
    %89 = vector.broadcast %68 : vector<1x32xf32> to vector<8x32xf32>
    %90 = arith.addf %88, %89 : vector<8x32xf32>
    %91 = arith.truncf %90 : vector<8x32xf32> to vector<8x32xbf16>
    %c0_40 = arith.constant 0 : index
    %c0_41 = arith.constant 0 : index
    %92 = vector.load %arg15[%c0_40, %c0_41] : memref<32x128xbf16, #tpu.memory_space<vmem>>, vector<32x128xbf16>
    %cst_42 = arith.constant dense<0.000000e+00> : vector<8x128xf32>
    %93 = tpu.matmul %91, %92, %cst_42 {dimension_numbers = #tpu.dot_dimension_numbers<[1], [0], [0], [1], [0, 0, 1, 1], [], []>} : vector<8x32xbf16>, vector<32x128xbf16>, vector<8x128xf32> -> vector<8x128xf32>
    %c0_43 = arith.constant 0 : index
    %c0_44 = arith.constant 0 : index
    %94 = vector.load %arg16[%c0_43, %c0_44] : memref<1x128xf32, #tpu.memory_space<vmem>>, vector<1x128xf32>
    %95 = vector.broadcast %94 : vector<1x128xf32> to vector<8x128xf32>
    %96 = arith.addf %93, %95 : vector<8x128xf32>
    %cst_45 = arith.constant 5.000000e-01 : f32
    %97 = vector.broadcast %cst_45 : f32 to vector<8x128xf32>
    %98 = arith.mulf %97, %96 : vector<8x128xf32>
    %cst_46 = arith.constant 0.707106769 : f32
    %99 = vector.broadcast %cst_46 : f32 to vector<8x128xf32>
    %100 = arith.mulf %96, %99 : vector<8x128xf32>
    %101 = math.erf %100 : vector<8x128xf32>
    %cst_47 = arith.constant 1.000000e+00 : f32
    %102 = vector.broadcast %cst_47 : f32 to vector<8x128xf32>
    %103 = arith.addf %102, %101 : vector<8x128xf32>
    %104 = arith.mulf %98, %103 : vector<8x128xf32>
    %105 = arith.truncf %104 : vector<8x128xf32> to vector<8x128xbf16>
    %c0_48 = arith.constant 0 : index
    %c0_49 = arith.constant 0 : index
    %106 = vector.load %arg17[%c0_48, %c0_49] : memref<128x32xbf16, #tpu.memory_space<vmem>>, vector<128x32xbf16>
    %cst_50 = arith.constant dense<0.000000e+00> : vector<8x32xf32>
    %107 = tpu.matmul %105, %106, %cst_50 {dimension_numbers = #tpu.dot_dimension_numbers<[1], [0], [0], [1], [0, 0, 1, 1], [], []>} : vector<8x128xbf16>, vector<128x32xbf16>, vector<8x32xf32> -> vector<8x32xf32>
    %c0_51 = arith.constant 0 : index
    %c0_52 = arith.constant 0 : index
    %108 = vector.load %arg18[%c0_51, %c0_52] : memref<1x32xf32, #tpu.memory_space<vmem>>, vector<1x32xf32>
    %109 = vector.broadcast %108 : vector<1x32xf32> to vector<8x32xf32>
    %110 = arith.addf %107, %109 : vector<8x32xf32>
    %111 = arith.addf %66, %110 : vector<8x32xf32>
    %c0_53 = arith.constant 0 : index
    %c0_54 = arith.constant 0 : index
    %c0_55 = arith.constant 0 : index
    %112 = vector.load %arg19[%c0_53, %c0_54, %c0_55] : memref<1x8x32xf32, #tpu.memory_space<vmem>>, vector<1x8x32xf32>
    %113 = vector.shape_cast %112 : vector<1x8x32xf32> to vector<8x32xf32>
    %114 = vector.shape_cast %111 : vector<8x32xf32> to vector<1x8x32xf32>
    tpu.vector_store %arg19[%c0_53, %c0_54, %c0_55], %114 {strides = array<i32>} : memref<1x8x32xf32, #tpu.memory_space<vmem>>, vector<1x8x32xf32>,
    return
  }
  func.func @transform_0(%arg0: i32, %arg1: i32) -> (i32, i32, i32) {
    %c0_i32 = arith.constant 0 : i32
    %c0_i32_0 = arith.constant 0 : i32
    %c0_i32_1 = arith.constant 0 : i32
    return %arg0, %c0_i32, %c0_i32_0 : i32, i32, i32
  }
  func.func @transform_1(%arg0: i32, %arg1: i32) -> (i32, i32) {
    %c0_i32 = arith.constant 0 : i32
    %c0_i32_0 = arith.constant 0 : i32
    %c0_i32_1 = arith.constant 0 : i32
    return %c0_i32, %c0_i32_0 : i32, i32
  }
  func.func @transform_2(%arg0: i32, %arg1: i32) -> (i32, i32) {
    %c0_i32 = arith.constant 0 : i32
    %c0_i32_0 = arith.constant 0 : i32
    %c0_i32_1 = arith.constant 0 : i32
    return %c0_i32, %c0_i32_0 : i32, i32
  }
  func.func @transform_3(%arg0: i32, %arg1: i32) -> (i32, i32) {
    %c0_i32 = arith.constant 0 : i32
    %c0_i32_0 = arith.constant 0 : i32
    %c0_i32_1 = arith.constant 0 : i32
    return %c0_i32, %c0_i32_0 : i32, i32
  }
  func.func @transform_4(%arg0: i32, %arg1: i32) -> (i32, i32) {
    %c0_i32 = arith.constant 0 : i32
    %c0_i32_0 = arith.constant 0 : i32
    %c0_i32_1 = arith.constant 0 : i32
    return %c0_i32, %c0_i32_0 : i32, i32
  }
  func.func @transform_5(%arg0: i32, %arg1: i32) -> (i32, i32) {
    %c0_i32 = arith.constant 0 : i32
    %c0_i32_0 = arith.constant 0 : i32
    %c0_i32_1 = arith.constant 0 : i32
    return %c0_i32, %c0_i32_0 : i32, i32
  }
  func.func @transform_6(%arg0: i32, %arg1: i32) -> (i32, i32) {
    %c0_i32 = arith.constant 0 : i32
    %c0_i32_0 = arith.constant 0 : i32
    %c0_i32_1 = arith.constant 0 : i32
    return %c0_i32, %c0_i32_0 : i32, i32
  }
  func.func @transform_7(%arg0: i32, %arg1: i32) -> (i32, i32) {
    %c0_i32 = arith.constant 0 : i32
    %c0_i32_0 = arith.constant 0 : i32
    %c0_i32_1 = arith.constant 0 : i32
    return %c0_i32, %c0_i32_0 : i32, i32
  }
  func.func @transform_8(%arg0: i32, %arg1: i32) -> (i32, i32) {
    %c0_i32 = arith.constant 0 : i32
    %c0_i32_0 = arith.constant 0 : i32
    %c0_i32_1 = arith.constant 0 : i32
    return %c0_i32, %c0_i32_0 : i32, i32
  }
  func.func @transform_9(%arg0: i32, %arg1: i32) -> (i32, i32) {
    %c0_i32 = arith.constant 0 : i32
    %c0_i32_0 = arith.constant 0 : i32
    %c0_i32_1 = arith.constant 0 : i32
    return %c0_i32, %c0_i32_0 : i32, i32
  }
  func.func @transform_10(%arg0: i32, %arg1: i32) -> (i32, i32) {
    %c0_i32 = arith.constant 0 : i32
    %c0_i32_0 = arith.constant 0 : i32
    %c0_i32_1 = arith.constant 0 : i32
    return %c0_i32, %c0_i32_0 : i32, i32
  }
  func.func @transform_11(%arg0: i32, %arg1: i32) -> (i32, i32) {
    %c0_i32 = arith.constant 0 : i32
    %c0_i32_0 = arith.constant 0 : i32
    %c0_i32_1 = arith.constant 0 : i32
    return %c0_i32, %c0_i32_0 : i32, i32
  }
  func.func @transform_12(%arg0: i32, %arg1: i32) -> (i32, i32) {
    %c0_i32 = arith.constant 0 : i32
    %c0_i32_0 = arith.constant 0 : i32
    %c0_i32_1 = arith.constant 0 : i32
    return %c0_i32, %c0_i32_0 : i32, i32
  }
  func.func @transform_13(%arg0: i32, %arg1: i32) -> (i32, i32) {
    %c0_i32 = arith.constant 0 : i32
    %c0_i32_0 = arith.constant 0 : i32
    %c0_i32_1 = arith.constant 0 : i32
    return %c0_i32, %c0_i32_0 : i32, i32
  }
  func.func @transform_14(%arg0: i32, %arg1: i32) -> (i32, i32) {
    %c0_i32 = arith.constant 0 : i32
    %c0_i32_0 = arith.constant 0 : i32
    %c0_i32_1 = arith.constant 0 : i32
    return %c0_i32, %c0_i32_0 : i32, i32
  }
  func.func @transform_15(%arg0: i32, %arg1: i32) -> (i32, i32) {
    %c0_i32 = arith.constant 0 : i32
    %c0_i32_0 = arith.constant 0 : i32
    %c0_i32_1 = arith.constant 0 : i32
    return %c0_i32, %c0_i32_0 : i32, i32
  }
  func.func @transform_16(%arg0: i32, %arg1: i32) -> (i32, i32) {
    %c0_i32 = arith.constant 0 : i32
    %c0_i32_0 = arith.constant 0 : i32
    %c0_i32_1 = arith.constant 0 : i32
    return %c0_i32, %c0_i32_0 : i32, i32
  }
  func.func @transform_17(%arg0: i32, %arg1: i32) -> (i32, i32, i32) {
    %c0_i32 = arith.constant 0 : i32
    %c0_i32_0 = arith.constant 0 : i32
    return %arg0, %arg1, %c0_i32 : i32, i32, i32
  }
}

</mosaic_0001>

<bundles_post_ra>
// kernel: tpu_custom_call.1
= control target key start
LH: loop header
LB: loop body
LE: loop exit
PB: predicated region body
PF: predicated region fallthrough
CT: control target
= control target key end

     0   :  { %s3290_s0 = inlined_call_operand.vmem [shape: f32[2,8,32], index: 0, kind: input, shape index: {}]   ;;  %s3291_s1 = inlined_call_operand.vmem [shape: f32[1,32], index: 1, kind: input, shape index: {}]   ;;  %s3292_s2 = inlined_call_operand.vmem [shape: f32[1,32], index: 2, kind: input, shape index: {}]   ;;  %s3293_s3 = inlined_call_operand.vmem [shape: bf16[32,32], index: 3, kind: input, shape index: {}]   ;;  %s3294_s4 = inlined_call_operand.vmem [shape: f32[1,32], index: 4, kind: input, shape index: {}]   ;;  %s3295_s5 = inlined_call_operand.vmem [shape: bf16[32,32], index: 5, kind: input, shape index: {}]   ;;  %s3296_s6 = inlined_call_operand.vmem [shape: f32[1,32], index: 6, kind: input, shape index: {}]   ;;  %s3297_s7 = inlined_call_operand.vmem [shape: bf16[32,32], index: 7, kind: input, shape index: {}]   ;;  %s3298_s8 = inlined_call_operand.vmem [shape: f32[1,32], index: 8, kind: input, shape index: {}]   ;;  %s3299_s9 = inlined_call_operand.vmem [shape: bf16[32,32], index: 9, kind: input, shape index: {}]   ;;  %s3300_s10 = inlined_call_operand.vmem [shape: f32[1,32], index: 10, kind: input, shape index: {}]   ;;  %s3301_s11 = inlined_call_operand.vmem [shape: f32[1,32], index: 11, kind: input, shape index: {}]   ;;  %s3302_s12 = inlined_call_operand.vmem [shape: f32[1,32], index: 12, kind: input, shape index: {}]   ;;  %s3303_s13 = inlined_call_operand.hbm [shape: bf16[32,128], index: 13, kind: input, shape index: {}]   ;;  %s3304_s14 = inlined_call_operand.vmem [shape: f32[1,128], index: 14, kind: input, shape index: {}]   ;;  %s3305_s15 = inlined_call_operand.vmem [shape: bf16[128,32], index: 15, kind: input, shape index: {}]   ;;  %s3306_s16 = inlined_call_operand.vmem [shape: f32[1,32], index: 16, kind: input, shape index: {}]   ;;  %s3307_s17 = inlined_call_operand.hbm [shape: f32[2,8,32], index: 17, kind: output, shape index: {}]  }
   0x1   :  { %3316 = sst [smem:[#allocation17_spill]] %s3290_s0 }
   0x2   :  { %3317 = sst [smem:[#allocation18_spill]] %s3291_s1 }
   0x3   :  { %3318 = sst [smem:[#allocation19_spill]] %s3307_s17 }
   0x4   :  { %22 = vsyncpa [#allocation5], 0 }
   0x5   :  { %23 = vsyncpa [#allocation6], 0 }
   0x6   :  { %25 = vsyncpa [#allocation6 + $0x1], 0  ;;  %s2865_s24 = smov 0   ;;  %s2867_s25 = smov 0  }
   0x7   :  { %s2869_s26 = smov 0   ;;  %s2871_s27 = smov 0  }
   0x8   :  { %s2873_s28 = smov 0   ;;  %s2875_s29 = smov 0  }
   0x9 LB: > { %3319 = sst [smem:[#allocation10_spill]] %s2738_s24  ;;  %s2326_s0 = sadd.s32 4294967295, %s2758_s29   ;;  %s2758_s29 = sphi %s2875_s29, %s31_s29   ;;  %s2754_s28 = sphi %s2873_s28, %s3340_s28   ;;  %s2750_s27 = sphi %s2871_s27, %s3339_s27   ;;  %s2746_s26 = sphi %s2869_s26, %s3338_s26   ;;  %s2742_s25 = sphi %s2867_s25, %s3342_s25   ;;  %s2738_s24 = sphi %s2865_s24, %s3341_s24  }
   0xa   : > { %3320 = sst [smem:[#allocation11_spill]] %s2746_s26  ;;  %s2327_s30 = sadd.s32 4294967294, %s2758_s29  }
   0xb   : > { %3321 = sst [smem:[#allocation12_spill]] %s2754_s28  ;;  %s43_s18 = sadd.s32 1, %s2754_s28 }
   0xc   : > { %3322 = sst [smem:[#allocation13_spill]] %s2758_s29  ;;  %s414_s19 = sadd.s32 1, %s2746_s26 }
   0xd   : > { %p45_p0 = scmp.ge.s32.totalorder %s43_s18, 2  ;;  %p424_p1 = scmp.ne.s32.totalorder %s2746_s26, %s2742_s25 }
   0xe   : > { %p425_p2 = scmp.eq.s32.totalorder %s2326_s0, 1  ;;  %p430_p3 = scmp.ne.s32.totalorder %s2742_s25, %s2738_s24 }
   0xf   : > { %s3344_s18 = smov (%p45_p0, %s43_s18), 0  ;;  %p431_p5 = scmp.eq.s32.totalorder %s2327_s30, 1 }
  0x10   : > { %3323 = sst [smem:[#allocation14_spill]] %s3344_s18  ;;  %p2905_p4 = por %p425_p2, %p424_p1 }
  0x11   : > { %s409_s20 = ssub.s32 %s2754_s28, %s3344_s18  ;;  %p2328_p6 = scmp.ge.s32.totalorder %s2758_s29, 1 }
  0x12   : > { %p412_p7 = scmp.eq.s32.totalorder %s409_s20, 0  ;;  %p2912_p8 = por %p431_p5, %p430_p3 }
  0x13   : > { %p438_p9 = scmp.lt.s32.totalorder %s2758_s29, 3  ;;  %p2924_p11 = scmp.eq.s32.totalorder %s2326_s0, 0 }
  0x14   : > { %s3325_s21 = scalar_select %p2912_p8, 1, 0 }
  0x15   : > { %s2918_s22 = scalar_select %p412_p7, %s2746_s26, %s414_s19  }
  0x16   : > { %3326 = sst [smem:[#allocation15_spill]] %s3325_s21  ;;  %p2920_p10 = pnand %p2328_p6, %p438_p9 }
  0x17   : > { %3327 = sst [smem:[#allocation16_spill]] %s2918_s22  ;;  %s2760_s30 = smov [#allocation4]  }
  0x18   : > { %p2536_p12 = pneg %p2920_p10  ;;  %s486_s20 = sshll.u32 %s2760_s30, 4  ;;  %s487_s20 = int_to_ptr.vmem [resolvable:$true] %s486_s20 }
  0x19   : > { %s2663_s19 = scalar_lea.vmem %s487_s20, 256  ;;  %p2671_p5 = scmp.lt.s32.totalorder %s487_s20, %s487_s20 }
  0x1a   : > { %p2537_p13 = pnand %p2924_p11, %p2536_p12  ;;  %p2664_p1 = scmp.ne.s32.totalorder %s487_s20, %s2663_s19 }
  0x1b   : > { %p2672_p6 = scmp.lt.s32.totalorder %s2663_s19, %s2663_s19 }
  0x1c   : > { %p2654_p0 = pneg %p2537_p13 }
  0x1d   : > { %p2673_p7 = por %p2672_p6, %p2671_p5 }
  0x1e   : > { %p2666_p2 = pnand %p2664_p1, %p2654_p0 }
  0x20   : > { %p2667_p3 = pneg %p2666_p2 }
  0x22   : > { %p2674_p9 = pnand %p2673_p7, %p2667_p3 }
  0x24   : > { %2677 = shalt.err (!%p2674_p9)
}
  0x25   : > { %s2761_s0 = smov 64   ;;  %s2762_s18 = smov 4  }
  0x26   : > { %2539 = dma.hbm_to_vmem [thread:$0]  (!%p2537_p13), %s3303_s13, 256, %s487_s20, [#allocation5], %s2761_s0, %s2761_s0, %s2762_s18  }
  0x27   : > { %518 = sbr.rel (%p2920_p10) target bundleno = 2507 (0x9cb), region = 88 }
  0x2c   : > { %2729 = dma.done.wait (%p2924_p11), [#allocation5], 256  }
  0x2d   : > { %2731 = vsyncadd (%p2924_p11), [#allocation5], 4294967040  ;;  %p569_p12 = scmp.lt.s32.totalorder %s2750_s27, 1  ;;  %s3330_s29 = sld [smem:[#allocation17_spill]]  ;;  %vm581_vm0 = vcmask 261120   ;;  %v2609_v12 = vld [vmem:[%s3295_s5 + $0x8] sm:$0xff]   ;;  %v597_v55 = vlaneseq }
  0x2e   : > { %v2763_v13 = vmov 0.0   ;;  %vm2764_vm1 = vmmov 0   ;;  %v2610_v14 = vld [vmem:[%s3295_s5] sm:$0xff]   ;;  %s3331_s22 = sld [smem:[#allocation18_spill]]  ;;  %v2611_v27 = vld [vmem:[%s3297_s7 + $0x8] sm:$0xff]   ;;  %s2765_s23 = smov 112  }
  0x2f   : > { %s570_s30 = scalar_select %p569_p12, %s2750_s27, 1  ;;  %2422 = vmatprep.subr.bf16.mxu0 %v2763_v13  ;;  %2426 = vmatprep.mubr.msk.bf16.mxu0 %vm2764_vm1, %v2763_v13  ;;  %v2381_v24 = vld [vmem:[%s3292_s2] ss:$0 sm:$0xff]  ;;  %v2613_v32 = vld [vmem:[%s3293_s3 + $0x8] sm:$0xff]   ;;  %v2768_v56 = vmov 1983009808  }
  0x30   : > { %2423 = vmatpush3.bf16.msra.mxu0 %v2609_v12  ;;  %2446 = vmatprep.subr.bf16.mxu1 %v2763_v13  ;;  %v2612_v30 = vld [vmem:[%s3297_s7] sm:$0xff]   ;;  %s2766_s20 = smov 120   ;;  %s2767_s0 = smov 104   ;;  %v750_v57 = vunpack.c.l.s4 %v2768_v56  ;;  %v598_v58 = vshrl.u32 %v597_v55, 7  ;;  %v2769_v60 = vmov 1934713408  }
  0x31   : > { %s2334_s19 = sshll.u32 %s570_s30, 3  ;;  %2424 = vmatprep.subr.bf16.mxu0 %v2763_v13  ;;  %2448 = vmatprep.mubr.msk.bf16.mxu1 %vm2764_vm1, %v2763_v13  ;;  %v2614_v34 = vld [vmem:[%s3293_s3] sm:$0xff]   ;;  %v767_v61 = vunpack.c.l.s4 %v2769_v60  ;;  %vm914_vm2 = vcmask 60416   ;;  %vm1367_vm3 = vcmask 64512   ;;  %vm1611_vm4 = vcmask 1043456  }
  0x32   : > { %v2335_v37 = vld [vmem:[%s3296_s6] ss:$0 sm:$0xff]  ;;  %v751_v59 = vunpack.c.0.s8 %v750_v57  ;;  %vm1942_vm5 = vcmask 130048   ;;  %vm1944_vm6 = vcmask 195584  }
  0x33   : > { %s2946_s17 = scalar_lea.vmem %s3330_s29, %s2334_s19  ;;  %v2343_v48 = vld [vmem:[%s3294_s4] ss:$0 sm:$0xff]  ;;  %v768_v63 = vunpack.c.0.s8 %v767_v61  ;;  %s3332_s29 = sld [smem:[#allocation19_spill]] }
  0x34   : > { %v580_v0 = vld [vmem:[%s2946_s17] sm:$0xff]  ;;  %2425 = vmatpush3.bf16.msra.mxu0 %v2610_v14  ;;  %v3011_v62 = vsub.s32 %v751_v59, %v598_v58 }
  0x35   : > { %v582_v1 = vsel %vm581_vm0, %v580_v0, 0.0  ;;  %2430 = vmatprep.subr.bf16.mxu0 %v2763_v13  ;;  %v2380_v22 = vld [vmem:[%s3331_s22] ss:$0 sm:$0xff]  ;;  %s2771_s22 = smov 16  }
  0x36   : > { %583 = vadd.xlane.f32.xlu0 %v582_v1 }
  0x39   : > { %s3333_s18 = smov %s3332_s29 }
  0x3a   : > { %1100 = vadd.xlane.f32.xlu0 %v582_v1  ;;  %v3013_v1 = vsub.s32 %v768_v63, %v598_v58 }
  0xbf   : > { %v584_v2 = vpop.xlane.xlu0 %583 }
  0xc0   : > { %v586_v3 = vmul.f32 0.03125, %v584_v2 }
  0xc2   : > { %v587_v4 = vsub.f32 %v580_v0, %v586_v3 }
  0xc3   : > { %v1101_v5 = vpop.xlane.xlu0 %1100 }
  0xc4   : > { %v1103_v6 = vmul.f32 0.03125, %v1101_v5  ;;  %v588_v7 = vmul.f32 %v587_v4, %v587_v4 }
  0xc6   : > { %v1104_v8 = vsub.f32 %v580_v0, %v1103_v6  ;;  %v589_v9 = vsel %vm581_vm0, %v588_v7, 0.0 }
  0xc7   : > { %590 = vadd.xlane.f32.xlu1 %v589_v9 }
  0xc8   : > { %v1105_v10 = vmul.f32 %v1104_v8, %v1104_v8 }
  0xca   : > { %v1106_v11 = vsel %vm581_vm0, %v1105_v10, 0.0 }
  0xcb   : > { %1107 = vadd.xlane.f32.xlu1 %v1106_v11 }
 0x150   : > { %v591_v15 = vpop.xlane.xlu1 %590 }
 0x151   : > { %v592_v16 = vmul.f32 0.03125, %v591_v15  ;;  %v2770_v15 = vmov 0  }
 0x153   : > { %v593_v17 = vadd.f32 1e-05, %v592_v16 }
 0x154   : > { %v1108_v18 = vpop.xlane.xlu1 %1107 }
 0x155   : > { %2627 = vrsqrt.f32 %v593_v17  ;;  %v1109_v19 = vmul.f32 0.03125, %v1108_v18 }
 0x157   : > { %v1110_v20 = vadd.f32 1e-05, %v1109_v19 }
 0x159   : > { %2629 = vrsqrt.f32 %v1110_v20 }
 0x162   : > { %v2628_v21 = vpop.eup %2627 }
 0x163   : > { %v595_v23 = vmul.f32 %v2628_v21, %v587_v4 }
 0x165   : > { %v602_v25 = vmul.f32 %v2380_v22, %v595_v23 }
 0x166   : > { %v2630_v29 = vpop.eup %2629 }
 0x167   : > { %v609_v26 = vadd.f32 %v2381_v24, %v602_v25  ;;  %v1112_v31 = vmul.f32 %v2630_v29, %v1104_v8 }
 0x169   : > { %v610_v28 = vpack.c.bf16 %v609_v26, %v609_v26  ;;  %v1119_v33 = vmul.f32 %v2380_v22, %v1112_v31 }
 0x16b   : > { %2427 = vmatmul.mubr.msk.bf16.vlgmr.msra.gmra.mxu0 %vm581_vm0, %v610_v28  ;;  %v1126_v35 = vadd.f32 %v2381_v24, %v1119_v33 }
 0x16c   : > { %2431 = vmatpush3.bf16.msra.mxu0 %v2611_v27  ;;  %2434 = vmatprep.mubr.msk.bf16.mxu0 %vm2764_vm1, %v2763_v13 }
 0x16d   : > { %2432 = vmatprep.subr.bf16.mxu0 %v2763_v13  ;;  %v1127_v36 = vpack.c.bf16 %v1126_v35, %v1126_v35 }
 0x170   : > { %2433 = vmatpush3.bf16.msra.mxu0 %v2612_v30 }
 0x171   : > { %2438 = vmatprep.subr.bf16.mxu0 %v2763_v13 }
 0x173   : > { %2435 = vmatmul.mubr.msk.bf16.vlgmr.msra.gmra.mxu0 %vm581_vm0, %v610_v28 }
 0x174   : > { %2439 = vmatpush3.bf16.msra.mxu0 %v2613_v32  ;;  %2442 = vmatprep.mubr.msk.bf16.mxu0 %vm2764_vm1, %v2763_v13 }
 0x175   : > { %2440 = vmatprep.subr.bf16.mxu0 %v2763_v13 }
 0x178   : > { %2441 = vmatpush3.bf16.msra.mxu0 %v2614_v34 }
 0x179   : > { %2452 = vmatprep.subr.bf16.mxu0 %v2763_v13 }
 0x17b   : > { %2443 = vmatmul.mubr.msk.bf16.vlgmr.msra.gmra.mxu0 %vm581_vm0, %v1127_v36 }
 0x17c   : > { %2454 = vmatprep.mubr.msk.bf16.mxu0 %vm2764_vm1, %v2763_v13 }
 0x22b   : > { %v671_v38 = vpop.f32.mrf.mxu0 }
 0x22c   : > { %v672_v39 = vadd.f32 %v2335_v37, %v671_v38 }
 0x22d   : > { %v2428_v40 = vpop.f32.mrf.mxu0 }
 0x22e   : > { %v677_v41 = vpack.c.bf16 %v672_v39, %v672_v39 }
 0x22f   : > { %v674_v42 = vpop.f32.mrf.mxu0 }
 0x230   : > { %745 = vrot.lane.b32.xlu1 %v677_v41, %s2765_s23  ;;  %743 = vrot.lane.b32.xlu0 %v677_v41, %s2766_s20  ;;  %v755_v2 = vrot.slane %v677_v41, %v3011_v62 }
 0x231   : > { %v2429_v43 = vpop.f32.mrf.mxu0 }
 0x233   : > { %v3002_v44 = vpop.f32.mrf.mxu0 }
 0x234   : > { %747 = vrot.lane.b32.xlu1 %v677_v41, %s2767_s0 }
 0x235   : > { %v2436_v45 = vpop.f32.mrf.mxu0 }
 0x237   : > { %v738_v46 = vpop.f32.mrf.mxu0 }
 0x239   : > { %v2437_v47 = vpop.f32.mrf.mxu0 }
 0x23b   : > { %v1188_v49 = vpop.f32.mrf.mxu0 }
 0x23c   : > { %v1189_v50 = vadd.f32 %v2343_v48, %v1188_v49 }
 0x23d   : > { %v2444_v51 = vpop.f32.mrf.mxu0 }
 0x23e   : > { %v1194_v52 = vpack.c.bf16 %v1189_v50, %v1189_v50 }
 0x23f   : > { %v1191_v53 = vpop.f32.mrf.mxu0 }
 0x240   : > { %1198 = vrot.lane.b32.xlu0 %v1194_v52, %s2765_s23  ;;  %1196 = vrot.lane.b32.xlu1 %v1194_v52, %s2766_s20  ;;  %v1208_v43 = vrot.slane %v1194_v52, %v3011_v62 }
 0x241   : > { %v2445_v54 = vpop.f32.mrf.mxu0 }
 0x244   : > { %1200 = vrot.lane.b32.xlu1 %v1194_v52, %s2767_s0 }
 0x2a2   : > { %v746_v0 = vpop.permute.xlu1 %745  ;;  %v744_v6 = vpop.permute.xlu0 %743 }
 0x2a3   : > { %v763_v3 = vrot.slane %v746_v0, %v3011_v62  ;;  %v789_v10 = vrot.slane %v744_v6, %v3011_v62 }
 0x2a5   : > { %v764_v4 = vcombine.low %v755_v2, %v763_v3  ;;  %v765_v5 = vcombine.high %v755_v2, %v763_v3 }
 0x2a6   : > { %v748_v7 = vpop.permute.xlu1 %747 }
 0x2a7   : > { %v772_v8 = vrot.slane %v764_v4, %v3013_v1  ;;  %v797_v9 = vrot.slane %v748_v7, %v3011_v62  ;;  %v779_v11 = vrot.slane %v765_v5, %v3013_v1 }
 0x2a9   : > { %v798_v12 = vcombine.low %v789_v10, %v797_v9  ;;  %v799_v14 = vcombine.high %v789_v10, %v797_v9  ;;  %v780_v16 = vcombine.high %v772_v8, %v2770_v15  ;;  %v781_v19 = vcombine.high %v779_v11, %v2770_v15 }
 0x2aa   : > { %v820_v20 = vshrl.u32 %v772_v8, 16  ;;  %v836_v26 = vshrl.u32 %v779_v11, 16 }
 0x2ab   : > { %v806_v17 = vrot.slane %v798_v12, %v3013_v1  ;;  %v813_v18 = vrot.slane %v799_v14, %v3013_v1  ;;  %v828_v25 = vshrl.u32 %v780_v16, 16  ;;  %v844_v33 = vshrl.u32 %v781_v19, 16 }
 0x2ad   : > { %v814_v21 = vcombine.high %v806_v17, %v2770_v15  ;;  %v815_v22 = vcombine.high %v813_v18, %v2770_v15  ;;  %v818_v23 = vpack.i.b16 %v806_v17, %v772_v8  ;;  %v821_v24 = vshrl.u32 %v806_v17, 16 }
 0x2ae   : > { %v834_v27 = vpack.i.b16 %v813_v18, %v779_v11  ;;  %v837_v28 = vshrl.u32 %v813_v18, 16 }
 0x2af   : > { %v822_v29 = vpack.i.b16 %v821_v24, %v820_v20  ;;  %v826_v30 = vpack.i.b16 %v814_v21, %v780_v16  ;;  %v829_v31 = vshrl.u32 %v814_v21, 16  ;;  %v842_v32 = vpack.i.b16 %v815_v22, %v781_v19 }
 0x2b0   : > { %v838_v34 = vpack.i.b16 %v837_v28, %v836_v26  ;;  %v845_v35 = vshrl.u32 %v815_v22, 16  ;;  %v848_v36 = vcombine.low %v818_v23, %v834_v27 }
 0x2b1   : > { %v830_v37 = vpack.i.b16 %v829_v31, %v828_v25  ;;  %v856_v38 = vcombine.low %v826_v30, %v842_v32 }
 0x2b2   : > { %v1199_v39 = vpop.permute.xlu0 %1198  ;;  %v1197_v40 = vpop.permute.xlu1 %1196  ;;  %v846_v41 = vpack.i.b16 %v845_v35, %v844_v33  ;;  %v873_v42 = vcombine.low %v822_v29, %v838_v34  ;;  %v855_v46 = vrot.slane %v848_v36, %v3011_v62 }
 0x2b3   : > { %v1216_v45 = vrot.slane %v1199_v39, %v3011_v62  ;;  %v863_v47 = vrot.slane %v856_v38, %v3011_v62  ;;  %v1242_v59 = vrot.slane %v1197_v40, %v3011_v62 }
 0x2b4   : > { %v881_v48 = vcombine.low %v830_v37, %v846_v41  ;;  %v880_v53 = vrot.slane %v873_v42, %v3011_v62 }
 0x2b5   : > { %v1217_v49 = vcombine.low %v1208_v43, %v1216_v45  ;;  %v1218_v50 = vcombine.high %v1208_v43, %v1216_v45  ;;  %v864_v51 = vcombine.low %v855_v46, %v863_v47 }
 0x2b6   : > { %v1201_v54 = vpop.permute.xlu1 %1200  ;;  %v888_v55 = vrot.slane %v881_v48, %v3011_v62 }
 0x2b7   : > { %v1225_v56 = vrot.slane %v1217_v49, %v3013_v1  ;;  %v1232_v57 = vrot.slane %v1218_v50, %v3013_v1  ;;  %v1250_v52 = vrot.slane %v1201_v54, %v3011_v62  ;;  %v871_v58 = vrot.slane %v864_v51, %v3013_v1 }
 0x2b8   : > { %v889_v60 = vcombine.low %v880_v53, %v888_v55 }
 0x2b9   : > { %v1233_v61 = vcombine.high %v1225_v56, %v2770_v15  ;;  %v1234_v63 = vcombine.high %v1232_v57, %v2770_v15  ;;  %v872_v0 = vcombine.high %v871_v58, %v2770_v15  ;;  %v1251_v2 = vcombine.low %v1242_v59, %v1250_v52 }
 0x2ba   : > { %v896_v3 = vrot.slane %v889_v60, %v3013_v1  ;;  %v902_v4 = vshrl.u32 %v871_v58, 16  ;;  %v1273_v5 = vshrl.u32 %v1225_v56, 16  ;;  %v1252_v6 = vcombine.high %v1242_v59, %v1250_v52 }
 0x2bb   : > { %v1281_v7 = vshrl.u32 %v1233_v61, 16  ;;  %v1289_v8 = vshrl.u32 %v1232_v57, 16  ;;  %v1297_v9 = vshrl.u32 %v1234_v63, 16  ;;  %v1259_v10 = vrot.slane %v1251_v2, %v3013_v1 }
 0x2bc   : > { %v897_v11 = vcombine.high %v896_v3, %v2770_v15  ;;  %v900_v12 = vpack.i.b16 %v896_v3, %v871_v58  ;;  %v903_v14 = vshrl.u32 %v896_v3, 16  ;;  %v1266_v16 = vrot.slane %v1252_v6, %v3013_v1 }
 0x2bd   : > { %v910_v17 = vshrl.u32 %v872_v0, 16  ;;  %v1267_v18 = vcombine.high %v1259_v10, %v2770_v15  ;;  %v1271_v19 = vpack.i.b16 %v1259_v10, %v1225_v56  ;;  %v1274_v20 = vshrl.u32 %v1259_v10, 16 }
 0x2be   : > { %v904_v21 = vpack.i.b16 %v903_v14, %v902_v4  ;;  %v908_v22 = vpack.i.b16 %v897_v11, %v872_v0  ;;  %v911_v23 = vshrl.u32 %v897_v11, 16  ;;  %915 = vst.msk [vmem:[#allocation2] sm:$0xf] %vm914_vm2, %v900_v12  ;;  %v1268_v24 = vcombine.high %v1266_v16, %v2770_v15 }
 0x2bf   : > { %v1275_v25 = vpack.i.b16 %v1274_v20, %v1273_v5  ;;  %v1279_v26 = vpack.i.b16 %v1267_v18, %v1233_v61  ;;  %v1282_v27 = vshrl.u32 %v1267_v18, 16  ;;  %v1287_v28 = vpack.i.b16 %v1266_v16, %v1232_v57 }
 0x2c0   : > { %v912_v29 = vpack.i.b16 %v911_v23, %v910_v17  ;;  %916 = vst.msk [vmem:[#allocation2 + $0x4] sm:$0xf] %vm914_vm2, %v904_v21  ;;  %917 = vst.msk [vmem:[#allocation2 + $0x8] sm:$0xf] %vm914_vm2, %v908_v22  ;;  %v1290_v30 = vshrl.u32 %v1266_v16, 16  ;;  %v1295_v31 = vpack.i.b16 %v1268_v24, %v1234_v63  ;;  %v1298_v32 = vshrl.u32 %v1268_v24, 16 }
 0x2c1   : > { %v1283_v33 = vpack.i.b16 %v1282_v27, %v1281_v7  ;;  %v1301_v34 = vcombine.low %v1271_v19, %v1287_v28  ;;  %v2339_v27 = vld [vmem:[%s3298_s8] ss:$0 sm:$0xff] }
 0x2c2   : > { %918 = vst.msk [vmem:[#allocation2 + $0xc] sm:$0xf] %vm914_vm2, %v912_v29  ;;  %v1291_v35 = vpack.i.b16 %v1290_v30, %v1289_v8  ;;  %v1299_v36 = vpack.i.b16 %v1298_v32, %v1297_v9  ;;  %v1309_v37 = vcombine.low %v1279_v26, %v1295_v31  ;;  %v736_v32 = vadd.f32 %v2339_v27, %v3002_v44 }
 0x2c3   : > { %v1308_v38 = vrot.slane %v1301_v34, %v3011_v62 }
 0x2c4   : > { %v1316_v39 = vrot.slane %v1309_v37, %v3011_v62  ;;  %v1326_v40 = vcombine.low %v1275_v25, %v1291_v35  ;;  %v1334_v41 = vcombine.low %v1283_v33, %v1299_v36  ;;  %v741_v33 = vpack.c.bf16 %v736_v32, %v736_v32 }
 0x2c5   : > { %v1363_v42 = vld [vmem:[#allocation2] sm:$0xf] }
 0x2c6   : > { %v1333_v43 = vrot.slane %v1326_v40, %v3011_v62  ;;  %v1372_v45 = vsel %vm1367_vm3, %v1363_v42, 0  ;;  %v1317_v46 = vcombine.low %v1308_v38, %v1316_v39  ;;  %v1341_v47 = vrot.slane %v1334_v41, %v3011_v62 }
 0x2c7   : > { %2447 = vmatpush3.bf16.xpose.msra.mxu1 %v1372_v45  ;;  %v1364_v48 = vld [vmem:[#allocation2 + $0x4] sm:$0xf]  ;;  %v1365_v54 = vld [vmem:[#allocation2 + $0x8] sm:$0xf] }
 0x2c8   : > { %v1418_v49 = vsel %vm1367_vm3, %v1364_v48, 0  ;;  %v1324_v50 = vrot.slane %v1317_v46, %v3013_v1  ;;  %v1342_v51 = vcombine.low %v1333_v43, %v1341_v47  ;;  %2458 = vmatprep.subr.bf16.mxu1 %v2763_v13  ;;  %v1464_v58 = vsel %vm1367_vm3, %v1365_v54, 0 }
 0x2c9   : > { %2453 = vmatpush3.bf16.xpose.msra.mxu0 %v1418_v49  ;;  %v1366_v52 = vld [vmem:[#allocation2 + $0xc] sm:$0xf]  ;;  %v932_v43 = vrot.slane %v741_v33, %v3011_v62 }
 0x2ca   : > { %v1349_v53 = vrot.slane %v1342_v51, %v3013_v1  ;;  %2464 = vmatprep.subr.bf16.mxu0 %v2763_v13  ;;  %v1354_v56 = vshrl.u32 %v1324_v50, 16  ;;  %v1510_v61 = vsel %vm1367_vm3, %v1366_v52, 0  ;;  %v1325_v63 = vcombine.high %v1324_v50, %v2770_v15 }
 0x2cc   : > { %v1353_v55 = vpack.i.b16 %v1349_v53, %v1324_v50  ;;  %v1355_v57 = vshrl.u32 %v1349_v53, 16  ;;  %v1350_v60 = vcombine.high %v1349_v53, %v2770_v15  ;;  %v1360_v3 = vshrl.u32 %v1325_v63, 16 }
 0x2ce   : > { %2449 = vmatmul.mubr.msk.bf16.vlgmr.msra.gmra.mxu1 %vm1367_vm3, %v1353_v55  ;;  %v1356_v59 = vpack.i.b16 %v1355_v57, %v1354_v56  ;;  %v1361_v0 = vshrl.u32 %v1350_v60, 16  ;;  %v1359_v2 = vpack.i.b16 %v1350_v60, %v1325_v63 }
 0x2cf   : > { %2459 = vmatpush3.bf16.xpose.msra.mxu1 %v1464_v58  ;;  %2460 = vmatprep.mubr.msk.bf16.mxu1 %vm2764_vm1, %v2763_v13 }
 0x2d0   : > { %2455 = vmatmul.mubr.msk.bf16.vlgmr.msra.gmra.mxu0 %vm1367_vm3, %v1356_v59  ;;  %2470 = vmatprep.subr.bf16.mxu1 %v2763_v13  ;;  %v1362_v4 = vpack.i.b16 %v1361_v0, %v1360_v3 }
 0x2d1   : > { %2465 = vmatpush3.bf16.xpose.msra.mxu0 %v1510_v61  ;;  %2466 = vmatprep.mubr.msk.bf16.mxu0 %vm2764_vm1, %v2763_v13 }
 0x2d2   : > { %2476 = vmatprep.subr.bf16.mxu0 %v2763_v13 }
 0x2d6   : > { %2461 = vmatmul.mubr.msk.bf16.vlgmr.msra.gmra.mxu1 %vm1367_vm3, %v1359_v2 }
 0x2d7   : > { %2472 = vmatprep.mubr.msk.bf16.mxu1 %vm2764_vm1, %v2763_v13 }
 0x2d8   : > { %2467 = vmatmul.mubr.msk.bf16.vlgmr.msra.gmra.mxu0 %vm1367_vm3, %v1362_v4 }
 0x2d9   : > { %2478 = vmatprep.mubr.msk.bf16.mxu0 %vm2764_vm1, %v2763_v13 }
 0x38e   : > { %v1408_v5 = vpop.f32.mrf.mxu1 }
 0x38f   : > { %v1552_v6 = vmul.f32 0.35355338, %v1408_v5 }
 0x390   : > { %v2450_v7 = vpop.f32.mrf.mxu1  ;;  %v1454_v8 = vpop.f32.mrf.mxu0 }
 0x391   : > { %v1553_v9 = vmul.f32 0.35355338, %v1454_v8  ;;  %v1556_v10 = vsel %vm1367_vm3, %v1552_v6, -inf }
 0x392   : > { %1557 = vmax.xlane.f32.xlu0 %v1556_v10  ;;  %v1411_v11 = vpop.f32.mrf.mxu1  ;;  %v2456_v12 = vpop.f32.mrf.mxu0 }
 0x393   : > { %v1559_v14 = vsel %vm1367_vm3, %v1553_v9, -inf }
 0x394   : > { %v2451_v16 = vpop.f32.mrf.mxu1  ;;  %1560 = vmax.xlane.f32.xlu1 %v1559_v14  ;;  %v1457_v17 = vpop.f32.mrf.mxu0 }
 0x396   : > { %v2457_v18 = vpop.f32.mrf.mxu0  ;;  %v1500_v19 = vpop.f32.mrf.mxu1 }
 0x397   : > { %v1554_v20 = vmul.f32 0.35355338, %v1500_v19 }
 0x398   : > { %v2462_v21 = vpop.f32.mrf.mxu1  ;;  %v1546_v22 = vpop.f32.mrf.mxu0 }
 0x399   : > { %v1555_v23 = vmul.f32 0.35355338, %v1546_v22  ;;  %v1562_v24 = vsel %vm1367_vm3, %v1554_v20, -inf }
 0x39a   : > { %1563 = vmax.xlane.f32.xlu0 %v1562_v24  ;;  %v1503_v25 = vpop.f32.mrf.mxu1  ;;  %v2468_v26 = vpop.f32.mrf.mxu0 }
 0x39b   : > { %v1565_v30 = vsel %vm1367_vm3, %v1555_v23, -inf }
 0x39c   : > { %v2463_v28 = vpop.f32.mrf.mxu1  ;;  %v1549_v29 = vpop.f32.mrf.mxu0 }
 0x39e   : > { %1566 = vmax.xlane.f32.xlu0 %v1565_v30  ;;  %v2469_v31 = vpop.f32.mrf.mxu0 }
 0x3a5   : > { %922 = vrot.lane.b32.xlu1 %v741_v33, %s2765_s23  ;;  %s2772_s23 = smov 8  }
 0x3a9   : > { %924 = vrot.lane.b32.xlu1 %v741_v33, %s2767_s0 }
 0x3b4   : > { %920 = vrot.lane.b32.xlu0 %v741_v33, %s2766_s20  ;;  %s2773_s20 = smov 24  }
 0x41b   : > { %v1558_v34 = vpop.xlane.xlu0 %1557 }
 0x41c   : > { %v1568_v35 = vsub.f32 %v1552_v6, %v1558_v34 }
 0x41d   : > { %v1561_v36 = vpop.xlane.xlu1 %1560 }
 0x41e   : > { %v1572_v37 = vmul.f32 1.442695, %v1568_v35  ;;  %v1569_v38 = vsub.f32 %v1553_v9, %v1561_v36 }
 0x420   : > { %2631 = vpow2.f32 %v1572_v37  ;;  %v1574_v39 = vmul.f32 1.442695, %v1569_v38 }
 0x421   : > { %v923_v40 = vpop.permute.xlu1 %922 }
 0x422   : > { %2633 = vpow2.f32 %v1574_v39  ;;  %v940_v41 = vrot.slane %v923_v40, %v3011_v62 }
 0x423   : > { %v1564_v42 = vpop.xlane.xlu0 %1563 }
 0x424   : > { %v1570_v44 = vsub.f32 %v1554_v20, %v1564_v42  ;;  %v941_v46 = vcombine.low %v932_v43, %v940_v41  ;;  %v942_v48 = vcombine.high %v932_v43, %v940_v41 }
 0x425   : > { %v925_v49 = vpop.permute.xlu1 %924 }
 0x426   : > { %v1576_v45 = vmul.f32 1.442695, %v1570_v44  ;;  %v949_v51 = vrot.slane %v941_v46, %v3013_v1  ;;  %v974_v55 = vrot.slane %v925_v49, %v3011_v62  ;;  %v956_v52 = vrot.slane %v942_v48, %v3013_v1 }
 0x427   : > { %v1567_v47 = vpop.xlane.xlu0 %1566 }
 0x428   : > { %2635 = vpow2.f32 %v1576_v45  ;;  %v1571_v50 = vsub.f32 %v1555_v23, %v1567_v47  ;;  %v957_v63 = vcombine.high %v949_v51, %v2770_v15  ;;  %v958_v4 = vcombine.high %v956_v52, %v2770_v15 }
 0x429   : > { %v997_v5 = vshrl.u32 %v949_v51, 16  ;;  %v1013_v11 = vshrl.u32 %v956_v52, 16 }
 0x42a   : > { %v1578_v53 = vmul.f32 1.442695, %v1571_v50  ;;  %v1005_v10 = vshrl.u32 %v957_v63, 16  ;;  %v1021_v20 = vshrl.u32 %v958_v4, 16 }
 0x42b   : > { %v921_v54 = vpop.permute.xlu0 %920 }
 0x42c   : > { %v966_v56 = vrot.slane %v921_v54, %v3011_v62  ;;  %2637 = vpow2.f32 %v1578_v53 }
 0x42d   : > { %v3095_v57 = vpop.eup %2631 }
 0x42e   : > { %v975_v58 = vcombine.low %v966_v56, %v974_v55  ;;  %v976_v59 = vcombine.high %v966_v56, %v974_v55  ;;  %v1580_v60 = vsel %vm1367_vm3, %v3095_v57, 0.0 }
 0x42f   : > { %v3100_v61 = vpop.eup %2633  ;;  %1581 = vadd.xlane.f32.xlu1 %v1580_v60 }
 0x430   : > { %v983_v0 = vrot.slane %v975_v58, %v3013_v1  ;;  %v990_v2 = vrot.slane %v976_v59, %v3013_v1  ;;  %v1583_v3 = vsel %vm1367_vm3, %v3100_v61, 0.0 }
 0x431   : > { %1584 = vadd.xlane.f32.xlu0 %v1583_v3 }
 0x432   : > { %v991_v6 = vcombine.high %v983_v0, %v2770_v15  ;;  %v992_v7 = vcombine.high %v990_v2, %v2770_v15  ;;  %v995_v8 = vpack.i.b16 %v983_v0, %v949_v51  ;;  %v998_v9 = vshrl.u32 %v983_v0, 16 }
 0x433   : > { %v1011_v12 = vpack.i.b16 %v990_v2, %v956_v52  ;;  %v1014_v14 = vshrl.u32 %v990_v2, 16 }
 0x434   : > { %v999_v16 = vpack.i.b16 %v998_v9, %v997_v5  ;;  %v1003_v17 = vpack.i.b16 %v991_v6, %v957_v63  ;;  %v1006_v18 = vshrl.u32 %v991_v6, 16  ;;  %v1019_v19 = vpack.i.b16 %v992_v7, %v958_v4 }
 0x435   : > { %v1015_v21 = vpack.i.b16 %v1014_v14, %v1013_v11  ;;  %v1022_v22 = vshrl.u32 %v992_v7, 16  ;;  %v1025_v23 = vcombine.low %v995_v8, %v1011_v12  ;;  %v3110_v24 = vpop.eup %2635 }
 0x436   : > { %v1007_v25 = vpack.i.b16 %v1006_v18, %v1005_v10  ;;  %v1033_v26 = vcombine.low %v1003_v17, %v1019_v19  ;;  %v1586_v29 = vsel %vm1367_vm3, %v3110_v24, 0.0 }
 0x437   : > { %v1023_v27 = vpack.i.b16 %v1022_v22, %v1021_v20  ;;  %v1050_v28 = vcombine.low %v999_v16, %v1015_v21  ;;  %v1032_v30 = vrot.slane %v1025_v23, %v3011_v62  ;;  %1587 = vadd.xlane.f32.xlu0 %v1586_v29 }
 0x438   : > { %v1040_v31 = vrot.slane %v1033_v26, %v3011_v62 }
 0x439   : > { %v1058_v32 = vcombine.low %v1007_v25, %v1023_v27  ;;  %v3116_v33 = vpop.eup %2637  ;;  %v1057_v35 = vrot.slane %v1050_v28, %v3011_v62 }
 0x43a   : > { %v1041_v34 = vcombine.low %v1032_v30, %v1040_v31  ;;  %v1589_v37 = vsel %vm1367_vm3, %v3116_v33, 0.0 }
 0x43b   : > { %v1065_v36 = vrot.slane %v1058_v32, %v3011_v62  ;;  %1590 = vadd.xlane.f32.xlu0 %v1589_v37 }
 0x43c   : > { %v1048_v38 = vrot.slane %v1041_v34, %v3013_v1 }
 0x43d   : > { %v1066_v39 = vcombine.low %v1057_v35, %v1065_v36 }
 0x43e   : > { %v1049_v40 = vcombine.high %v1048_v38, %v2770_v15  ;;  %v1079_v43 = vshrl.u32 %v1048_v38, 16 }
 0x43f   : > { %v1073_v41 = vrot.slane %v1066_v39, %v3013_v1 }
 0x440   : > { %v1087_v48 = vshrl.u32 %v1049_v40, 16 }
 0x441   : > { %v1074_v42 = vcombine.high %v1073_v41, %v2770_v15  ;;  %v1077_v44 = vpack.i.b16 %v1073_v41, %v1048_v38  ;;  %v1080_v45 = vshrl.u32 %v1073_v41, 16  ;;  %v2615_v41 = vld [vmem:[%s3299_s9 + $0x8] sm:$0xff]  }
 0x443   : > { %v1081_v46 = vpack.i.b16 %v1080_v45, %v1079_v43  ;;  %v1085_v47 = vpack.i.b16 %v1074_v42, %v1049_v40  ;;  %v1088_v49 = vshrl.u32 %v1074_v42, 16  ;;  %1091 = vst.msk [vmem:[#allocation3] sm:$0xf] %vm914_vm2, %v1077_v44 }
 0x445   : > { %v1089_v50 = vpack.i.b16 %v1088_v49, %v1087_v48  ;;  %1092 = vst.msk [vmem:[#allocation3 + $0x4] sm:$0xf] %vm914_vm2, %v1081_v46  ;;  %1093 = vst.msk [vmem:[#allocation3 + $0x8] sm:$0xf] %vm914_vm2, %v1085_v47 }
 0x447   : > { %1094 = vst.msk [vmem:[#allocation3 + $0xc] sm:$0xf] %vm914_vm2, %v1089_v50 }
 0x44a   : > { %v1604_v51 = vld [vmem:[#allocation3] sm:$0xf] }
 0x44b   : > { %v1613_v15 = vsel %vm1611_vm4, %v1604_v51, 0  ;;  %v2616_v51 = vld [vmem:[%s3299_s9] sm:$0xff]  }
 0x44c   : > { %2471 = vmatpush3.bf16.msra.mxu1 %v1613_v15  ;;  %v1605_v53 = vld [vmem:[#allocation3 + $0x4] sm:$0xf]  ;;  %v1606_v0 = vld [vmem:[#allocation3 + $0x8] sm:$0xf] }
 0x44d   : > { %v1659_v54 = vsel %vm1611_vm4, %v1605_v53, 0  ;;  %2482 = vmatprep.subr.bf16.mxu1 %v2763_v13  ;;  %v1705_v5 = vsel %vm1611_vm4, %v1606_v0, 0 }
 0x44e   : > { %2477 = vmatpush3.bf16.msra.mxu0 %v1659_v54  ;;  %v1607_v4 = vld [vmem:[#allocation3 + $0xc] sm:$0xf] }
 0x44f   : > { %2488 = vmatprep.subr.bf16.mxu0 %v2763_v13  ;;  %v1751_v7 = vsel %vm1611_vm4, %v1607_v4, 0 }
 0x4b8   : > { %v1582_v55 = vpop.xlane.xlu1 %1581 }
 0x4b9   : > { %2639 = vrcp.f32 %v1582_v55 }
 0x4ba   : > { %v1585_v56 = vpop.xlane.xlu0 %1584 }
 0x4bb   : > { %2641 = vrcp.f32 %v1585_v56 }
 0x4c0   : > { %v1588_v52 = vpop.xlane.xlu0 %1587 }
 0x4c1   : > { %2643 = vrcp.f32 %v1588_v52 }
 0x4c4   : > { %v1591_v58 = vpop.xlane.xlu0 %1590 }
 0x4c5   : > { %2645 = vrcp.f32 %v1591_v58 }
 0x4c6   : > { %v2640_v59 = vpop.eup %2639 }
 0x4c7   : > { %v1596_v60 = vmul.f32 %v2640_v59, %v3095_v57 }
 0x4c8   : > { %v2642_v63 = vpop.eup %2641 }
 0x4c9   : > { %v1600_v2 = vpack.c.bf16 %v1596_v60, %v1596_v60  ;;  %v1597_v3 = vmul.f32 %v2642_v63, %v3100_v61 }
 0x4cb   : > { %2473 = vmatmul.mubr.msk.bf16.vlgmr.msra.gmra.mxu1 %vm1367_vm3, %v1600_v2  ;;  %v1601_v6 = vpack.c.bf16 %v1597_v3, %v1597_v3 }
 0x4cc   : > { %2483 = vmatpush3.bf16.msra.mxu1 %v1705_v5  ;;  %2484 = vmatprep.mubr.msk.bf16.mxu1 %vm2764_vm1, %v2763_v13 }
 0x4cd   : > { %2479 = vmatmul.mubr.msk.bf16.vlgmr.msra.gmra.mxu0 %vm1367_vm3, %v1601_v6  ;;  %2494 = vmatprep.subr.bf16.mxu1 %v2763_v13 }
 0x4ce   : > { %2489 = vmatpush3.bf16.msra.mxu0 %v1751_v7  ;;  %2490 = vmatprep.mubr.msk.bf16.mxu0 %vm2764_vm1, %v2763_v13  ;;  %v2644_v57 = vpop.eup %2643 }
 0x4cf   : > { %2502 = vmatprep.subr.bf16.mxu0 %v2763_v13  ;;  %v1598_v61 = vmul.f32 %v2644_v57, %v3110_v24 }
 0x4d1   : > { %v1602_v8 = vpack.c.bf16 %v1598_v61, %v1598_v61 }
 0x4d2   : > { %v2646_v9 = vpop.eup %2645 }
 0x4d3   : > { %2485 = vmatmul.mubr.msk.bf16.vlgmr.msra.gmra.mxu1 %vm1367_vm3, %v1602_v8  ;;  %v1599_v10 = vmul.f32 %v2646_v9, %v3116_v33 }
 0x4d4   : > { %2498 = vmatprep.mubr.msk.bf16.mxu1 %vm2764_vm1, %v2763_v13  ;;  %2495 = vmatpush3.bf16.msra.mxu1 %v2615_v41  ;;  %v2622_v41 = vld [vmem:[%s3305_s15 + $0x20] sm:$0xff]  }
 0x4d5   : > { %v1603_v11 = vpack.c.bf16 %v1599_v10, %v1599_v10  ;;  %2496 = vmatprep.subr.bf16.mxu1 %v2763_v13  ;;  %v2357_v10 = vld [vmem:[%s3300_s10] ss:$0 sm:$0xff] }
 0x4d7   : > { %2491 = vmatmul.mubr.msk.bf16.vlgmr.msra.gmra.mxu0 %vm1367_vm3, %v1603_v11 }
 0x4d8   : > { %2506 = vmatprep.mubr.msk.bf16.mxu0 %vm2764_vm1, %v2763_v13  ;;  %2497 = vmatpush3.bf16.msra.mxu1 %v2616_v51 }
 0x4d9   : > { %2510 = vmatprep.subr.bf16.mxu1 %v2763_v13 }
 0x58b   : > { %v1649_v12 = vpop.f32.mrf.mxu1 }
 0x58d   : > { %v2474_v14 = vpop.f32.mrf.mxu1  ;;  %v1695_v16 = vpop.f32.mrf.mxu0 }
 0x58f   : > { %v1652_v17 = vpop.f32.mrf.mxu1  ;;  %v2480_v18 = vpop.f32.mrf.mxu0 }
 0x591   : > { %v2475_v19 = vpop.f32.mrf.mxu1  ;;  %v1698_v20 = vpop.f32.mrf.mxu0 }
 0x593   : > { %v2481_v21 = vpop.f32.mrf.mxu0  ;;  %v1741_v22 = vpop.f32.mrf.mxu1 }
 0x594   : > { %v1793_v24 = vcombine.low %v1649_v12, %v1741_v22  ;;  %v1794_v25 = vcombine.high %v1649_v12, %v1741_v22 }
 0x595   : > { %v2486_v23 = vpop.f32.mrf.mxu1 }
 0x596   : > { %v1801_v32 = vrot.slane %v1793_v24, %v3011_v62  ;;  %v1808_v33 = vrot.slane %v1794_v25, %v3011_v62 }
 0x597   : > { %v1744_v26 = vpop.f32.mrf.mxu1  ;;  %v1787_v27 = vpop.f32.mrf.mxu0 }
 0x598   : > { %v1809_v28 = vcombine.low %v1695_v16, %v1787_v27  ;;  %v1810_v29 = vcombine.high %v1695_v16, %v1787_v27  ;;  %v2651_v16 = vld [vmem:[%s2946_s17] sm:$0xff]  ;;  %v2617_v26 = vld [vmem:[#allocation4 + $0x8] sm:$0xff]   ;;  %s2377_s17 = sshll.u32 %s2750_s27, 7 }
 0x599   : > { %v2487_v30 = vpop.f32.mrf.mxu1  ;;  %v2492_v31 = vpop.f32.mrf.mxu0  ;;  %2503 = vmatpush3.bf16.msra.mxu0 %v2617_v26  ;;  %v2618_v27 = vld [vmem:[#allocation4] sm:$0xff]   ;;  %s3243_s21 = scalar_lea.hbm %s3332_s29, %s2377_s17 }
 0x59a   : > { %v1817_v34 = vrot.slane %v1809_v28, %v3011_v62  ;;  %v1824_v35 = vrot.slane %v1810_v29, %v3011_v62  ;;  %2504 = vmatprep.subr.bf16.mxu0 %v2763_v13  ;;  %v2619_v28 = vld [vmem:[%s3305_s15 + $0x38] sm:$0xff]   ;;  %v2620_v29 = vld [vmem:[%s3305_s15 + $0x30] sm:$0xff]  }
 0x59b   : > { %v1790_v36 = vpop.f32.mrf.mxu0 }
 0x59c   : > { %v1825_v37 = vcombine.low %v1801_v32, %v1817_v34  ;;  %v1826_v38 = vcombine.high %v1801_v32, %v1817_v34  ;;  %v1841_v39 = vcombine.low %v1808_v33, %v1824_v35  ;;  %v1842_v40 = vcombine.high %v1808_v33, %v1824_v35  ;;  %v2361_v34 = vld [vmem:[%s3301_s11] ss:$0 sm:$0xff] }
 0x59d   : > { %v2493_v42 = vpop.f32.mrf.mxu0  ;;  %2505 = vmatpush3.bf16.msra.mxu0 %v2618_v27  ;;  %v2362_v36 = vld [vmem:[%s3302_s12] ss:$0 sm:$0xff] }
 0x59e   : > { %v1833_v44 = vrot.slane %v1825_v37, %v3013_v1  ;;  %v1840_v43 = vrot.slane %v1826_v38, %v3013_v1  ;;  %v1849_v45 = vrot.slane %v1841_v39, %v3013_v1  ;;  %v1856_v46 = vrot.slane %v1842_v40, %v3013_v1  ;;  %v2621_v40 = vld [vmem:[%s3305_s15 + $0x28] sm:$0xff]   ;;  %v2623_v42 = vld [vmem:[%s3305_s15 + $0x18] sm:$0xff]  }
 0x5a0   : > { %v1861_v47 = vcombine.low %v1833_v44, %v1840_v43  ;;  %v2355_v48 = vcombine.high %v1833_v44, %v1840_v43  ;;  %v1877_v49 = vcombine.low %v1849_v45, %v1856_v46  ;;  %v2356_v50 = vcombine.high %v1849_v45, %v1856_v46  ;;  %v2624_v44 = vld [vmem:[%s3305_s15 + $0x10] sm:$0xff]   ;;  %v2625_v43 = vld [vmem:[%s3305_s15 + $0x8] sm:$0xff]   ;;  %v2626_v45 = vld [vmem:[%s3305_s15] sm:$0xff]  }
 0x5a1   : > { %v2363_v46 = vld [vmem:[%s3304_s14] ss:$0 sm:$0xff] }
 0x5a2   : > { %v1868_v15 = vrot.slane %v1861_v47, %v3011_v62  ;;  %v1876_v53 = vrot.slane %v2355_v48, %v3011_v62  ;;  %v1884_v54 = vrot.slane %v1877_v49, %v3011_v62  ;;  %v1892_v55 = vrot.slane %v2356_v50, %v3011_v62 }
 0x5a4   : > { %v1894_v56 = vcombine.high %v1868_v15, %v1876_v53  ;;  %v1910_v52 = vcombine.high %v1884_v54, %v1892_v55  ;;  %v1893_v58 = vcombine.low %v1868_v15, %v1876_v53  ;;  %v1909_v59 = vcombine.low %v1884_v54, %v1892_v55 }
 0x5a6   : > { %v1908_v60 = vrot.slane %v1894_v56, %v3013_v1  ;;  %v1924_v63 = vrot.slane %v1910_v52, %v3013_v1  ;;  %v1901_v0 = vrot.slane %v1893_v58, %v3013_v1  ;;  %v1917_v2 = vrot.slane %v1909_v59, %v3013_v1  ;;  %v2367_v52 = vld [vmem:[%s3306_s16] ss:$0 sm:$0xff] }
 0x5a8   : > { %v1927_v3 = vcombine.low %v1908_v60, %v1924_v63  ;;  %v1926_v4 = vcombine.high %v1901_v0, %v1917_v2  ;;  %v1925_v5 = vcombine.low %v1901_v0, %v1917_v2  ;;  %v1928_v62 = vcombine.high %v1908_v60, %v1924_v63 }
 0x5aa   : > { %1934 = vrot.lane.b32.xlu0 %v1927_v3, %s2771_s22  ;;  %1930 = vrot.lane.b32.xlu1 %v1926_v4, %s2772_s23  ;;  %s566_s23 = sand.u32 1, %s2742_s25  }
 0x5ab   : > { %s2230_s27 = scalar_lea.sflag [#allocation6], %s566_s23 }
 0x5ae   : > { %1938 = vrot.lane.b32.xlu1 %v1928_v62, %s2773_s20  ;;  %s2333_s20 = sshll.u32 %s566_s23, 3 }
 0x5af   : > { %s568_s19 = scalar_lea.vmem [#allocation7], %s2333_s20  ;;  %s2774_s20 = smov [#allocation7]  }
 0x5b0   : > { %s2244_s24 = sshll.u32 %s568_s19, 4  ;;  %s2682_s0 = sshll.u32 %s2774_s20, 4  ;;  %s3245_s24 = int_to_ptr.vmem [resolvable:$true] %s2244_s24  ;;  %s2683_s0 = int_to_ptr.vmem [resolvable:$false] %s2682_s0 }
 0x5b1   : > { %s2678_s22 = scalar_lea.vmem %s3245_s24, 128  ;;  %s2684_s30 = scalar_lea.vmem %s2683_s0, 256 }
 0x5b2   : > { %p2679_p10 = scmp.ne.s32.totalorder %s3245_s24, %s2678_s22  ;;  %p2685_p0 = scmp.lt.s32.totalorder %s3245_s24, %s2683_s0 }
 0x5b3   : > { %p2686_p1 = scmp.lt.s32.totalorder %s2684_s30, %s2678_s22 }
 0x5b4   : > { %p2680_p11 = pnand %p2679_p10, %p2905_p4 }
 0x5b5   : > { %p2687_p2 = por %p2686_p1, %p2685_p0 }
 0x5b6   : > { %p2681_p13 = pneg %p2680_p11 }
 0x5b8   : > { %p2688_p3 = pnand %p2687_p2, %p2681_p13 }
 0x61c   : > { %v1931_v6 = vpop.permute.xlu1 %1930  ;;  %v1935_v7 = vpop.permute.xlu0 %1934 }
 0x61d   : > { %v1941_v57 = vsel %vm1367_vm3, %v1925_v5, %v1931_v6 }
 0x61e   : > { %v1943_v8 = vsel %vm1942_vm5, %v1941_v57, %v1935_v7 }
 0x620   : > { %v1939_v61 = vpop.permute.xlu1 %1938 }
 0x621   : > { %v1945_v1 = vsel %vm1944_vm6, %v1943_v8, %v1939_v61 }
 0x622   : > { %v1946_v9 = vpack.c.bf16 %v1945_v1, %v1945_v1 }
 0x624   : > { %2499 = vmatmul.mubr.msk.bf16.vlgmr.msra.gmra.mxu1 %vm581_vm0, %v1946_v9 }
 0x625   : > { %2526 = vmatprep.mubr.msk.bf16.mxu1 %vm2764_vm1, %v2763_v13  ;;  %2511 = vmatpush3.bf16.msra.mxu1 %v2619_v28 }
 0x626   : > { %2512 = vmatprep.subr.bf16.mxu1 %v2763_v13 }
 0x629   : > { %2513 = vmatpush3.bf16.msra.mxu1 %v2620_v29 }
 0x62a   : > { %2514 = vmatprep.subr.bf16.mxu1 %v2763_v13 }
 0x62d   : > { %2515 = vmatpush3.bf16.msra.mxu1 %v2621_v40 }
 0x62e   : > { %2516 = vmatprep.subr.bf16.mxu1 %v2763_v13 }
 0x631   : > { %2517 = vmatpush3.bf16.msra.mxu1 %v2622_v41 }
 0x632   : > { %2518 = vmatprep.subr.bf16.mxu1 %v2763_v13 }
 0x635   : > { %2519 = vmatpush3.bf16.msra.mxu1 %v2623_v42 }
 0x636   : > { %2520 = vmatprep.subr.bf16.mxu1 %v2763_v13 }
 0x639   : > { %2521 = vmatpush3.bf16.msra.mxu1 %v2624_v44 }
 0x63a   : > { %2522 = vmatprep.subr.bf16.mxu1 %v2763_v13 }
 0x63d   : > { %2523 = vmatpush3.bf16.msra.mxu1 %v2625_v43 }
 0x63e   : > { %2524 = vmatprep.subr.bf16.mxu1 %v2763_v13 }
 0x641   : > { %2525 = vmatpush3.bf16.msra.mxu1 %v2626_v45 }
 0x6e4   : > { %v2007_v11 = vpop.f32.mrf.mxu1 }
 0x6e5   : > { %v2008_v12 = vadd.f32 %v2357_v10, %v2007_v11 }
 0x6e6   : > { %v2500_v14 = vpop.f32.mrf.mxu1 }
 0x6e7   : > { %v3186_v17 = vadd.f32 %v2651_v16, %v2008_v12 }
 0x6e8   : > { %v2010_v18 = vpop.f32.mrf.mxu1 }
 0x6e9   : > { %v2016_v19 = vsel %vm581_vm0, %v3186_v17, 0.0 }
 0x6ea   : > { %2017 = vadd.xlane.f32.xlu1 %v2016_v19  ;;  %v2501_v20 = vpop.f32.mrf.mxu1 }
 0x773   : > { %v2018_v21 = vpop.xlane.xlu1 %2017 }
 0x774   : > { %v2019_v22 = vmul.f32 0.03125, %v2018_v21 }
 0x776   : > { %v2020_v23 = vsub.f32 %v3186_v17, %v2019_v22 }
 0x778   : > { %v2021_v24 = vmul.f32 %v2020_v23, %v2020_v23 }
 0x77a   : > { %v2022_v25 = vsel %vm581_vm0, %v2021_v24, 0.0 }
 0x77b   : > { %2023 = vadd.xlane.f32.xlu0 %v2022_v25 }
 0x804   : > { %v2024_v30 = vpop.xlane.xlu0 %2023 }
 0x805   : > { %v2025_v31 = vmul.f32 0.03125, %v2024_v30 }
 0x807   : > { %v2026_v32 = vadd.f32 1e-05, %v2025_v31 }
 0x809   : > { %2647 = vrsqrt.f32 %v2026_v32 }
 0x816   : > { %v2648_v33 = vpop.eup %2647 }
 0x817   : > { %v2028_v35 = vmul.f32 %v2648_v33, %v2020_v23 }
 0x819   : > { %v2035_v37 = vmul.f32 %v2361_v34, %v2028_v35 }
 0x81b   : > { %v2042_v38 = vadd.f32 %v2362_v36, %v2035_v37 }
 0x81d   : > { %v2043_v39 = vpack.c.bf16 %v2042_v38, %v2042_v38 }
 0x81f   : > { %2507 = vmatmul.mubr.msk.bf16.vlgmr.msra.gmra.mxu0 %vm581_vm0, %v2043_v39 }
 0x8df   : > { %v2104_v47 = vpop.f32.mrf.mxu0 }
 0x8e0   : > { %v2105_v48 = vadd.f32 %v2363_v46, %v2104_v47 }
 0x8e1   : > { %v2508_v49 = vpop.f32.mrf.mxu0 }
 0x8e2   : > { %v2111_v50 = vmul.f32 0.70710677, %v2105_v48  ;;  %v2110_v13 = vmul.f32 0.5, %v2105_v48 }
 0x8e3   : > { %v2107_v51 = vpop.f32.mrf.mxu0 }
 0x8e4   : > { %2649 = verf.f32 %v2111_v50 }
 0x8e5   : > { %v2509_v15 = vpop.f32.mrf.mxu0 }
 0x8f1   : > { %v2650_v53 = vpop.eup %2649 }
 0x8f2   : > { %v2113_v54 = vadd.f32 1.0, %v2650_v53 }
 0x8f4   : > { %v2114_v55 = vmul.f32 %v2113_v54, %v2110_v13 }
 0x8f6   : > { %v2115_v56 = vpack.c.bf16 %v2114_v55, %v2114_v55 }
 0x8f8   : > { %2527 = vmatmul.mubr.bf16.vlgmr.msra.gmra.mxu1 %v2115_v56 }
 0x9b8   : > { %v2221_v58 = vpop.f32.mrf.mxu1 }
 0x9b9   : > { %v2222_v59 = vadd.f32 %v2367_v52, %v2221_v58 }
 0x9ba   : > { %v2528_v60 = vpop.f32.mrf.mxu1 }
 0x9bb   : > { %v2227_v63 = vadd.f32 %v2222_v59, %v3186_v17 }
 0x9bc   : > { %v2224_v0 = vpop.f32.mrf.mxu1 }
 0x9bd   : > { %2228 = vst.msk [vmem:[%s568_s19] sm:$0xff] %vm581_vm0, %v2227_v63 }
 0x9be   : > { %v2529_v2 = vpop.f32.mrf.mxu1 }
 0x9bf   : > { %2691 = shalt.err (!%p2688_p3)
}
 0x9c0   : > { %s2692_s17 = scalar_lea.hbm %s3243_s21, 128  ;;  %s2696_s26 = scalar_lea.hbm %s3333_s18, 256 }
 0x9c1   : > { %p2693_p5 = scmp.ne.s32.totalorder %s3243_s21, %s2692_s17  ;;  %p2697_p9 = scmp.lt.s32.totalorder %s3243_s21, %s3333_s18 }
 0x9c2   : > { %p2698_p12 = scmp.lt.s32.totalorder %s2696_s26, %s2692_s17 }
 0x9c3   : > { %p2694_p6 = pnand %p2693_p5, %p2905_p4 }
 0x9c4   : > { %p2699_p10 = por %p2698_p12, %p2697_p9 }
 0x9c5   : > { %p2695_p7 = pneg %p2694_p6 }
 0x9c7   : > { %p2700_p11 = pnand %p2699_p10, %p2695_p7 }
 0x9c9   : > { %2703 = shalt.err (!%p2700_p11)
}
 0x9ca   : > { %2534 = dma.vmem_to_hbm [thread:$0]  (%p2905_p4), %s3245_s24, 128, %s3243_s21, %s2230_s27  }
 0x9cb PF: > { %s3334_s22 = sld [smem:[#allocation13_spill]] }
 0x9cc   : > { %s3335_s20 = sld [smem:[#allocation10_spill]] }
 0x9d1   : > { %p2546_p13 = scmp.ge.s32.totalorder %s3334_s22, 2 }
 0x9d2   : > { %s2256_s30 = sand.u32 1, %s3335_s20  }
 0x9d3   : > { %p2541_p0 = pnand %p2546_p13, %p2912_p8  ;;  %s2257_s23 = scalar_lea.sflag [#allocation6], %s2256_s30 }
 0x9d5   : > { %p2542_p1 = pneg %p2541_p0 }
 0x9d7   : > { %2733 = dma.done.wait (%p2542_p1), %s2257_s23, 128  }
 0x9d8   : > { %2735 = vsyncadd (%p2542_p1), %s2257_s23, 4294967168  ;;  %s31_s29 = sadd.s32 1, %s3334_s22   ;;  %s3337_s1 = sld [smem:[#allocation11_spill]] }
 0x9d9   : > { %p28_p2 = scmp.ge.s32.totalorder %s31_s29, 4   ;;  %s3338_s26 = sld [smem:[#allocation16_spill]] }
 0x9da   : > { %s3339_s27 = sld [smem:[#allocation12_spill]]  ;;  %s3341_s24 = smov %s2742_s25 }
 0x9db   : > { %s3340_s28 = sld [smem:[#allocation14_spill]]  ;;  %30 = sbr.rel (!%p28_p2) target bundleno = 9 (0x9), region = 133 }
 0x9de   : > { %s3342_s25 = smov %s3337_s1 }
 0x9e0   :  { %2262 = vsyncpa [#allocation5], 1 }
 0x9e1   :  { %2264 = vsyncpa [#allocation5 + $0x1], 1 }
 0x9e2   :  { %2265 = vsyncpa [#allocation6], 1 }
 0x9e3   :  { %2267 = vsyncpa [#allocation6 + $0x1], 1 }

// kernel: tpu_custom_call.1
= control target key start
LH: loop header
LB: loop body
LE: loop exit
PB: predicated region body
PF: predicated region fallthrough
CT: control target
= control target key end

     0   :  { %s3290_s0 = inlined_call_operand.vmem [shape: f32[2,8,32], index: 0, kind: input, shape index: {}]   ;;  %s3291_s1 = inlined_call_operand.vmem [shape: f32[1,32], index: 1, kind: input, shape index: {}]   ;;  %s3292_s2 = inlined_call_operand.vmem [shape: f32[1,32], index: 2, kind: input, shape index: {}]   ;;  %s3293_s3 = inlined_call_operand.vmem [shape: bf16[32,32], index: 3, kind: input, shape index: {}]   ;;  %s3294_s4 = inlined_call_operand.vmem [shape: f32[1,32], index: 4, kind: input, shape index: {}]   ;;  %s3295_s5 = inlined_call_operand.vmem [shape: bf16[32,32], index: 5, kind: input, shape index: {}]   ;;  %s3296_s6 = inlined_call_operand.vmem [shape: f32[1,32], index: 6, kind: input, shape index: {}]   ;;  %s3297_s7 = inlined_call_operand.vmem [shape: bf16[32,32], index: 7, kind: input, shape index: {}]   ;;  %s3298_s8 = inlined_call_operand.vmem [shape: f32[1,32], index: 8, kind: input, shape index: {}]   ;;  %s3299_s9 = inlined_call_operand.vmem [shape: bf16[32,32], index: 9, kind: input, shape index: {}]   ;;  %s3300_s10 = inlined_call_operand.vmem [shape: f32[1,32], index: 10, kind: input, shape index: {}]   ;;  %s3301_s11 = inlined_call_operand.vmem [shape: f32[1,32], index: 11, kind: input, shape index: {}]   ;;  %s3302_s12 = inlined_call_operand.vmem [shape: f32[1,32], index: 12, kind: input, shape index: {}]   ;;  %s3303_s13 = inlined_call_operand.hbm [shape: bf16[32,128], index: 13, kind: input, shape index: {}]   ;;  %s3304_s14 = inlined_call_operand.vmem [shape: f32[1,128], index: 14, kind: input, shape index: {}]   ;;  %s3305_s15 = inlined_call_operand.vmem [shape: bf16[128,32], index: 15, kind: input, shape index: {}]   ;;  %s3306_s16 = inlined_call_operand.vmem [shape: f32[1,32], index: 16, kind: input, shape index: {}]   ;;  %s3307_s17 = inlined_call_operand.hbm [shape: f32[2,8,32], index: 17, kind: output, shape index: {}]  }
   0x1   :  { %3316 = sst [smem:[#allocation17_spill]] %s3290_s0 }
   0x2   :  { %3317 = sst [smem:[#allocation18_spill]] %s3291_s1 }
   0x3   :  { %3318 = sst [smem:[#allocation19_spill]] %s3307_s17 }
   0x4   :  { %22 = vsyncpa [#allocation5], 0 }
   0x5   :  { %23 = vsyncpa [#allocation6], 0 }
   0x6   :  { %25 = vsyncpa [#allocation6 + $0x1], 0  ;;  %s2865_s24 = smov 0   ;;  %s2867_s25 = smov 0  }
   0x7   :  { %s2869_s26 = smov 0   ;;  %s2871_s27 = smov 0  }
   0x8   :  { %s2873_s28 = smov 0   ;;  %s2875_s29 = smov 0  }
   0x9 LB: > { %3319 = sst [smem:[#allocation10_spill]] %s2738_s24  ;;  %s2326_s0 = sadd.s32 4294967295, %s2758_s29   ;;  %s2758_s29 = sphi %s2875_s29, %s31_s29   ;;  %s2754_s28 = sphi %s2873_s28, %s3340_s28   ;;  %s2750_s27 = sphi %s2871_s27, %s3339_s27   ;;  %s2746_s26 = sphi %s2869_s26, %s3338_s26   ;;  %s2742_s25 = sphi %s2867_s25, %s3342_s25   ;;  %s2738_s24 = sphi %s2865_s24, %s3341_s24  }
   0xa   : > { %3320 = sst [smem:[#allocation11_spill]] %s2746_s26  ;;  %s2327_s30 = sadd.s32 4294967294, %s2758_s29  }
   0xb   : > { %3321 = sst [smem:[#allocation12_spill]] %s2754_s28  ;;  %s43_s18 = sadd.s32 1, %s2754_s28 }
   0xc   : > { %3322 = sst [smem:[#allocation13_spill]] %s2758_s29  ;;  %s414_s19 = sadd.s32 1, %s2746_s26 }
   0xd   : > { %p45_p0 = scmp.ge.s32.totalorder %s43_s18, 2  ;;  %p424_p1 = scmp.ne.s32.totalorder %s2746_s26, %s2742_s25 }
   0xe   : > { %p425_p2 = scmp.eq.s32.totalorder %s2326_s0, 1  ;;  %p430_p3 = scmp.ne.s32.totalorder %s2742_s25, %s2738_s24 }
   0xf   : > { %s3344_s18 = smov (%p45_p0, %s43_s18), 0  ;;  %p431_p5 = scmp.eq.s32.totalorder %s2327_s30, 1 }
  0x10   : > { %3323 = sst [smem:[#allocation14_spill]] %s3344_s18  ;;  %p2905_p4 = por %p425_p2, %p424_p1 }
  0x11   : > { %s409_s20 = ssub.s32 %s2754_s28, %s3344_s18  ;;  %p2328_p6 = scmp.ge.s32.totalorder %s2758_s29, 1 }
  0x12   : > { %p412_p7 = scmp.eq.s32.totalorder %s409_s20, 0  ;;  %p2912_p8 = por %p431_p5, %p430_p3 }
  0x13   : > { %p438_p9 = scmp.lt.s32.totalorder %s2758_s29, 3  ;;  %p2924_p11 = scmp.eq.s32.totalorder %s2326_s0, 0 }
  0x14   : > { %s3325_s21 = scalar_select %p2912_p8, 1, 0 }
  0x15   : > { %s2918_s22 = scalar_select %p412_p7, %s2746_s26, %s414_s19  }
  0x16   : > { %3326 = sst [smem:[#allocation15_spill]] %s3325_s21  ;;  %p2920_p10 = pnand %p2328_p6, %p438_p9 }
  0x17   : > { %3327 = sst [smem:[#allocation16_spill]] %s2918_s22  ;;  %s2760_s30 = smov [#allocation4]  }
  0x18   : > { %p2536_p12 = pneg %p2920_p10  ;;  %s486_s20 = sshll.u32 %s2760_s30, 4  ;;  %s487_s20 = int_to_ptr.vmem [resolvable:$true] %s486_s20 }
  0x19   : > { %s2663_s19 = scalar_lea.vmem %s487_s20, 256  ;;  %p2671_p5 = scmp.lt.s32.totalorder %s487_s20, %s487_s20 }
  0x1a   : > { %p2537_p13 = pnand %p2924_p11, %p2536_p12  ;;  %p2664_p1 = scmp.ne.s32.totalorder %s487_s20, %s2663_s19 }
  0x1b   : > { %p2672_p6 = scmp.lt.s32.totalorder %s2663_s19, %s2663_s19 }
  0x1c   : > { %p2654_p0 = pneg %p2537_p13 }
  0x1d   : > { %p2673_p7 = por %p2672_p6, %p2671_p5 }
  0x1e   : > { %p2666_p2 = pnand %p2664_p1, %p2654_p0 }
  0x20   : > { %p2667_p3 = pneg %p2666_p2 }
  0x22   : > { %p2674_p9 = pnand %p2673_p7, %p2667_p3 }
  0x24   : > { %2677 = shalt.err (!%p2674_p9)
}
  0x25   : > { %s2761_s0 = smov 64   ;;  %s2762_s18 = smov 4  }
  0x26   : > { %2539 = dma.hbm_to_vmem [thread:$0]  (!%p2537_p13), %s3303_s13, 256, %s487_s20, [#allocation5], %s2761_s0, %s2761_s0, %s2762_s18  }
  0x27   : > { %518 = sbr.rel (%p2920_p10) target bundleno = 2507 (0x9cb), region = 88 }
  0x2c   : > { %2729 = dma.done.wait (%p2924_p11), [#allocation5], 256  }
  0x2d   : > { %2731 = vsyncadd (%p2924_p11), [#allocation5], 4294967040  ;;  %p569_p12 = scmp.lt.s32.totalorder %s2750_s27, 1  ;;  %s3330_s29 = sld [smem:[#allocation17_spill]]  ;;  %vm581_vm0 = vcmask 261120   ;;  %v2609_v12 = vld [vmem:[%s3295_s5 + $0x8] sm:$0xff]   ;;  %v597_v55 = vlaneseq }
  0x2e   : > { %v2763_v13 = vmov 0.0   ;;  %vm2764_vm1 = vmmov 0   ;;  %v2610_v14 = vld [vmem:[%s3295_s5] sm:$0xff]   ;;  %s3331_s22 = sld [smem:[#allocation18_spill]]  ;;  %v2611_v27 = vld [vmem:[%s3297_s7 + $0x8] sm:$0xff]   ;;  %s2765_s23 = smov 112  }
  0x2f   : > { %s570_s30 = scalar_select %p569_p12, %s2750_s27, 1  ;;  %2422 = vmatprep.subr.bf16.mxu0 %v2763_v13  ;;  %2426 = vmatprep.mubr.msk.bf16.mxu0 %vm2764_vm1, %v2763_v13  ;;  %v2381_v24 = vld [vmem:[%s3292_s2] ss:$0 sm:$0xff]  ;;  %v2613_v32 = vld [vmem:[%s3293_s3 + $0x8] sm:$0xff]   ;;  %v2768_v56 = vmov 1983009808  }
  0x30   : > { %2423 = vmatpush3.bf16.msra.mxu0 %v2609_v12  ;;  %2446 = vmatprep.subr.bf16.mxu1 %v2763_v13  ;;  %v2612_v30 = vld [vmem:[%s3297_s7] sm:$0xff]   ;;  %s2766_s20 = smov 120   ;;  %s2767_s0 = smov 104   ;;  %v750_v57 = vunpack.c.l.s4 %v2768_v56  ;;  %v598_v58 = vshrl.u32 %v597_v55, 7  ;;  %v2769_v60 = vmov 1934713408  }
  0x31   : > { %s2334_s19 = sshll.u32 %s570_s30, 3  ;;  %2424 = vmatprep.subr.bf16.mxu0 %v2763_v13  ;;  %2448 = vmatprep.mubr.msk.bf16.mxu1 %vm2764_vm1, %v2763_v13  ;;  %v2614_v34 = vld [vmem:[%s3293_s3] sm:$0xff]   ;;  %v767_v61 = vunpack.c.l.s4 %v2769_v60  ;;  %vm914_vm2 = vcmask 60416   ;;  %vm1367_vm3 = vcmask 64512   ;;  %vm1611_vm4 = vcmask 1043456  }
  0x32   : > { %v2335_v37 = vld [vmem:[%s3296_s6] ss:$0 sm:$0xff]  ;;  %v751_v59 = vunpack.c.0.s8 %v750_v57  ;;  %vm1942_vm5 = vcmask 130048   ;;  %vm1944_vm6 = vcmask 195584  }
  0x33   : > { %s2946_s17 = scalar_lea.vmem %s3330_s29, %s2334_s19  ;;  %v2343_v48 = vld [vmem:[%s3294_s4] ss:$0 sm:$0xff]  ;;  %v768_v63 = vunpack.c.0.s8 %v767_v61  ;;  %s3332_s29 = sld [smem:[#allocation19_spill]] }
  0x34   : > { %v580_v0 = vld [vmem:[%s2946_s17] sm:$0xff]  ;;  %2425 = vmatpush3.bf16.msra.mxu0 %v2610_v14  ;;  %v3011_v62 = vsub.s32 %v751_v59, %v598_v58 }
  0x35   : > { %v582_v1 = vsel %vm581_vm0, %v580_v0, 0.0  ;;  %2430 = vmatprep.subr.bf16.mxu0 %v2763_v13  ;;  %v2380_v22 = vld [vmem:[%s3331_s22] ss:$0 sm:$0xff]  ;;  %s2771_s22 = smov 16  }
  0x36   : > { %583 = vadd.xlane.f32.xlu0 %v582_v1 }
  0x39   : > { %s3333_s18 = smov %s3332_s29 }
  0x3a   : > { %1100 = vadd.xlane.f32.xlu0 %v582_v1  ;;  %v3013_v1 = vsub.s32 %v768_v63, %v598_v58 }
  0xbf   : > { %v584_v2 = vpop.xlane.xlu0 %583 }
  0xc0   : > { %v586_v3 = vmul.f32 0.03125, %v584_v2 }
  0xc2   : > { %v587_v4 = vsub.f32 %v580_v0, %v586_v3 }
  0xc3   : > { %v1101_v5 = vpop.xlane.xlu0 %1100 }
  0xc4   : > { %v1103_v6 = vmul.f32 0.03125, %v1101_v5  ;;  %v588_v7 = vmul.f32 %v587_v4, %v587_v4 }
  0xc6   : > { %v1104_v8 = vsub.f32 %v580_v0, %v1103_v6  ;;  %v589_v9 = vsel %vm581_vm0, %v588_v7, 0.0 }
  0xc7   : > { %590 = vadd.xlane.f32.xlu1 %v589_v9 }
  0xc8   : > { %v1105_v10 = vmul.f32 %v1104_v8, %v1104_v8 }
  0xca   : > { %v1106_v11 = vsel %vm581_vm0, %v1105_v10, 0.0 }
  0xcb   : > { %1107 = vadd.xlane.f32.xlu1 %v1106_v11 }
 0x150   : > { %v591_v15 = vpop.xlane.xlu1 %590 }
 0x151   : > { %v592_v16 = vmul.f32 0.03125, %v591_v15  ;;  %v2770_v15 = vmov 0  }
 0x153   : > { %v593_v17 = vadd.f32 1e-05, %v592_v16 }
 0x154   : > { %v1108_v18 = vpop.xlane.xlu1 %1107 }
 0x155   : > { %2627 = vrsqrt.f32 %v593_v17  ;;  %v1109_v19 = vmul.f32 0.03125, %v1108_v18 }
 0x157   : > { %v1110_v20 = vadd.f32 1e-05, %v1109_v19 }
 0x159   : > { %2629 = vrsqrt.f32 %v1110_v20 }
 0x162   : > { %v2628_v21 = vpop.eup %2627 }
 0x163   : > { %v595_v23 = vmul.f32 %v2628_v21, %v587_v4 }
 0x165   : > { %v602_v25 = vmul.f32 %v2380_v22, %v595_v23 }
 0x166   : > { %v2630_v29 = vpop.eup %2629 }
 0x167   : > { %v609_v26 = vadd.f32 %v2381_v24, %v602_v25  ;;  %v1112_v31 = vmul.f32 %v2630_v29, %v1104_v8 }
 0x169   : > { %v610_v28 = vpack.c.bf16 %v609_v26, %v609_v26  ;;  %v1119_v33 = vmul.f32 %v2380_v22, %v1112_v31 }
 0x16b   : > { %2427 = vmatmul.mubr.msk.bf16.vlgmr.msra.gmra.mxu0 %vm581_vm0, %v610_v28  ;;  %v1126_v35 = vadd.f32 %v2381_v24, %v1119_v33 }
 0x16c   : > { %2431 = vmatpush3.bf16.msra.mxu0 %v2611_v27  ;;  %2434 = vmatprep.mubr.msk.bf16.mxu0 %vm2764_vm1, %v2763_v13 }
 0x16d   : > { %2432 = vmatprep.subr.bf16.mxu0 %v2763_v13  ;;  %v1127_v36 = vpack.c.bf16 %v1126_v35, %v1126_v35 }
 0x170   : > { %2433 = vmatpush3.bf16.msra.mxu0 %v2612_v30 }
 0x171   : > { %2438 = vmatprep.subr.bf16.mxu0 %v2763_v13 }
 0x173   : > { %2435 = vmatmul.mubr.msk.bf16.vlgmr.msra.gmra.mxu0 %vm581_vm0, %v610_v28 }
 0x174   : > { %2439 = vmatpush3.bf16.msra.mxu0 %v2613_v32  ;;  %2442 = vmatprep.mubr.msk.bf16.mxu0 %vm2764_vm1, %v2763_v13 }
 0x175   : > { %2440 = vmatprep.subr.bf16.mxu0 %v2763_v13 }
 0x178   : > { %2441 = vmatpush3.bf16.msra.mxu0 %v2614_v34 }
 0x179   : > { %2452 = vmatprep.subr.bf16.mxu0 %v2763_v13 }
 0x17b   : > { %2443 = vmatmul.mubr.msk.bf16.vlgmr.msra.gmra.mxu0 %vm581_vm0, %v1127_v36 }
 0x17c   : > { %2454 = vmatprep.mubr.msk.bf16.mxu0 %vm2764_vm1, %v2763_v13 }
 0x22b   : > { %v671_v38 = vpop.f32.mrf.mxu0 }
 0x22c   : > { %v672_v39 = vadd.f32 %v2335_v37, %v671_v38 }
 0x22d   : > { %v2428_v40 = vpop.f32.mrf.mxu0 }
 0x22e   : > { %v677_v41 = vpack.c.bf16 %v672_v39, %v672_v39 }
 0x22f   : > { %v674_v42 = vpop.f32.mrf.mxu0 }
 0x230   : > { %745 = vrot.lane.b32.xlu1 %v677_v41, %s2765_s23  ;;  %743 = vrot.lane.b32.xlu0 %v677_v41, %s2766_s20  ;;  %v755_v2 = vrot.slane %v677_v41, %v3011_v62 }
 0x231   : > { %v2429_v43 = vpop.f32.mrf.mxu0 }
 0x233   : > { %v3002_v44 = vpop.f32.mrf.mxu0 }
 0x234   : > { %747 = vrot.lane.b32.xlu1 %v677_v41, %s2767_s0 }
 0x235   : > { %v2436_v45 = vpop.f32.mrf.mxu0 }
 0x237   : > { %v738_v46 = vpop.f32.mrf.mxu0 }
 0x239   : > { %v2437_v47 = vpop.f32.mrf.mxu0 }
 0x23b   : > { %v1188_v49 = vpop.f32.mrf.mxu0 }
 0x23c   : > { %v1189_v50 = vadd.f32 %v2343_v48, %v1188_v49 }
 0x23d   : > { %v2444_v51 = vpop.f32.mrf.mxu0 }
 0x23e   : > { %v1194_v52 = vpack.c.bf16 %v1189_v50, %v1189_v50 }
 0x23f   : > { %v1191_v53 = vpop.f32.mrf.mxu0 }
 0x240   : > { %1198 = vrot.lane.b32.xlu0 %v1194_v52, %s2765_s23  ;;  %1196 = vrot.lane.b32.xlu1 %v1194_v52, %s2766_s20  ;;  %v1208_v43 = vrot.slane %v1194_v52, %v3011_v62 }
 0x241   : > { %v2445_v54 = vpop.f32.mrf.mxu0 }
 0x244   : > { %1200 = vrot.lane.b32.xlu1 %v1194_v52, %s2767_s0 }
 0x2a2   : > { %v746_v0 = vpop.permute.xlu1 %745  ;;  %v744_v6 = vpop.permute.xlu0 %743 }
 0x2a3   : > { %v763_v3 = vrot.slane %v746_v0, %v3011_v62  ;;  %v789_v10 = vrot.slane %v744_v6, %v3011_v62 }
 0x2a5   : > { %v764_v4 = vcombine.low %v755_v2, %v763_v3  ;;  %v765_v5 = vcombine.high %v755_v2, %v763_v3 }
 0x2a6   : > { %v748_v7 = vpop.permute.xlu1 %747 }
 0x2a7   : > { %v772_v8 = vrot.slane %v764_v4, %v3013_v1  ;;  %v797_v9 = vrot.slane %v748_v7, %v3011_v62  ;;  %v779_v11 = vrot.slane %v765_v5, %v3013_v1 }
 0x2a9   : > { %v798_v12 = vcombine.low %v789_v10, %v797_v9  ;;  %v799_v14 = vcombine.high %v789_v10, %v797_v9  ;;  %v780_v16 = vcombine.high %v772_v8, %v2770_v15  ;;  %v781_v19 = vcombine.high %v779_v11, %v2770_v15 }
 0x2aa   : > { %v820_v20 = vshrl.u32 %v772_v8, 16  ;;  %v836_v26 = vshrl.u32 %v779_v11, 16 }
 0x2ab   : > { %v806_v17 = vrot.slane %v798_v12, %v3013_v1  ;;  %v813_v18 = vrot.slane %v799_v14, %v3013_v1  ;;  %v828_v25 = vshrl.u32 %v780_v16, 16  ;;  %v844_v33 = vshrl.u32 %v781_v19, 16 }
 0x2ad   : > { %v814_v21 = vcombine.high %v806_v17, %v2770_v15  ;;  %v815_v22 = vcombine.high %v813_v18, %v2770_v15  ;;  %v818_v23 = vpack.i.b16 %v806_v17, %v772_v8  ;;  %v821_v24 = vshrl.u32 %v806_v17, 16 }
 0x2ae   : > { %v834_v27 = vpack.i.b16 %v813_v18, %v779_v11  ;;  %v837_v28 = vshrl.u32 %v813_v18, 16 }
 0x2af   : > { %v822_v29 = vpack.i.b16 %v821_v24, %v820_v20  ;;  %v826_v30 = vpack.i.b16 %v814_v21, %v780_v16  ;;  %v829_v31 = vshrl.u32 %v814_v21, 16  ;;  %v842_v32 = vpack.i.b16 %v815_v22, %v781_v19 }
 0x2b0   : > { %v838_v34 = vpack.i.b16 %v837_v28, %v836_v26  ;;  %v845_v35 = vshrl.u32 %v815_v22, 16  ;;  %v848_v36 = vcombine.low %v818_v23, %v834_v27 }
 0x2b1   : > { %v830_v37 = vpack.i.b16 %v829_v31, %v828_v25  ;;  %v856_v38 = vcombine.low %v826_v30, %v842_v32 }
 0x2b2   : > { %v1199_v39 = vpop.permute.xlu0 %1198  ;;  %v1197_v40 = vpop.permute.xlu1 %1196  ;;  %v846_v41 = vpack.i.b16 %v845_v35, %v844_v33  ;;  %v873_v42 = vcombine.low %v822_v29, %v838_v34  ;;  %v855_v46 = vrot.slane %v848_v36, %v3011_v62 }
 0x2b3   : > { %v1216_v45 = vrot.slane %v1199_v39, %v3011_v62  ;;  %v863_v47 = vrot.slane %v856_v38, %v3011_v62  ;;  %v1242_v59 = vrot.slane %v1197_v40, %v3011_v62 }
 0x2b4   : > { %v881_v48 = vcombine.low %v830_v37, %v846_v41  ;;  %v880_v53 = vrot.slane %v873_v42, %v3011_v62 }
 0x2b5   : > { %v1217_v49 = vcombine.low %v1208_v43, %v1216_v45  ;;  %v1218_v50 = vcombine.high %v1208_v43, %v1216_v45  ;;  %v864_v51 = vcombine.low %v855_v46, %v863_v47 }
 0x2b6   : > { %v1201_v54 = vpop.permute.xlu1 %1200  ;;  %v888_v55 = vrot.slane %v881_v48, %v3011_v62 }
 0x2b7   : > { %v1225_v56 = vrot.slane %v1217_v49, %v3013_v1  ;;  %v1232_v57 = vrot.slane %v1218_v50, %v3013_v1  ;;  %v1250_v52 = vrot.slane %v1201_v54, %v3011_v62  ;;  %v871_v58 = vrot.slane %v864_v51, %v3013_v1 }
 0x2b8   : > { %v889_v60 = vcombine.low %v880_v53, %v888_v55 }
 0x2b9   : > { %v1233_v61 = vcombine.high %v1225_v56, %v2770_v15  ;;  %v1234_v63 = vcombine.high %v1232_v57, %v2770_v15  ;;  %v872_v0 = vcombine.high %v871_v58, %v2770_v15  ;;  %v1251_v2 = vcombine.low %v1242_v59, %v1250_v52 }
 0x2ba   : > { %v896_v3 = vrot.slane %v889_v60, %v3013_v1  ;;  %v902_v4 = vshrl.u32 %v871_v58, 16  ;;  %v1273_v5 = vshrl.u32 %v1225_v56, 16  ;;  %v1252_v6 = vcombine.high %v1242_v59, %v1250_v52 }
 0x2bb   : > { %v1281_v7 = vshrl.u32 %v1233_v61, 16  ;;  %v1289_v8 = vshrl.u32 %v1232_v57, 16  ;;  %v1297_v9 = vshrl.u32 %v1234_v63, 16  ;;  %v1259_v10 = vrot.slane %v1251_v2, %v3013_v1 }
 0x2bc   : > { %v897_v11 = vcombine.high %v896_v3, %v2770_v15  ;;  %v900_v12 = vpack.i.b16 %v896_v3, %v871_v58  ;;  %v903_v14 = vshrl.u32 %v896_v3, 16  ;;  %v1266_v16 = vrot.slane %v1252_v6, %v3013_v1 }
 0x2bd   : > { %v910_v17 = vshrl.u32 %v872_v0, 16  ;;  %v1267_v18 = vcombine.high %v1259_v10, %v2770_v15  ;;  %v1271_v19 = vpack.i.b16 %v1259_v10, %v1225_v56  ;;  %v1274_v20 = vshrl.u32 %v1259_v10, 16 }
 0x2be   : > { %v904_v21 = vpack.i.b16 %v903_v14, %v902_v4  ;;  %v908_v22 = vpack.i.b16 %v897_v11, %v872_v0  ;;  %v911_v23 = vshrl.u32 %v897_v11, 16  ;;  %915 = vst.msk [vmem:[#allocation2] sm:$0xf] %vm914_vm2, %v900_v12  ;;  %v1268_v24 = vcombine.high %v1266_v16, %v2770_v15 }
 0x2bf   : > { %v1275_v25 = vpack.i.b16 %v1274_v20, %v1273_v5  ;;  %v1279_v26 = vpack.i.b16 %v1267_v18, %v1233_v61  ;;  %v1282_v27 = vshrl.u32 %v1267_v18, 16  ;;  %v1287_v28 = vpack.i.b16 %v1266_v16, %v1232_v57 }
 0x2c0   : > { %v912_v29 = vpack.i.b16 %v911_v23, %v910_v17  ;;  %916 = vst.msk [vmem:[#allocation2 + $0x4] sm:$0xf] %vm914_vm2, %v904_v21  ;;  %917 = vst.msk [vmem:[#allocation2 + $0x8] sm:$0xf] %vm914_vm2, %v908_v22  ;;  %v1290_v30 = vshrl.u32 %v1266_v16, 16  ;;  %v1295_v31 = vpack.i.b16 %v1268_v24, %v1234_v63  ;;  %v1298_v32 = vshrl.u32 %v1268_v24, 16 }
 0x2c1   : > { %v1283_v33 = vpack.i.b16 %v1282_v27, %v1281_v7  ;;  %v1301_v34 = vcombine.low %v1271_v19, %v1287_v28  ;;  %v2339_v27 = vld [vmem:[%s3298_s8] ss:$0 sm:$0xff] }
 0x2c2   : > { %918 = vst.msk [vmem:[#allocation2 + $0xc] sm:$0xf] %vm914_vm2, %v912_v29  ;;  %v1291_v35 = vpack.i.b16 %v1290_v30, %v1289_v8  ;;  %v1299_v36 = vpack.i.b16 %v1298_v32, %v1297_v9  ;;  %v1309_v37 = vcombine.low %v1279_v26, %v1295_v31  ;;  %v736_v32 = vadd.f32 %v2339_v27, %v3002_v44 }
 0x2c3   : > { %v1308_v38 = vrot.slane %v1301_v34, %v3011_v62 }
 0x2c4   : > { %v1316_v39 = vrot.slane %v1309_v37, %v3011_v62  ;;  %v1326_v40 = vcombine.low %v1275_v25, %v1291_v35  ;;  %v1334_v41 = vcombine.low %v1283_v33, %v1299_v36  ;;  %v741_v33 = vpack.c.bf16 %v736_v32, %v736_v32 }
 0x2c5   : > { %v1363_v42 = vld [vmem:[#allocation2] sm:$0xf] }
 0x2c6   : > { %v1333_v43 = vrot.slane %v1326_v40, %v3011_v62  ;;  %v1372_v45 = vsel %vm1367_vm3, %v1363_v42, 0  ;;  %v1317_v46 = vcombine.low %v1308_v38, %v1316_v39  ;;  %v1341_v47 = vrot.slane %v1334_v41, %v3011_v62 }
 0x2c7   : > { %2447 = vmatpush3.bf16.xpose.msra.mxu1 %v1372_v45  ;;  %v1364_v48 = vld [vmem:[#allocation2 + $0x4] sm:$0xf]  ;;  %v1365_v54 = vld [vmem:[#allocation2 + $0x8] sm:$0xf] }
 0x2c8   : > { %v1418_v49 = vsel %vm1367_vm3, %v1364_v48, 0  ;;  %v1324_v50 = vrot.slane %v1317_v46, %v3013_v1  ;;  %v1342_v51 = vcombine.low %v1333_v43, %v1341_v47  ;;  %2458 = vmatprep.subr.bf16.mxu1 %v2763_v13  ;;  %v1464_v58 = vsel %vm1367_vm3, %v1365_v54, 0 }
 0x2c9   : > { %2453 = vmatpush3.bf16.xpose.msra.mxu0 %v1418_v49  ;;  %v1366_v52 = vld [vmem:[#allocation2 + $0xc] sm:$0xf]  ;;  %v932_v43 = vrot.slane %v741_v33, %v3011_v62 }
 0x2ca   : > { %v1349_v53 = vrot.slane %v1342_v51, %v3013_v1  ;;  %2464 = vmatprep.subr.bf16.mxu0 %v2763_v13  ;;  %v1354_v56 = vshrl.u32 %v1324_v50, 16  ;;  %v1510_v61 = vsel %vm1367_vm3, %v1366_v52, 0  ;;  %v1325_v63 = vcombine.high %v1324_v50, %v2770_v15 }
 0x2cc   : > { %v1353_v55 = vpack.i.b16 %v1349_v53, %v1324_v50  ;;  %v1355_v57 = vshrl.u32 %v1349_v53, 16  ;;  %v1350_v60 = vcombine.high %v1349_v53, %v2770_v15  ;;  %v1360_v3 = vshrl.u32 %v1325_v63, 16 }
 0x2ce   : > { %2449 = vmatmul.mubr.msk.bf16.vlgmr.msra.gmra.mxu1 %vm1367_vm3, %v1353_v55  ;;  %v1356_v59 = vpack.i.b16 %v1355_v57, %v1354_v56  ;;  %v1361_v0 = vshrl.u32 %v1350_v60, 16  ;;  %v1359_v2 = vpack.i.b16 %v1350_v60, %v1325_v63 }
 0x2cf   : > { %2459 = vmatpush3.bf16.xpose.msra.mxu1 %v1464_v58  ;;  %2460 = vmatprep.mubr.msk.bf16.mxu1 %vm2764_vm1, %v2763_v13 }
 0x2d0   : > { %2455 = vmatmul.mubr.msk.bf16.vlgmr.msra.gmra.mxu0 %vm1367_vm3, %v1356_v59  ;;  %2470 = vmatprep.subr.bf16.mxu1 %v2763_v13  ;;  %v1362_v4 = vpack.i.b16 %v1361_v0, %v1360_v3 }
 0x2d1   : > { %2465 = vmatpush3.bf16.xpose.msra.mxu0 %v1510_v61  ;;  %2466 = vmatprep.mubr.msk.bf16.mxu0 %vm2764_vm1, %v2763_v13 }
 0x2d2   : > { %2476 = vmatprep.subr.bf16.mxu0 %v2763_v13 }
 0x2d6   : > { %2461 = vmatmul.mubr.msk.bf16.vlgmr.msra.gmra.mxu1 %vm1367_vm3, %v1359_v2 }
 0x2d7   : > { %2472 = vmatprep.mubr.msk.bf16.mxu1 %vm2764_vm1, %v2763_v13 }
 0x2d8   : > { %2467 = vmatmul.mubr.msk.bf16.vlgmr.msra.gmra.mxu0 %vm1367_vm3, %v1362_v4 }
 0x2d9   : > { %2478 = vmatprep.mubr.msk.bf16.mxu0 %vm2764_vm1, %v2763_v13 }
 0x38e   : > { %v1408_v5 = vpop.f32.mrf.mxu1 }
 0x38f   : > { %v1552_v6 = vmul.f32 0.35355338, %v1408_v5 }
 0x390   : > { %v2450_v7 = vpop.f32.mrf.mxu1  ;;  %v1454_v8 = vpop.f32.mrf.mxu0 }
 0x391   : > { %v1553_v9 = vmul.f32 0.35355338, %v1454_v8  ;;  %v1556_v10 = vsel %vm1367_vm3, %v1552_v6, -inf }
 0x392   : > { %1557 = vmax.xlane.f32.xlu0 %v1556_v10  ;;  %v1411_v11 = vpop.f32.mrf.mxu1  ;;  %v2456_v12 = vpop.f32.mrf.mxu0 }
 0x393   : > { %v1559_v14 = vsel %vm1367_vm3, %v1553_v9, -inf }
 0x394   : > { %v2451_v16 = vpop.f32.mrf.mxu1  ;;  %1560 = vmax.xlane.f32.xlu1 %v1559_v14  ;;  %v1457_v17 = vpop.f32.mrf.mxu0 }
 0x396   : > { %v2457_v18 = vpop.f32.mrf.mxu0  ;;  %v1500_v19 = vpop.f32.mrf.mxu1 }
 0x397   : > { %v1554_v20 = vmul.f32 0.35355338, %v1500_v19 }
 0x398   : > { %v2462_v21 = vpop.f32.mrf.mxu1  ;;  %v1546_v22 = vpop.f32.mrf.mxu0 }
 0x399   : > { %v1555_v23 = vmul.f32 0.35355338, %v1546_v22  ;;  %v1562_v24 = vsel %vm1367_vm3, %v1554_v20, -inf }
 0x39a   : > { %1563 = vmax.xlane.f32.xlu0 %v1562_v24  ;;  %v1503_v25 = vpop.f32.mrf.mxu1  ;;  %v2468_v26 = vpop.f32.mrf.mxu0 }
 0x39b   : > { %v1565_v30 = vsel %vm1367_vm3, %v1555_v23, -inf }
 0x39c   : > { %v2463_v28 = vpop.f32.mrf.mxu1  ;;  %v1549_v29 = vpop.f32.mrf.mxu0 }
 0x39e   : > { %1566 = vmax.xlane.f32.xlu0 %v1565_v30  ;;  %v2469_v31 = vpop.f32.mrf.mxu0 }
 0x3a5   : > { %922 = vrot.lane.b32.xlu1 %v741_v33, %s2765_s23  ;;  %s2772_s23 = smov 8  }
 0x3a9   : > { %924 = vrot.lane.b32.xlu1 %v741_v33, %s2767_s0 }
 0x3b4   : > { %920 = vrot.lane.b32.xlu0 %v741_v33, %s2766_s20  ;;  %s2773_s20 = smov 24  }
 0x41b   : > { %v1558_v34 = vpop.xlane.xlu0 %1557 }
 0x41c   : > { %v1568_v35 = vsub.f32 %v1552_v6, %v1558_v34 }
 0x41d   : > { %v1561_v36 = vpop.xlane.xlu1 %1560 }
 0x41e   : > { %v1572_v37 = vmul.f32 1.442695, %v1568_v35  ;;  %v1569_v38 = vsub.f32 %v1553_v9, %v1561_v36 }
 0x420   : > { %2631 = vpow2.f32 %v1572_v37  ;;  %v1574_v39 = vmul.f32 1.442695, %v1569_v38 }
 0x421   : > { %v923_v40 = vpop.permute.xlu1 %922 }
 0x422   : > { %2633 = vpow2.f32 %v1574_v39  ;;  %v940_v41 = vrot.slane %v923_v40, %v3011_v62 }
 0x423   : > { %v1564_v42 = vpop.xlane.xlu0 %1563 }
 0x424   : > { %v1570_v44 = vsub.f32 %v1554_v20, %v1564_v42  ;;  %v941_v46 = vcombine.low %v932_v43, %v940_v41  ;;  %v942_v48 = vcombine.high %v932_v43, %v940_v41 }
 0x425   : > { %v925_v49 = vpop.permute.xlu1 %924 }
 0x426   : > { %v1576_v45 = vmul.f32 1.442695, %v1570_v44  ;;  %v949_v51 = vrot.slane %v941_v46, %v3013_v1  ;;  %v974_v55 = vrot.slane %v925_v49, %v3011_v62  ;;  %v956_v52 = vrot.slane %v942_v48, %v3013_v1 }
 0x427   : > { %v1567_v47 = vpop.xlane.xlu0 %1566 }
 0x428   : > { %2635 = vpow2.f32 %v1576_v45  ;;  %v1571_v50 = vsub.f32 %v1555_v23, %v1567_v47  ;;  %v957_v63 = vcombine.high %v949_v51, %v2770_v15  ;;  %v958_v4 = vcombine.high %v956_v52, %v2770_v15 }
 0x429   : > { %v997_v5 = vshrl.u32 %v949_v51, 16  ;;  %v1013_v11 = vshrl.u32 %v956_v52, 16 }
 0x42a   : > { %v1578_v53 = vmul.f32 1.442695, %v1571_v50  ;;  %v1005_v10 = vshrl.u32 %v957_v63, 16  ;;  %v1021_v20 = vshrl.u32 %v958_v4, 16 }
 0x42b   : > { %v921_v54 = vpop.permute.xlu0 %920 }
 0x42c   : > { %v966_v56 = vrot.slane %v921_v54, %v3011_v62  ;;  %2637 = vpow2.f32 %v1578_v53 }
 0x42d   : > { %v3095_v57 = vpop.eup %2631 }
 0x42e   : > { %v975_v58 = vcombine.low %v966_v56, %v974_v55  ;;  %v976_v59 = vcombine.high %v966_v56, %v974_v55  ;;  %v1580_v60 = vsel %vm1367_vm3, %v3095_v57, 0.0 }
 0x42f   : > { %v3100_v61 = vpop.eup %2633  ;;  %1581 = vadd.xlane.f32.xlu1 %v1580_v60 }
 0x430   : > { %v983_v0 = vrot.slane %v975_v58, %v3013_v1  ;;  %v990_v2 = vrot.slane %v976_v59, %v3013_v1  ;;  %v1583_v3 = vsel %vm1367_vm3, %v3100_v61, 0.0 }
 0x431   : > { %1584 = vadd.xlane.f32.xlu0 %v1583_v3 }
 0x432   : > { %v991_v6 = vcombine.high %v983_v0, %v2770_v15  ;;  %v992_v7 = vcombine.high %v990_v2, %v2770_v15  ;;  %v995_v8 = vpack.i.b16 %v983_v0, %v949_v51  ;;  %v998_v9 = vshrl.u32 %v983_v0, 16 }
 0x433   : > { %v1011_v12 = vpack.i.b16 %v990_v2, %v956_v52  ;;  %v1014_v14 = vshrl.u32 %v990_v2, 16 }
 0x434   : > { %v999_v16 = vpack.i.b16 %v998_v9, %v997_v5  ;;  %v1003_v17 = vpack.i.b16 %v991_v6, %v957_v63  ;;  %v1006_v18 = vshrl.u32 %v991_v6, 16  ;;  %v1019_v19 = vpack.i.b16 %v992_v7, %v958_v4 }
 0x435   : > { %v1015_v21 = vpack.i.b16 %v1014_v14, %v1013_v11  ;;  %v1022_v22 = vshrl.u32 %v992_v7, 16  ;;  %v1025_v23 = vcombine.low %v995_v8, %v1011_v12  ;;  %v3110_v24 = vpop.eup %2635 }
 0x436   : > { %v1007_v25 = vpack.i.b16 %v1006_v18, %v1005_v10  ;;  %v1033_v26 = vcombine.low %v1003_v17, %v1019_v19  ;;  %v1586_v29 = vsel %vm1367_vm3, %v3110_v24, 0.0 }
 0x437   : > { %v1023_v27 = vpack.i.b16 %v1022_v22, %v1021_v20  ;;  %v1050_v28 = vcombine.low %v999_v16, %v1015_v21  ;;  %v1032_v30 = vrot.slane %v1025_v23, %v3011_v62  ;;  %1587 = vadd.xlane.f32.xlu0 %v1586_v29 }
 0x438   : > { %v1040_v31 = vrot.slane %v1033_v26, %v3011_v62 }
 0x439   : > { %v1058_v32 = vcombine.low %v1007_v25, %v1023_v27  ;;  %v3116_v33 = vpop.eup %2637  ;;  %v1057_v35 = vrot.slane %v1050_v28, %v3011_v62 }
 0x43a   : > { %v1041_v34 = vcombine.low %v1032_v30, %v1040_v31  ;;  %v1589_v37 = vsel %vm1367_vm3, %v3116_v33, 0.0 }
 0x43b   : > { %v1065_v36 = vrot.slane %v1058_v32, %v3011_v62  ;;  %1590 = vadd.xlane.f32.xlu0 %v1589_v37 }
 0x43c   : > { %v1048_v38 = vrot.slane %v1041_v34, %v3013_v1 }
 0x43d   : > { %v1066_v39 = vcombine.low %v1057_v35, %v1065_v36 }
 0x43e   : > { %v1049_v40 = vcombine.high %v1048_v38, %v2770_v15  ;;  %v1079_v43 = vshrl.u32 %v1048_v38, 16 }
 0x43f   : > { %v1073_v41 = vrot.slane %v1066_v39, %v3013_v1 }
 0x440   : > { %v1087_v48 = vshrl.u32 %v1049_v40, 16 }
 0x441   : > { %v1074_v42 = vcombine.high %v1073_v41, %v2770_v15  ;;  %v1077_v44 = vpack.i.b16 %v1073_v41, %v1048_v38  ;;  %v1080_v45 = vshrl.u32 %v1073_v41, 16  ;;  %v2615_v41 = vld [vmem:[%s3299_s9 + $0x8] sm:$0xff]  }
 0x443   : > { %v1081_v46 = vpack.i.b16 %v1080_v45, %v1079_v43  ;;  %v1085_v47 = vpack.i.b16 %v1074_v42, %v1049_v40  ;;  %v1088_v49 = vshrl.u32 %v1074_v42, 16  ;;  %1091 = vst.msk [vmem:[#allocation3] sm:$0xf] %vm914_vm2, %v1077_v44 }
 0x445   : > { %v1089_v50 = vpack.i.b16 %v1088_v49, %v1087_v48  ;;  %1092 = vst.msk [vmem:[#allocation3 + $0x4] sm:$0xf] %vm914_vm2, %v1081_v46  ;;  %1093 = vst.msk [vmem:[#allocation3 + $0x8] sm:$0xf] %vm914_vm2, %v1085_v47 }
 0x447   : > { %1094 = vst.msk [vmem:[#allocation3 + $0xc] sm:$0xf] %vm914_vm2, %v1089_v50 }
 0x44a   : > { %v1604_v51 = vld [vmem:[#allocation3] sm:$0xf] }
 0x44b   : > { %v1613_v15 = vsel %vm1611_vm4, %v1604_v51, 0  ;;  %v2616_v51 = vld [vmem:[%s3299_s9] sm:$0xff]  }
 0x44c   : > { %2471 = vmatpush3.bf16.msra.mxu1 %v1613_v15  ;;  %v1605_v53 = vld [vmem:[#allocation3 + $0x4] sm:$0xf]  ;;  %v1606_v0 = vld [vmem:[#allocation3 + $0x8] sm:$0xf] }
 0x44d   : > { %v1659_v54 = vsel %vm1611_vm4, %v1605_v53, 0  ;;  %2482 = vmatprep.subr.bf16.mxu1 %v2763_v13  ;;  %v1705_v5 = vsel %vm1611_vm4, %v1606_v0, 0 }
 0x44e   : > { %2477 = vmatpush3.bf16.msra.mxu0 %v1659_v54  ;;  %v1607_v4 = vld [vmem:[#allocation3 + $0xc] sm:$0xf] }
 0x44f   : > { %2488 = vmatprep.subr.bf16.mxu0 %v2763_v13  ;;  %v1751_v7 = vsel %vm1611_vm4, %v1607_v4, 0 }
 0x4b8   : > { %v1582_v55 = vpop.xlane.xlu1 %1581 }
 0x4b9   : > { %2639 = vrcp.f32 %v1582_v55 }
 0x4ba   : > { %v1585_v56 = vpop.xlane.xlu0 %1584 }
 0x4bb   : > { %2641 = vrcp.f32 %v1585_v56 }
 0x4c0   : > { %v1588_v52 = vpop.xlane.xlu0 %1587 }
 0x4c1   : > { %2643 = vrcp.f32 %v1588_v52 }
 0x4c4   : > { %v1591_v58 = vpop.xlane.xlu0 %1590 }
 0x4c5   : > { %2645 = vrcp.f32 %v1591_v58 }
 0x4c6   : > { %v2640_v59 = vpop.eup %2639 }
 0x4c7   : > { %v1596_v60 = vmul.f32 %v2640_v59, %v3095_v57 }
 0x4c8   : > { %v2642_v63 = vpop.eup %2641 }
 0x4c9   : > { %v1600_v2 = vpack.c.bf16 %v1596_v60, %v1596_v60  ;;  %v1597_v3 = vmul.f32 %v2642_v63, %v3100_v61 }
 0x4cb   : > { %2473 = vmatmul.mubr.msk.bf16.vlgmr.msra.gmra.mxu1 %vm1367_vm3, %v1600_v2  ;;  %v1601_v6 = vpack.c.bf16 %v1597_v3, %v1597_v3 }
 0x4cc   : > { %2483 = vmatpush3.bf16.msra.mxu1 %v1705_v5  ;;  %2484 = vmatprep.mubr.msk.bf16.mxu1 %vm2764_vm1, %v2763_v13 }
 0x4cd   : > { %2479 = vmatmul.mubr.msk.bf16.vlgmr.msra.gmra.mxu0 %vm1367_vm3, %v1601_v6  ;;  %2494 = vmatprep.subr.bf16.mxu1 %v2763_v13 }
 0x4ce   : > { %2489 = vmatpush3.bf16.msra.mxu0 %v1751_v7  ;;  %2490 = vmatprep.mubr.msk.bf16.mxu0 %vm2764_vm1, %v2763_v13  ;;  %v2644_v57 = vpop.eup %2643 }
 0x4cf   : > { %2502 = vmatprep.subr.bf16.mxu0 %v2763_v13  ;;  %v1598_v61 = vmul.f32 %v2644_v57, %v3110_v24 }
 0x4d1   : > { %v1602_v8 = vpack.c.bf16 %v1598_v61, %v1598_v61 }
 0x4d2   : > { %v2646_v9 = vpop.eup %2645 }
 0x4d3   : > { %2485 = vmatmul.mubr.msk.bf16.vlgmr.msra.gmra.mxu1 %vm1367_vm3, %v1602_v8  ;;  %v1599_v10 = vmul.f32 %v2646_v9, %v3116_v33 }
 0x4d4   : > { %2498 = vmatprep.mubr.msk.bf16.mxu1 %vm2764_vm1, %v2763_v13  ;;  %2495 = vmatpush3.bf16.msra.mxu1 %v2615_v41  ;;  %v2622_v41 = vld [vmem:[%s3305_s15 + $0x20] sm:$0xff]  }
 0x4d5   : > { %v1603_v11 = vpack.c.bf16 %v1599_v10, %v1599_v10  ;;  %2496 = vmatprep.subr.bf16.mxu1 %v2763_v13  ;;  %v2357_v10 = vld [vmem:[%s3300_s10] ss:$0 sm:$0xff] }
 0x4d7   : > { %2491 = vmatmul.mubr.msk.bf16.vlgmr.msra.gmra.mxu0 %vm1367_vm3, %v1603_v11 }
 0x4d8   : > { %2506 = vmatprep.mubr.msk.bf16.mxu0 %vm2764_vm1, %v2763_v13  ;;  %2497 = vmatpush3.bf16.msra.mxu1 %v2616_v51 }
 0x4d9   : > { %2510 = vmatprep.subr.bf16.mxu1 %v2763_v13 }
 0x58b   : > { %v1649_v12 = vpop.f32.mrf.mxu1 }
 0x58d   : > { %v2474_v14 = vpop.f32.mrf.mxu1  ;;  %v1695_v16 = vpop.f32.mrf.mxu0 }
 0x58f   : > { %v1652_v17 = vpop.f32.mrf.mxu1  ;;  %v2480_v18 = vpop.f32.mrf.mxu0 }
 0x591   : > { %v2475_v19 = vpop.f32.mrf.mxu1  ;;  %v1698_v20 = vpop.f32.mrf.mxu0 }
 0x593   : > { %v2481_v21 = vpop.f32.mrf.mxu0  ;;  %v1741_v22 = vpop.f32.mrf.mxu1 }
 0x594   : > { %v1793_v24 = vcombine.low %v1649_v12, %v1741_v22  ;;  %v1794_v25 = vcombine.high %v1649_v12, %v1741_v22 }
 0x595   : > { %v2486_v23 = vpop.f32.mrf.mxu1 }
 0x596   : > { %v1801_v32 = vrot.slane %v1793_v24, %v3011_v62  ;;  %v1808_v33 = vrot.slane %v1794_v25, %v3011_v62 }
 0x597   : > { %v1744_v26 = vpop.f32.mrf.mxu1  ;;  %v1787_v27 = vpop.f32.mrf.mxu0 }
 0x598   : > { %v1809_v28 = vcombine.low %v1695_v16, %v1787_v27  ;;  %v1810_v29 = vcombine.high %v1695_v16, %v1787_v27  ;;  %v2651_v16 = vld [vmem:[%s2946_s17] sm:$0xff]  ;;  %v2617_v26 = vld [vmem:[#allocation4 + $0x8] sm:$0xff]   ;;  %s2377_s17 = sshll.u32 %s2750_s27, 7 }
 0x599   : > { %v2487_v30 = vpop.f32.mrf.mxu1  ;;  %v2492_v31 = vpop.f32.mrf.mxu0  ;;  %2503 = vmatpush3.bf16.msra.mxu0 %v2617_v26  ;;  %v2618_v27 = vld [vmem:[#allocation4] sm:$0xff]   ;;  %s3243_s21 = scalar_lea.hbm %s3332_s29, %s2377_s17 }
 0x59a   : > { %v1817_v34 = vrot.slane %v1809_v28, %v3011_v62  ;;  %v1824_v35 = vrot.slane %v1810_v29, %v3011_v62  ;;  %2504 = vmatprep.subr.bf16.mxu0 %v2763_v13  ;;  %v2619_v28 = vld [vmem:[%s3305_s15 + $0x38] sm:$0xff]   ;;  %v2620_v29 = vld [vmem:[%s3305_s15 + $0x30] sm:$0xff]  }
 0x59b   : > { %v1790_v36 = vpop.f32.mrf.mxu0 }
 0x59c   : > { %v1825_v37 = vcombine.low %v1801_v32, %v1817_v34  ;;  %v1826_v38 = vcombine.high %v1801_v32, %v1817_v34  ;;  %v1841_v39 = vcombine.low %v1808_v33, %v1824_v35  ;;  %v1842_v40 = vcombine.high %v1808_v33, %v1824_v35  ;;  %v2361_v34 = vld [vmem:[%s3301_s11] ss:$0 sm:$0xff] }
 0x59d   : > { %v2493_v42 = vpop.f32.mrf.mxu0  ;;  %2505 = vmatpush3.bf16.msra.mxu0 %v2618_v27  ;;  %v2362_v36 = vld [vmem:[%s3302_s12] ss:$0 sm:$0xff] }
 0x59e   : > { %v1833_v44 = vrot.slane %v1825_v37, %v3013_v1  ;;  %v1840_v43 = vrot.slane %v1826_v38, %v3013_v1  ;;  %v1849_v45 = vrot.slane %v1841_v39, %v3013_v1  ;;  %v1856_v46 = vrot.slane %v1842_v40, %v3013_v1  ;;  %v2621_v40 = vld [vmem:[%s3305_s15 + $0x28] sm:$0xff]   ;;  %v2623_v42 = vld [vmem:[%s3305_s15 + $0x18] sm:$0xff]  }
 0x5a0   : > { %v1861_v47 = vcombine.low %v1833_v44, %v1840_v43  ;;  %v2355_v48 = vcombine.high %v1833_v44, %v1840_v43  ;;  %v1877_v49 = vcombine.low %v1849_v45, %v1856_v46  ;;  %v2356_v50 = vcombine.high %v1849_v45, %v1856_v46  ;;  %v2624_v44 = vld [vmem:[%s3305_s15 + $0x10] sm:$0xff]   ;;  %v2625_v43 = vld [vmem:[%s3305_s15 + $0x8] sm:$0xff]   ;;  %v2626_v45 = vld [vmem:[%s3305_s15] sm:$0xff]  }
 0x5a1   : > { %v2363_v46 = vld [vmem:[%s3304_s14] ss:$0 sm:$0xff] }
 0x5a2   : > { %v1868_v15 = vrot.slane %v1861_v47, %v3011_v62  ;;  %v1876_v53 = vrot.slane %v2355_v48, %v3011_v62  ;;  %v1884_v54 = vrot.slane %v1877_v49, %v3011_v62  ;;  %v1892_v55 = vrot.slane %v2356_v50, %v3011_v62 }
 0x5a4   : > { %v1894_v56 = vcombine.high %v1868_v15, %v1876_v53  ;;  %v1910_v52 = vcombine.high %v1884_v54, %v1892_v55  ;;  %v1893_v58 = vcombine.low %v1868_v15, %v1876_v53  ;;  %v1909_v59 = vcombine.low %v1884_v54, %v1892_v55 }
 0x5a6   : > { %v1908_v60 = vrot.slane %v1894_v56, %v3013_v1  ;;  %v1924_v63 = vrot.slane %v1910_v52, %v3013_v1  ;;  %v1901_v0 = vrot.slane %v1893_v58, %v3013_v1  ;;  %v1917_v2 = vrot.slane %v1909_v59, %v3013_v1  ;;  %v2367_v52 = vld [vmem:[%s3306_s16] ss:$0 sm:$0xff] }
 0x5a8   : > { %v1927_v3 = vcombine.low %v1908_v60, %v1924_v63  ;;  %v1926_v4 = vcombine.high %v1901_v0, %v1917_v2  ;;  %v1925_v5 = vcombine.low %v1901_v0, %v1917_v2  ;;  %v1928_v62 = vcombine.high %v1908_v60, %v1924_v63 }
 0x5aa   : > { %1934 = vrot.lane.b32.xlu0 %v1927_v3, %s2771_s22  ;;  %1930 = vrot.lane.b32.xlu1 %v1926_v4, %s2772_s23  ;;  %s566_s23 = sand.u32 1, %s2742_s25  }
 0x5ab   : > { %s2230_s27 = scalar_lea.sflag [#allocation6], %s566_s23 }
 0x5ae   : > { %1938 = vrot.lane.b32.xlu1 %v1928_v62, %s2773_s20  ;;  %s2333_s20 = sshll.u32 %s566_s23, 3 }
 0x5af   : > { %s568_s19 = scalar_lea.vmem [#allocation7], %s2333_s20  ;;  %s2774_s20 = smov [#allocation7]  }
 0x5b0   : > { %s2244_s24 = sshll.u32 %s568_s19, 4  ;;  %s2682_s0 = sshll.u32 %s2774_s20, 4  ;;  %s3245_s24 = int_to_ptr.vmem [resolvable:$true] %s2244_s24  ;;  %s2683_s0 = int_to_ptr.vmem [resolvable:$false] %s2682_s0 }
 0x5b1   : > { %s2678_s22 = scalar_lea.vmem %s3245_s24, 128  ;;  %s2684_s30 = scalar_lea.vmem %s2683_s0, 256 }
 0x5b2   : > { %p2679_p10 = scmp.ne.s32.totalorder %s3245_s24, %s2678_s22  ;;  %p2685_p0 = scmp.lt.s32.totalorder %s3245_s24, %s2683_s0 }
 0x5b3   : > { %p2686_p1 = scmp.lt.s32.totalorder %s2684_s30, %s2678_s22 }
 0x5b4   : > { %p2680_p11 = pnand %p2679_p10, %p2905_p4 }
 0x5b5   : > { %p2687_p2 = por %p2686_p1, %p2685_p0 }
 0x5b6   : > { %p2681_p13 = pneg %p2680_p11 }
 0x5b8   : > { %p2688_p3 = pnand %p2687_p2, %p2681_p13 }
 0x61c   : > { %v1931_v6 = vpop.permute.xlu1 %1930  ;;  %v1935_v7 = vpop.permute.xlu0 %1934 }
 0x61d   : > { %v1941_v57 = vsel %vm1367_vm3, %v1925_v5, %v1931_v6 }
 0x61e   : > { %v1943_v8 = vsel %vm1942_vm5, %v1941_v57, %v1935_v7 }
 0x620   : > { %v1939_v61 = vpop.permute.xlu1 %1938 }
 0x621   : > { %v1945_v1 = vsel %vm1944_vm6, %v1943_v8, %v1939_v61 }
 0x622   : > { %v1946_v9 = vpack.c.bf16 %v1945_v1, %v1945_v1 }
 0x624   : > { %2499 = vmatmul.mubr.msk.bf16.vlgmr.msra.gmra.mxu1 %vm581_vm0, %v1946_v9 }
 0x625   : > { %2526 = vmatprep.mubr.msk.bf16.mxu1 %vm2764_vm1, %v2763_v13  ;;  %2511 = vmatpush3.bf16.msra.mxu1 %v2619_v28 }
 0x626   : > { %2512 = vmatprep.subr.bf16.mxu1 %v2763_v13 }
 0x629   : > { %2513 = vmatpush3.bf16.msra.mxu1 %v2620_v29 }
 0x62a   : > { %2514 = vmatprep.subr.bf16.mxu1 %v2763_v13 }
 0x62d   : > { %2515 = vmatpush3.bf16.msra.mxu1 %v2621_v40 }
 0x62e   : > { %2516 = vmatprep.subr.bf16.mxu1 %v2763_v13 }
 0x631   : > { %2517 = vmatpush3.bf16.msra.mxu1 %v2622_v41 }
 0x632   : > { %2518 = vmatprep.subr.bf16.mxu1 %v2763_v13 }
 0x635   : > { %2519 = vmatpush3.bf16.msra.mxu1 %v2623_v42 }
 0x636   : > { %2520 = vmatprep.subr.bf16.mxu1 %v2763_v13 }
 0x639   : > { %2521 = vmatpush3.bf16.msra.mxu1 %v2624_v44 }
 0x63a   : > { %2522 = vmatprep.subr.bf16.mxu1 %v2763_v13 }
 0x63d   : > { %2523 = vmatpush3.bf16.msra.mxu1 %v2625_v43 }
 0x63e   : > { %2524 = vmatprep.subr.bf16.mxu1 %v2763_v13 }
 0x641   : > { %2525 = vmatpush3.bf16.msra.mxu1 %v2626_v45 }
 0x6e4   : > { %v2007_v11 = vpop.f32.mrf.mxu1 }
 0x6e5   : > { %v2008_v12 = vadd.f32 %v2357_v10, %v2007_v11 }
 0x6e6   : > { %v2500_v14 = vpop.f32.mrf.mxu1 }
 0x6e7   : > { %v3186_v17 = vadd.f32 %v2651_v16, %v2008_v12 }
 0x6e8   : > { %v2010_v18 = vpop.f32.mrf.mxu1 }
 0x6e9   : > { %v2016_v19 = vsel %vm581_vm0, %v3186_v17, 0.0 }
 0x6ea   : > { %2017 = vadd.xlane.f32.xlu1 %v2016_v19  ;;  %v2501_v20 = vpop.f32.mrf.mxu1 }
 0x773   : > { %v2018_v21 = vpop.xlane.xlu1 %2017 }
 0x774   : > { %v2019_v22 = vmul.f32 0.03125, %v2018_v21 }
 0x776   : > { %v2020_v23 = vsub.f32 %v3186_v17, %v2019_v22 }
 0x778   : > { %v2021_v24 = vmul.f32 %v2020_v23, %v2020_v23 }
 0x77a   : > { %v2022_v25 = vsel %vm581_vm0, %v2021_v24, 0.0 }
 0x77b   : > { %2023 = vadd.xlane.f32.xlu0 %v2022_v25 }
 0x804   : > { %v2024_v30 = vpop.xlane.xlu0 %2023 }
 0x805   : > { %v2025_v31 = vmul.f32 0.03125, %v2024_v30 }
 0x807   : > { %v2026_v32 = vadd.f32 1e-05, %v2025_v31 }
 0x809   : > { %2647 = vrsqrt.f32 %v2026_v32 }
 0x816   : > { %v2648_v33 = vpop.eup %2647 }
 0x817   : > { %v2028_v35 = vmul.f32 %v2648_v33, %v2020_v23 }
 0x819   : > { %v2035_v37 = vmul.f32 %v2361_v34, %v2028_v35 }
 0x81b   : > { %v2042_v38 = vadd.f32 %v2362_v36, %v2035_v37 }
 0x81d   : > { %v2043_v39 = vpack.c.bf16 %v2042_v38, %v2042_v38 }
 0x81f   : > { %2507 = vmatmul.mubr.msk.bf16.vlgmr.msra.gmra.mxu0 %vm581_vm0, %v2043_v39 }
 0x8df   : > { %v2104_v47 = vpop.f32.mrf.mxu0 }
 0x8e0   : > { %v2105_v48 = vadd.f32 %v2363_v46, %v2104_v47 }
 0x8e1   : > { %v2508_v49 = vpop.f32.mrf.mxu0 }
 0x8e2   : > { %v2111_v50 = vmul.f32 0.70710677, %v2105_v48  ;;  %v2110_v13 = vmul.f32 0.5, %v2105_v48 }
 0x8e3   : > { %v2107_v51 = vpop.f32.mrf.mxu0 }
 0x8e4   : > { %2649 = verf.f32 %v2111_v50 }
 0x8e5   : > { %v2509_v15 = vpop.f32.mrf.mxu0 }
 0x8f1   : > { %v2650_v53 = vpop.eup %2649 }
 0x8f2   : > { %v2113_v54 = vadd.f32 1.0, %v2650_v53 }
 0x8f4   : > { %v2114_v55 = vmul.f32 %v2113_v54, %v2110_v13 }
 0x8f6   : > { %v2115_v56 = vpack.c.bf16 %v2114_v55, %v2114_v55 }
 0x8f8   : > { %2527 = vmatmul.mubr.bf16.vlgmr.msra.gmra.mxu1 %v2115_v56 }
 0x9b8   : > { %v2221_v58 = vpop.f32.mrf.mxu1 }
 0x9b9   : > { %v2222_v59 = vadd.f32 %v2367_v52, %v2221_v58 }
 0x9ba   : > { %v2528_v60 = vpop.f32.mrf.mxu1 }
 0x9bb   : > { %v2227_v63 = vadd.f32 %v2222_v59, %v3186_v17 }
 0x9bc   : > { %v2224_v0 = vpop.f32.mrf.mxu1 }
 0x9bd   : > { %2228 = vst.msk [vmem:[%s568_s19] sm:$0xff] %vm581_vm0, %v2227_v63 }
 0x9be   : > { %v2529_v2 = vpop.f32.mrf.mxu1 }
 0x9bf   : > { %2691 = shalt.err (!%p2688_p3)
}
 0x9c0   : > { %s2692_s17 = scalar_lea.hbm %s3243_s21, 128  ;;  %s2696_s26 = scalar_lea.hbm %s3333_s18, 256 }
 0x9c1   : > { %p2693_p5 = scmp.ne.s32.totalorder %s3243_s21, %s2692_s17  ;;  %p2697_p9 = scmp.lt.s32.totalorder %s3243_s21, %s3333_s18 }
 0x9c2   : > { %p2698_p12 = scmp.lt.s32.totalorder %s2696_s26, %s2692_s17 }
 0x9c3   : > { %p2694_p6 = pnand %p2693_p5, %p2905_p4 }
 0x9c4   : > { %p2699_p10 = por %p2698_p12, %p2697_p9 }
 0x9c5   : > { %p2695_p7 = pneg %p2694_p6 }
 0x9c7   : > { %p2700_p11 = pnand %p2699_p10, %p2695_p7 }
 0x9c9   : > { %2703 = shalt.err (!%p2700_p11)
}
 0x9ca   : > { %2534 = dma.vmem_to_hbm [thread:$0]  (%p2905_p4), %s3245_s24, 128, %s3243_s21, %s2230_s27  }
 0x9cb PF: > { %s3334_s22 = sld [smem:[#allocation13_spill]] }
 0x9cc   : > { %s3335_s20 = sld [smem:[#allocation10_spill]] }
 0x9d1   : > { %p2546_p13 = scmp.ge.s32.totalorder %s3334_s22, 2 }
 0x9d2   : > { %s2256_s30 = sand.u32 1, %s3335_s20  }
 0x9d3   : > { %p2541_p0 = pnand %p2546_p13, %p2912_p8  ;;  %s2257_s23 = scalar_lea.sflag [#allocation6], %s2256_s30 }
 0x9d5   : > { %p2542_p1 = pneg %p2541_p0 }
 0x9d7   : > { %2733 = dma.done.wait (%p2542_p1), %s2257_s23, 128  }
 0x9d8   : > { %2735 = vsyncadd (%p2542_p1), %s2257_s23, 4294967168  ;;  %s31_s29 = sadd.s32 1, %s3334_s22   ;;  %s3337_s1 = sld [smem:[#allocation11_spill]] }
 0x9d9   : > { %p28_p2 = scmp.ge.s32.totalorder %s31_s29, 4   ;;  %s3338_s26 = sld [smem:[#allocation16_spill]] }
 0x9da   : > { %s3339_s27 = sld [smem:[#allocation12_spill]]  ;;  %s3341_s24 = smov %s2742_s25 }
 0x9db   : > { %s3340_s28 = sld [smem:[#allocation14_spill]]  ;;  %30 = sbr.rel (!%p28_p2) target bundleno = 9 (0x9), region = 133 }
 0x9de   : > { %s3342_s25 = smov %s3337_s1 }
 0x9e0   :  { %2262 = vsyncpa [#allocation5], 1 }
 0x9e1   :  { %2264 = vsyncpa [#allocation5 + $0x1], 1 }
 0x9e2   :  { %2265 = vsyncpa [#allocation6], 1 }
 0x9e3   :  { %2267 = vsyncpa [#allocation6 + $0x1], 1 }

</bundles_post_ra>
